<compile_context>
chip_gen: v7x
topology: tpu7x:2x2x1
jax: 0.10.0
libtpu: 0.0.40
codegen_flags: <defaults>
</compile_context>

<pallas_src>
import functools
import math

import jax
import jax.numpy as jnp
from jax.experimental import pallas as pl
from jax.experimental.pallas import tpu as pltpu


def _weight_pipeline_kwargs():
    """Single-buffer the resident weights (constant index map => the block
    never changes, so double buffering only wastes VMEM; this matters at
    production H/out_dim on v7x's 64 MiB VMEM).  Guarded so the script still
    runs on jax versions without pl.Buffered / the pipeline_mode kwarg."""
    if not hasattr(pl, "Buffered"):
        return {}
    try:
        pl.BlockSpec((8, 128), lambda i: (0, 0), pipeline_mode=pl.Buffered(1))
    except TypeError:
        return {}
    return {"pipeline_mode": pl.Buffered(1)}


def _global_attention_kernel(locx_ref, glox_ref,
                             wq_ref, bq_ref,
                             wkv_ref, bkv_ref,
                             wf_ref, bf_ref,
                             seg_ref,
                             out_ref,
                             sc_ref, ctx_ref,
                             *, num_heads, head_dim, exact_softmax):
    tb, sq, hidden = locx_ref.shape
    sk = glox_ref.shape[1]
    n = num_heads * sk
    cdt = wq_ref.dtype                       # MXU compute dtype (f32 or bf16)
    cast = (lambda a: a.astype(cdt)) if cdt != jnp.float32 else (lambda a: a)

    # Fold (batch_block, seq) -> M rows so the projections fill the MXU.
    x_loc = locx_ref[...].reshape(tb * sq, hidden)
    x_glo = glox_ref[...].reshape(tb * sk, hidden)
    if x_loc.dtype != cdt:                   # skipped entirely in f32 mode
        x_loc = x_loc.astype(cdt)
        x_glo = x_glo.astype(cdt)

    # Q projection (1/sqrt(D) pre-folded into wq/bq) and fused K|V projection
    # (one lane-dense N=2H matmul instead of two N=H ones); f32 accumulation.
    q = jnp.dot(x_loc, wq_ref[...], preferred_element_type=jnp.float32) + bq_ref[...]
    kv = jnp.dot(x_glo, wkv_ref[...], preferred_element_type=jnp.float32) + bkv_ref[...]

    q3 = cast(q).reshape(tb, sq, hidden)
    kv3 = cast(kv).reshape(tb, sk, 2 * hidden)
    k3 = kv3[:, :, :hidden]
    v3 = kv3[:, :, hidden:]

    # --- Attention core -----------------------------------------------------
    # Per-head scores (exact per-head max for numerical stability), packed
    # side by side into one (tb*Sq, nh*Sk) scratch so the expensive
    # elementwise path (exp / reciprocal / scaling) runs lane-dense once.
    for h in range(num_heads):
        lo = h * head_dim
        qh = q3[:, :, lo:lo + head_dim]                      # (tb, Sq, D)
        kh = k3[:, :, lo:lo + head_dim]                      # (tb, Sk, D)
        s = jnp.einsum("bqd,bkd->bqk", qh, kh,
                       preferred_element_type=jnp.float32)
        m = jnp.max(s, axis=-1, keepdims=True)
        sc_ref[:, h * sk:(h + 1) * sk] = (s - m).reshape(tb * sq, sk)

    e = jnp.exp(sc_ref[...])                                 # one dense exp
    # Per-head softmax denominators, broadcast back to every lane of the
    # head's segment with a single MXU matmul against a block-diag 0/1 matrix.
    denom = jnp.dot(e, seg_ref[...], preferred_element_type=jnp.float32)
    if exact_softmax:
        p = e / denom
    else:
        p = e * pl.reciprocal(denom, approx=True)            # EUP slot
    # attn_dropout is the identity (rate = 0.0).
    p3 = cast(p).reshape(tb, sq, n)

    # PV per head, written straight into the (tb*Sq, H) context scratch at the
    # head's lane offset (concat-free; matches permute(0,2,1,3).view(...,H)).
    for h in range(num_heads):
        lo = h * head_dim
        vh = v3[:, :, lo:lo + head_dim]                      # (tb, Sk, D)
        ph = p3[:, :, h * sk:(h + 1) * sk]                   # (tb, Sq, Sk)
        ctx_h = jnp.einsum("bqk,bkd->bqd", ph, vh,
                           preferred_element_type=jnp.float32)
        ctx_ref[:, lo:lo + head_dim] = ctx_h.reshape(tb * sq, head_dim)

    # Fused `out` + `output_proj` linear (exact: proj_dropout rate = 0.0),
    # lane-dense N = out_dim output.
    ctx = cast(ctx_ref[...])
    out = jnp.dot(ctx, wf_ref[...], preferred_element_type=jnp.float32) + bf_ref[...]
    out_ref[...] = out.reshape(out_ref.shape).astype(out_ref.dtype)


def prepare_global_attention_params(params, *, num_heads,
                                    compute_dtype=jnp.float32):
    """One-time weight preparation (hoisted out of the per-call path):
       * fold 1/sqrt(head_dim) into the query projection,
       * fuse K|V into one (H, 2H) weight,
       * algebraically fuse out + output_proj: wf = wo @ wp, bf = bo @ wp + bp
         (exact while both dropout rates are 0.0).
    Biases stay f32 — they are added to f32 accumulators in the kernel."""
    hidden = params["wq"].shape[0]
    head_dim = hidden // num_heads
    scale = 1.0 / math.sqrt(head_dim)
    return dict(
        wq=(params["wq"] * scale).astype(compute_dtype),
        bq=params["bq"] * scale,
        wkv=jnp.concatenate([params["wk"], params["wv"]], axis=1).astype(compute_dtype),
        bkv=jnp.concatenate([params["bk"], params["bv"]], axis=1),
        wf=(params["wo"] @ params["wp"]).astype(compute_dtype),
        bf=params["bo"] @ params["wp"] + params["bp"],
    )


def global_attention(locx, glox, prepared, *, num_heads,
                     batch_block=None, exact_softmax=False):
    B, Sq, H = locx.shape
    Bg, Sk, Hg = glox.shape
    assert (Bg, Hg) == (B, H)
    assert H % num_heads == 0
    head_dim = H // num_heads
    out_dim = prepared["wf"].shape[1]
    n = num_heads * Sk
    # Folding (tb, S) -> rows is layout-preserving only when S is a sublane
    # multiple.  TODO(synk): pad Sq/Sk up to a multiple of 8 in the wrapper.
    assert Sq % 8 == 0 and Sk % 8 == 0, (Sq, Sk)

    # Batch elements per grid step: target >=256 M rows for the projection
    # matmuls (v6e/v7x MXU is 2x256x256), but keep the grid length >= 2 when
    # B >= 2 so dimension_semantics=("parallel",) can feed both v7x cores.
    if batch_block is None:
        tb = min(B, max(1, pl.cdiv(256, Sq)))
        if B >= 2:
            tb = min(tb, B // 2)
        # TODO(synk): pad B instead of degrading towards tb=1 for awkward B.
        while B % tb:
            tb -= 1
    else:
        tb = batch_block
        assert B % tb == 0, (B, tb)
    grid = (B // tb,)

    # Block-diagonal 0/1 matrix: e @ seg gives each head's softmax
    # denominator broadcast to all Sk lanes of that head's segment.
    head_of_lane = jnp.arange(n, dtype=jnp.int32) // Sk
    seg = (head_of_lane[:, None] == head_of_lane[None, :]).astype(jnp.float32)

    kernel = functools.partial(_global_attention_kernel,
                               num_heads=num_heads, head_dim=head_dim,
                               exact_softmax=exact_softmax)

    def build(weight_kw):
        def wspec(shape):
            # Whole weight/bias resident every step (constant index map).
            return pl.BlockSpec(shape, lambda i: (0, 0), **weight_kw)

        return pl.pallas_call(
            kernel,
            out_shape=jax.ShapeDtypeStruct((B, Sq, out_dim), locx.dtype),
            grid=grid,
            in_specs=[
                pl.BlockSpec((tb, Sq, H), lambda i: (i, 0, 0)),   # locx
                pl.BlockSpec((tb, Sk, H), lambda i: (i, 0, 0)),   # glox
                wspec((H, H)), wspec((1, H)),                     # query (pre-scaled)
                wspec((H, 2 * H)), wspec((1, 2 * H)),             # fused key|value
                wspec((H, out_dim)), wspec((1, out_dim)),         # fused out+proj
                wspec((n, n)),                                    # segment-sum matrix
            ],
            out_specs=pl.BlockSpec((tb, Sq, out_dim), lambda i: (i, 0, 0)),
            scratch_shapes=[
                pltpu.VMEM((tb * Sq, n), jnp.float32),            # packed scores
                pltpu.VMEM((tb * Sq, H), jnp.float32),            # context (concat-free)
            ],
            compiler_params=pltpu.CompilerParams(
                dimension_semantics=("parallel",),
                # Default scoped VMEM (16/32 MiB) blocks larger batch blocks
                # at production sizes; 48 MiB stays under v7x's 64 MiB.
                vmem_limit_bytes=48 * 1024 * 1024,
            ),
        )

    args = (locx, glox,
            prepared["wq"], prepared["bq"],
            prepared["wkv"], prepared["bkv"],
            prepared["wf"], prepared["bf"],
            seg)

    weight_kw = _weight_pipeline_kwargs()
    try:
        return build(weight_kw)(*args)
    except Exception:
        if not weight_kw:
            raise
        return build({})(*args)   # fallback: double-buffered resident weights


def _reference(locx, glox, params, *, num_heads):
    """Pure-JAX reference mirroring the PyTorch forward (unfused linears)."""
    B, Sq, H = locx.shape
    Sk = glox.shape[1]
    D = H // num_heads

    q = locx @ params["wq"] + params["bq"][0]
    k = glox @ params["wk"] + params["bk"][0]
    v = glox @ params["wv"] + params["bv"][0]

    def split(x, S):
        return x.reshape(B, S, num_heads, D).transpose(0, 2, 1, 3)

    qh, kh, vh = split(q, Sq), split(k, Sk), split(v, Sk)
    scores = jnp.einsum("bhqd,bhkd->bhqk", qh, kh) / math.sqrt(D)
    probs = jax.nn.softmax(scores, axis=-1)
    ctx = jnp.einsum("bhqk,bhkd->bhqd", probs, vh)
    ctx = ctx.transpose(0, 2, 1, 3).reshape(B, Sq, H)
    attn_out = ctx @ params["wo"] + params["bo"][0]
    return attn_out @ params["wp"] + params["bp"][0]


def init_params(key, hidden, out_dim):
    """Deterministic synthetic parameters (nn.Linear shapes, pre-transposed)."""
    ks = jax.random.split(key, 10)
    s = 1.0 / math.sqrt(hidden)

    def lin(kw, kb, d_in, d_out):
        w = jax.random.uniform(kw, (d_in, d_out), jnp.float32, -s, s)
        b = jax.random.uniform(kb, (1, d_out), jnp.float32, -s, s)
        return w, b

    wq, bq = lin(ks[0], ks[1], hidden, hidden)
    wk, bk = lin(ks[2], ks[3], hidden, hidden)
    wv, bv = lin(ks[4], ks[5], hidden, hidden)
    wo, bo = lin(ks[6], ks[7], hidden, hidden)
    wp, bp = lin(ks[8], ks[9], hidden, out_dim)
    return dict(wq=wq, bq=bq, wk=wk, bk=bk, wv=wv, bv=bv,
                wo=wo, bo=bo, wp=wp, bp=bp)


if __name__ == "__main__":
    # Small shapes consistent with the module: hidden divisible by 8 heads,
    # output_proj -> 1024 as in the module.  Sq/Sk multiples of 8 (sublane).
    B, Sq, Sk = 2, 16, 8
    NUM_HEADS = 8
    HIDDEN = 64          # head_dim = 8
    OUT_DIM = 1024

    key = jax.random.PRNGKey(0)
    k_loc, k_glo, k_par = jax.random.split(key, 3)
    locx = jax.random.normal(k_loc, (B, Sq, HIDDEN), jnp.float32)
    glox = jax.random.normal(k_glo, (B, Sk, HIDDEN), jnp.float32)
    params = init_params(k_par, HIDDEN, OUT_DIM)

    ref = _reference(locx, glox, params, num_heads=NUM_HEADS)

    # f32 MXU path, exact softmax normalization.
    prep_f32 = prepare_global_attention_params(
        params, num_heads=NUM_HEADS, compute_dtype=jnp.float32)
    out = global_attention(locx, glox, prep_f32, num_heads=NUM_HEADS,
                           exact_softmax=True)
    out = jax.block_until_ready(out)
    assert out.shape == (B, Sq, OUT_DIM), out.shape
    err = float(jnp.max(jnp.abs(out - ref)))
    assert jnp.allclose(out, ref, atol=2e-3, rtol=2e-3), err

    # bf16 MXU path (full-rate on v5e/v6e/v7x), f32 softmax + accumulation,
    # approximate EUP reciprocal; looser tolerance.
    prep_bf16 = prepare_global_attention_params(
        params, num_heads=NUM_HEADS, compute_dtype=jnp.bfloat16)
    out_bf16 = global_attention(locx, glox, prep_bf16, num_heads=NUM_HEADS)
    out_bf16 = jax.block_until_ready(out_bf16)
    err_bf = float(jnp.max(jnp.abs(out_bf16 - ref)))
    assert jnp.allclose(out_bf16, ref, atol=5e-2, rtol=5e-2), err_bf

    print("KERNEL_OK")
</pallas_src>

<mosaic_0001>
module attributes {stable_mosaic.version = 11 : i64} {
  func.func @_global_attention_kernel(%arg0: i32, %arg1: memref<1x16x64xf32, #tpu.memory_space<vmem>>, %arg2: memref<1x8x64xf32, #tpu.memory_space<vmem>>, %arg3: memref<64x64xf32, #tpu.memory_space<vmem>>, %arg4: memref<1x64xf32, #tpu.memory_space<vmem>>, %arg5: memref<64x128xf32, #tpu.memory_space<vmem>>, %arg6: memref<1x128xf32, #tpu.memory_space<vmem>>, %arg7: memref<64x1024xf32, #tpu.memory_space<vmem>>, %arg8: memref<1x1024xf32, #tpu.memory_space<vmem>>, %arg9: memref<64x64xf32, #tpu.memory_space<vmem>>, %arg10: memref<1x16x1024xf32, #tpu.memory_space<vmem>>, %arg11: memref<16x64xf32, #tpu.memory_space<vmem>>, %arg12: memref<16x64xf32, #tpu.memory_space<vmem>>) attributes {dimension_semantics = [#tpu.dimension_semantics<parallel>], iteration_bounds = array<i64: 2>, scalar_prefetch = 0 : i64, scratch_operands = 2 : i64, tpu.core_type = #tpu.core_type<tc>, window_params = [{transform_indices = @transform_0, window_bounds = array<i64: 1, 16, 64>}, {transform_indices = @transform_1, window_bounds = array<i64: 1, 8, 64>}, {pipeline_mode = #tpu.pipeline_mode<synchronous>, transform_indices = @transform_2, window_bounds = array<i64: 64, 64>}, {pipeline_mode = #tpu.pipeline_mode<synchronous>, transform_indices = @transform_3, window_bounds = array<i64: 1, 64>}, {pipeline_mode = #tpu.pipeline_mode<synchronous>, transform_indices = @transform_4, window_bounds = array<i64: 64, 128>}, {pipeline_mode = #tpu.pipeline_mode<synchronous>, transform_indices = @transform_5, window_bounds = array<i64: 1, 128>}, {pipeline_mode = #tpu.pipeline_mode<synchronous>, transform_indices = @transform_6, window_bounds = array<i64: 64, 1024>}, {pipeline_mode = #tpu.pipeline_mode<synchronous>, transform_indices = @transform_7, window_bounds = array<i64: 1, 1024>}, {pipeline_mode = #tpu.pipeline_mode<synchronous>, transform_indices = @transform_8, window_bounds = array<i64: 64, 64>}, {transform_indices = @transform_9, window_bounds = array<i64: 1, 16, 1024>}]} {
    %c0 = arith.constant 0 : index
    %c0_0 = arith.constant 0 : index
    %c0_1 = arith.constant 0 : index
    %0 = vector.load %arg1[%c0, %c0_0, %c0_1] : memref<1x16x64xf32, #tpu.memory_space<vmem>>, vector<1x16x64xf32>
    %1 = vector.shape_cast %0 : vector<1x16x64xf32> to vector<16x64xf32>
    %c0_2 = arith.constant 0 : index
    %c0_3 = arith.constant 0 : index
    %c0_4 = arith.constant 0 : index
    %2 = vector.load %arg2[%c0_2, %c0_3, %c0_4] : memref<1x8x64xf32, #tpu.memory_space<vmem>>, vector<1x8x64xf32>
    %3 = vector.shape_cast %2 : vector<1x8x64xf32> to vector<8x64xf32>
    %c0_5 = arith.constant 0 : index
    %c0_6 = arith.constant 0 : index
    %4 = vector.load %arg3[%c0_5, %c0_6] : memref<64x64xf32, #tpu.memory_space<vmem>>, vector<64x64xf32>
    %cst = arith.constant dense<0.000000e+00> : vector<16x64xf32>
    %5 = tpu.matmul %1, %4, %cst {dimension_numbers = #tpu.dot_dimension_numbers<[1], [0], [0], [1], [0, 0, 1, 1], [], []>} : vector<16x64xf32>, vector<64x64xf32>, vector<16x64xf32> -> vector<16x64xf32>
    %c0_7 = arith.constant 0 : index
    %c0_8 = arith.constant 0 : index
    %6 = vector.load %arg4[%c0_7, %c0_8] : memref<1x64xf32, #tpu.memory_space<vmem>>, vector<1x64xf32>
    %7 = vector.broadcast %6 : vector<1x64xf32> to vector<16x64xf32>
    %8 = arith.addf %5, %7 : vector<16x64xf32>
    %c0_9 = arith.constant 0 : index
    %c0_10 = arith.constant 0 : index
    %9 = vector.load %arg5[%c0_9, %c0_10] : memref<64x128xf32, #tpu.memory_space<vmem>>, vector<64x128xf32>
    %cst_11 = arith.constant dense<0.000000e+00> : vector<8x128xf32>
    %10 = tpu.matmul %3, %9, %cst_11 {dimension_numbers = #tpu.dot_dimension_numbers<[1], [0], [0], [1], [0, 0, 1, 1], [], []>} : vector<8x64xf32>, vector<64x128xf32>, vector<8x128xf32> -> vector<8x128xf32>
    %c0_12 = arith.constant 0 : index
    %c0_13 = arith.constant 0 : index
    %11 = vector.load %arg6[%c0_12, %c0_13] : memref<1x128xf32, #tpu.memory_space<vmem>>, vector<1x128xf32>
    %12 = vector.broadcast %11 : vector<1x128xf32> to vector<8x128xf32>
    %13 = arith.addf %10, %12 : vector<8x128xf32>
    %14 = vector.shape_cast %8 : vector<16x64xf32> to vector<1x16x64xf32>
    %15 = vector.shape_cast %13 : vector<8x128xf32> to vector<1x8x128xf32>
    %16 = vector.extract_strided_slice %15 {offsets = [0, 0, 0], sizes = [1, 8, 64], strides = [1, 1, 1]} : vector<1x8x128xf32> to vector<1x8x64xf32>
    %17 = vector.extract_strided_slice %15 {offsets = [0, 0, 64], sizes = [1, 8, 64], strides = [1, 1, 1]} : vector<1x8x128xf32> to vector<1x8x64xf32>
    %18 = vector.extract_strided_slice %14 {offsets = [0, 0, 0], sizes = [1, 16, 8], strides = [1, 1, 1]} : vector<1x16x64xf32> to vector<1x16x8xf32>
    %19 = vector.extract_strided_slice %16 {offsets = [0, 0, 0], sizes = [1, 8, 8], strides = [1, 1, 1]} : vector<1x8x64xf32> to vector<1x8x8xf32>
    "tpu.trace_start"() <{level = 10 : i32, message = "bqd,bkd->bqk"}> : () -> ()
    %cst_14 = arith.constant dense<0.000000e+00> : vector<1x16x8xf32>
    %20 = tpu.matmul %18, %19, %cst_14 {dimension_numbers = #tpu.dot_dimension_numbers<[2], [2], [1], [1], [0, 0, 0, 1, 1, 1], [0], [0]>} : vector<1x16x8xf32>, vector<1x8x8xf32>, vector<1x16x8xf32> -> vector<1x16x8xf32>
    "tpu.trace_stop"() : () -> ()
    %cst_15 = arith.constant dense<0xFF800000> : vector<1x16xf32>
    %21 = vector.multi_reduction <maximumf>, %20, %cst_15 [2] : vector<1x16x8xf32> to vector<1x16xf32>
    %22 = vector.shape_cast %21 : vector<1x16xf32> to vector<1x16x1xf32>
    %23 = vector.broadcast %22 : vector<1x16x1xf32> to vector<1x16x8xf32>
    %24 = arith.subf %20, %23 : vector<1x16x8xf32>
    %25 = vector.shape_cast %24 : vector<1x16x8xf32> to vector<16x8xf32>
    %c0_16 = arith.constant 0 : index
    %c0_17 = arith.constant 0 : index
    %26 = vector.load %arg11[%c0_16, %c0_17] : memref<16x64xf32, #tpu.memory_space<vmem>>, vector<16x8xf32>
    tpu.vector_store %arg11[%c0_16, %c0_17], %25 {strides = array<i32>} : memref<16x64xf32, #tpu.memory_space<vmem>>, vector<16x8xf32>,
    %27 = vector.extract_strided_slice %14 {offsets = [0, 0, 8], sizes = [1, 16, 8], strides = [1, 1, 1]} : vector<1x16x64xf32> to vector<1x16x8xf32>
    %28 = vector.extract_strided_slice %16 {offsets = [0, 0, 8], sizes = [1, 8, 8], strides = [1, 1, 1]} : vector<1x8x64xf32> to vector<1x8x8xf32>
    "tpu.trace_start"() <{level = 10 : i32, message = "bqd,bkd->bqk"}> : () -> ()
    %cst_18 = arith.constant dense<0.000000e+00> : vector<1x16x8xf32>
    %29 = tpu.matmul %27, %28, %cst_18 {dimension_numbers = #tpu.dot_dimension_numbers<[2], [2], [1], [1], [0, 0, 0, 1, 1, 1], [0], [0]>} : vector<1x16x8xf32>, vector<1x8x8xf32>, vector<1x16x8xf32> -> vector<1x16x8xf32>
    "tpu.trace_stop"() : () -> ()
    %cst_19 = arith.constant dense<0xFF800000> : vector<1x16xf32>
    %30 = vector.multi_reduction <maximumf>, %29, %cst_19 [2] : vector<1x16x8xf32> to vector<1x16xf32>
    %31 = vector.shape_cast %30 : vector<1x16xf32> to vector<1x16x1xf32>
    %32 = vector.broadcast %31 : vector<1x16x1xf32> to vector<1x16x8xf32>
    %33 = arith.subf %29, %32 : vector<1x16x8xf32>
    %34 = vector.shape_cast %33 : vector<1x16x8xf32> to vector<16x8xf32>
    %c0_20 = arith.constant 0 : index
    %c8 = arith.constant 8 : index
    %35 = vector.load %arg11[%c0_20, %c8] : memref<16x64xf32, #tpu.memory_space<vmem>>, vector<16x8xf32>
    tpu.vector_store %arg11[%c0_20, %c8], %34 {strides = array<i32>} : memref<16x64xf32, #tpu.memory_space<vmem>>, vector<16x8xf32>,
    %36 = vector.extract_strided_slice %14 {offsets = [0, 0, 16], sizes = [1, 16, 8], strides = [1, 1, 1]} : vector<1x16x64xf32> to vector<1x16x8xf32>
    %37 = vector.extract_strided_slice %16 {offsets = [0, 0, 16], sizes = [1, 8, 8], strides = [1, 1, 1]} : vector<1x8x64xf32> to vector<1x8x8xf32>
    "tpu.trace_start"() <{level = 10 : i32, message = "bqd,bkd->bqk"}> : () -> ()
    %cst_21 = arith.constant dense<0.000000e+00> : vector<1x16x8xf32>
    %38 = tpu.matmul %36, %37, %cst_21 {dimension_numbers = #tpu.dot_dimension_numbers<[2], [2], [1], [1], [0, 0, 0, 1, 1, 1], [0], [0]>} : vector<1x16x8xf32>, vector<1x8x8xf32>, vector<1x16x8xf32> -> vector<1x16x8xf32>
    "tpu.trace_stop"() : () -> ()
    %cst_22 = arith.constant dense<0xFF800000> : vector<1x16xf32>
    %39 = vector.multi_reduction <maximumf>, %38, %cst_22 [2] : vector<1x16x8xf32> to vector<1x16xf32>
    %40 = vector.shape_cast %39 : vector<1x16xf32> to vector<1x16x1xf32>
    %41 = vector.broadcast %40 : vector<1x16x1xf32> to vector<1x16x8xf32>
    %42 = arith.subf %38, %41 : vector<1x16x8xf32>
    %43 = vector.shape_cast %42 : vector<1x16x8xf32> to vector<16x8xf32>
    %c0_23 = arith.constant 0 : index
    %c16 = arith.constant 16 : index
    %44 = vector.load %arg11[%c0_23, %c16] : memref<16x64xf32, #tpu.memory_space<vmem>>, vector<16x8xf32>
    tpu.vector_store %arg11[%c0_23, %c16], %43 {strides = array<i32>} : memref<16x64xf32, #tpu.memory_space<vmem>>, vector<16x8xf32>,
    %45 = vector.extract_strided_slice %14 {offsets = [0, 0, 24], sizes = [1, 16, 8], strides = [1, 1, 1]} : vector<1x16x64xf32> to vector<1x16x8xf32>
    %46 = vector.extract_strided_slice %16 {offsets = [0, 0, 24], sizes = [1, 8, 8], strides = [1, 1, 1]} : vector<1x8x64xf32> to vector<1x8x8xf32>
    "tpu.trace_start"() <{level = 10 : i32, message = "bqd,bkd->bqk"}> : () -> ()
    %cst_24 = arith.constant dense<0.000000e+00> : vector<1x16x8xf32>
    %47 = tpu.matmul %45, %46, %cst_24 {dimension_numbers = #tpu.dot_dimension_numbers<[2], [2], [1], [1], [0, 0, 0, 1, 1, 1], [0], [0]>} : vector<1x16x8xf32>, vector<1x8x8xf32>, vector<1x16x8xf32> -> vector<1x16x8xf32>
    "tpu.trace_stop"() : () -> ()
    %cst_25 = arith.constant dense<0xFF800000> : vector<1x16xf32>
    %48 = vector.multi_reduction <maximumf>, %47, %cst_25 [2] : vector<1x16x8xf32> to vector<1x16xf32>
    %49 = vector.shape_cast %48 : vector<1x16xf32> to vector<1x16x1xf32>
    %50 = vector.broadcast %49 : vector<1x16x1xf32> to vector<1x16x8xf32>
    %51 = arith.subf %47, %50 : vector<1x16x8xf32>
    %52 = vector.shape_cast %51 : vector<1x16x8xf32> to vector<16x8xf32>
    %c0_26 = arith.constant 0 : index
    %c24 = arith.constant 24 : index
    %53 = vector.load %arg11[%c0_26, %c24] : memref<16x64xf32, #tpu.memory_space<vmem>>, vector<16x8xf32>
    tpu.vector_store %arg11[%c0_26, %c24], %52 {strides = array<i32>} : memref<16x64xf32, #tpu.memory_space<vmem>>, vector<16x8xf32>,
    %54 = vector.extract_strided_slice %14 {offsets = [0, 0, 32], sizes = [1, 16, 8], strides = [1, 1, 1]} : vector<1x16x64xf32> to vector<1x16x8xf32>
    %55 = vector.extract_strided_slice %16 {offsets = [0, 0, 32], sizes = [1, 8, 8], strides = [1, 1, 1]} : vector<1x8x64xf32> to vector<1x8x8xf32>
    "tpu.trace_start"() <{level = 10 : i32, message = "bqd,bkd->bqk"}> : () -> ()
    %cst_27 = arith.constant dense<0.000000e+00> : vector<1x16x8xf32>
    %56 = tpu.matmul %54, %55, %cst_27 {dimension_numbers = #tpu.dot_dimension_numbers<[2], [2], [1], [1], [0, 0, 0, 1, 1, 1], [0], [0]>} : vector<1x16x8xf32>, vector<1x8x8xf32>, vector<1x16x8xf32> -> vector<1x16x8xf32>
    "tpu.trace_stop"() : () -> ()
    %cst_28 = arith.constant dense<0xFF800000> : vector<1x16xf32>
    %57 = vector.multi_reduction <maximumf>, %56, %cst_28 [2] : vector<1x16x8xf32> to vector<1x16xf32>
    %58 = vector.shape_cast %57 : vector<1x16xf32> to vector<1x16x1xf32>
    %59 = vector.broadcast %58 : vector<1x16x1xf32> to vector<1x16x8xf32>
    %60 = arith.subf %56, %59 : vector<1x16x8xf32>
    %61 = vector.shape_cast %60 : vector<1x16x8xf32> to vector<16x8xf32>
    %c0_29 = arith.constant 0 : index
    %c32 = arith.constant 32 : index
    %62 = vector.load %arg11[%c0_29, %c32] : memref<16x64xf32, #tpu.memory_space<vmem>>, vector<16x8xf32>
    tpu.vector_store %arg11[%c0_29, %c32], %61 {strides = array<i32>} : memref<16x64xf32, #tpu.memory_space<vmem>>, vector<16x8xf32>,
    %63 = vector.extract_strided_slice %14 {offsets = [0, 0, 40], sizes = [1, 16, 8], strides = [1, 1, 1]} : vector<1x16x64xf32> to vector<1x16x8xf32>
    %64 = vector.extract_strided_slice %16 {offsets = [0, 0, 40], sizes = [1, 8, 8], strides = [1, 1, 1]} : vector<1x8x64xf32> to vector<1x8x8xf32>
    "tpu.trace_start"() <{level = 10 : i32, message = "bqd,bkd->bqk"}> : () -> ()
    %cst_30 = arith.constant dense<0.000000e+00> : vector<1x16x8xf32>
    %65 = tpu.matmul %63, %64, %cst_30 {dimension_numbers = #tpu.dot_dimension_numbers<[2], [2], [1], [1], [0, 0, 0, 1, 1, 1], [0], [0]>} : vector<1x16x8xf32>, vector<1x8x8xf32>, vector<1x16x8xf32> -> vector<1x16x8xf32>
    "tpu.trace_stop"() : () -> ()
    %cst_31 = arith.constant dense<0xFF800000> : vector<1x16xf32>
    %66 = vector.multi_reduction <maximumf>, %65, %cst_31 [2] : vector<1x16x8xf32> to vector<1x16xf32>
    %67 = vector.shape_cast %66 : vector<1x16xf32> to vector<1x16x1xf32>
    %68 = vector.broadcast %67 : vector<1x16x1xf32> to vector<1x16x8xf32>
    %69 = arith.subf %65, %68 : vector<1x16x8xf32>
    %70 = vector.shape_cast %69 : vector<1x16x8xf32> to vector<16x8xf32>
    %c0_32 = arith.constant 0 : index
    %c40 = arith.constant 40 : index
    %71 = vector.load %arg11[%c0_32, %c40] : memref<16x64xf32, #tpu.memory_space<vmem>>, vector<16x8xf32>
    tpu.vector_store %arg11[%c0_32, %c40], %70 {strides = array<i32>} : memref<16x64xf32, #tpu.memory_space<vmem>>, vector<16x8xf32>,
    %72 = vector.extract_strided_slice %14 {offsets = [0, 0, 48], sizes = [1, 16, 8], strides = [1, 1, 1]} : vector<1x16x64xf32> to vector<1x16x8xf32>
    %73 = vector.extract_strided_slice %16 {offsets = [0, 0, 48], sizes = [1, 8, 8], strides = [1, 1, 1]} : vector<1x8x64xf32> to vector<1x8x8xf32>
    "tpu.trace_start"() <{level = 10 : i32, message = "bqd,bkd->bqk"}> : () -> ()
    %cst_33 = arith.constant dense<0.000000e+00> : vector<1x16x8xf32>
    %74 = tpu.matmul %72, %73, %cst_33 {dimension_numbers = #tpu.dot_dimension_numbers<[2], [2], [1], [1], [0, 0, 0, 1, 1, 1], [0], [0]>} : vector<1x16x8xf32>, vector<1x8x8xf32>, vector<1x16x8xf32> -> vector<1x16x8xf32>
    "tpu.trace_stop"() : () -> ()
    %cst_34 = arith.constant dense<0xFF800000> : vector<1x16xf32>
    %75 = vector.multi_reduction <maximumf>, %74, %cst_34 [2] : vector<1x16x8xf32> to vector<1x16xf32>
    %76 = vector.shape_cast %75 : vector<1x16xf32> to vector<1x16x1xf32>
    %77 = vector.broadcast %76 : vector<1x16x1xf32> to vector<1x16x8xf32>
    %78 = arith.subf %74, %77 : vector<1x16x8xf32>
    %79 = vector.shape_cast %78 : vector<1x16x8xf32> to vector<16x8xf32>
    %c0_35 = arith.constant 0 : index
    %c48 = arith.constant 48 : index
    %80 = vector.load %arg11[%c0_35, %c48] : memref<16x64xf32, #tpu.memory_space<vmem>>, vector<16x8xf32>
    tpu.vector_store %arg11[%c0_35, %c48], %79 {strides = array<i32>} : memref<16x64xf32, #tpu.memory_space<vmem>>, vector<16x8xf32>,
    %81 = vector.extract_strided_slice %14 {offsets = [0, 0, 56], sizes = [1, 16, 8], strides = [1, 1, 1]} : vector<1x16x64xf32> to vector<1x16x8xf32>
    %82 = vector.extract_strided_slice %16 {offsets = [0, 0, 56], sizes = [1, 8, 8], strides = [1, 1, 1]} : vector<1x8x64xf32> to vector<1x8x8xf32>
    "tpu.trace_start"() <{level = 10 : i32, message = "bqd,bkd->bqk"}> : () -> ()
    %cst_36 = arith.constant dense<0.000000e+00> : vector<1x16x8xf32>
    %83 = tpu.matmul %81, %82, %cst_36 {dimension_numbers = #tpu.dot_dimension_numbers<[2], [2], [1], [1], [0, 0, 0, 1, 1, 1], [0], [0]>} : vector<1x16x8xf32>, vector<1x8x8xf32>, vector<1x16x8xf32> -> vector<1x16x8xf32>
    "tpu.trace_stop"() : () -> ()
    %cst_37 = arith.constant dense<0xFF800000> : vector<1x16xf32>
    %84 = vector.multi_reduction <maximumf>, %83, %cst_37 [2] : vector<1x16x8xf32> to vector<1x16xf32>
    %85 = vector.shape_cast %84 : vector<1x16xf32> to vector<1x16x1xf32>
    %86 = vector.broadcast %85 : vector<1x16x1xf32> to vector<1x16x8xf32>
    %87 = arith.subf %83, %86 : vector<1x16x8xf32>
    %88 = vector.shape_cast %87 : vector<1x16x8xf32> to vector<16x8xf32>
    %c0_38 = arith.constant 0 : index
    %c56 = arith.constant 56 : index
    %89 = vector.load %arg11[%c0_38, %c56] : memref<16x64xf32, #tpu.memory_space<vmem>>, vector<16x8xf32>
    tpu.vector_store %arg11[%c0_38, %c56], %88 {strides = array<i32>} : memref<16x64xf32, #tpu.memory_space<vmem>>, vector<16x8xf32>,
    %c0_39 = arith.constant 0 : index
    %c0_40 = arith.constant 0 : index
    %90 = vector.load %arg11[%c0_39, %c0_40] : memref<16x64xf32, #tpu.memory_space<vmem>>, vector<16x64xf32>
    %91 = math.exp %90 : vector<16x64xf32>
    %c0_41 = arith.constant 0 : index
    %c0_42 = arith.constant 0 : index
    %92 = vector.load %arg9[%c0_41, %c0_42] : memref<64x64xf32, #tpu.memory_space<vmem>>, vector<64x64xf32>
    %cst_43 = arith.constant dense<0.000000e+00> : vector<16x64xf32>
    %93 = tpu.matmul %91, %92, %cst_43 {dimension_numbers = #tpu.dot_dimension_numbers<[1], [0], [0], [1], [0, 0, 1, 1], [], []>} : vector<16x64xf32>, vector<64x64xf32>, vector<16x64xf32> -> vector<16x64xf32>
    %94 = arith.divf %91, %93 : vector<16x64xf32>
    %95 = vector.shape_cast %94 : vector<16x64xf32> to vector<1x16x64xf32>
    %96 = vector.extract_strided_slice %17 {offsets = [0, 0, 0], sizes = [1, 8, 8], strides = [1, 1, 1]} : vector<1x8x64xf32> to vector<1x8x8xf32>
    %97 = vector.extract_strided_slice %95 {offsets = [0, 0, 0], sizes = [1, 16, 8], strides = [1, 1, 1]} : vector<1x16x64xf32> to vector<1x16x8xf32>
    "tpu.trace_start"() <{level = 10 : i32, message = "bqk,bkd->bqd"}> : () -> ()
    %cst_44 = arith.constant dense<0.000000e+00> : vector<1x16x8xf32>
    %98 = tpu.matmul %97, %96, %cst_44 {dimension_numbers = #tpu.dot_dimension_numbers<[2], [1], [1], [2], [0, 0, 0, 1, 1, 2], [0], [0]>} : vector<1x16x8xf32>, vector<1x8x8xf32>, vector<1x16x8xf32> -> vector<1x16x8xf32>
    "tpu.trace_stop"() : () -> ()
    %99 = vector.shape_cast %98 : vector<1x16x8xf32> to vector<16x8xf32>
    %c0_45 = arith.constant 0 : index
    %c0_46 = arith.constant 0 : index
    %100 = vector.load %arg12[%c0_45, %c0_46] : memref<16x64xf32, #tpu.memory_space<vmem>>, vector<16x8xf32>
    tpu.vector_store %arg12[%c0_45, %c0_46], %99 {strides = array<i32>} : memref<16x64xf32, #tpu.memory_space<vmem>>, vector<16x8xf32>,
    %101 = vector.extract_strided_slice %17 {offsets = [0, 0, 8], sizes = [1, 8, 8], strides = [1, 1, 1]} : vector<1x8x64xf32> to vector<1x8x8xf32>
    %102 = vector.extract_strided_slice %95 {offsets = [0, 0, 8], sizes = [1, 16, 8], strides = [1, 1, 1]} : vector<1x16x64xf32> to vector<1x16x8xf32>
    "tpu.trace_start"() <{level = 10 : i32, message = "bqk,bkd->bqd"}> : () -> ()
    %cst_47 = arith.constant dense<0.000000e+00> : vector<1x16x8xf32>
    %103 = tpu.matmul %102, %101, %cst_47 {dimension_numbers = #tpu.dot_dimension_numbers<[2], [1], [1], [2], [0, 0, 0, 1, 1, 2], [0], [0]>} : vector<1x16x8xf32>, vector<1x8x8xf32>, vector<1x16x8xf32> -> vector<1x16x8xf32>
    "tpu.trace_stop"() : () -> ()
    %104 = vector.shape_cast %103 : vector<1x16x8xf32> to vector<16x8xf32>
    %c0_48 = arith.constant 0 : index
    %c8_49 = arith.constant 8 : index
    %105 = vector.load %arg12[%c0_48, %c8_49] : memref<16x64xf32, #tpu.memory_space<vmem>>, vector<16x8xf32>
    tpu.vector_store %arg12[%c0_48, %c8_49], %104 {strides = array<i32>} : memref<16x64xf32, #tpu.memory_space<vmem>>, vector<16x8xf32>,
    %106 = vector.extract_strided_slice %17 {offsets = [0, 0, 16], sizes = [1, 8, 8], strides = [1, 1, 1]} : vector<1x8x64xf32> to vector<1x8x8xf32>
    %107 = vector.extract_strided_slice %95 {offsets = [0, 0, 16], sizes = [1, 16, 8], strides = [1, 1, 1]} : vector<1x16x64xf32> to vector<1x16x8xf32>
    "tpu.trace_start"() <{level = 10 : i32, message = "bqk,bkd->bqd"}> : () -> ()
    %cst_50 = arith.constant dense<0.000000e+00> : vector<1x16x8xf32>
    %108 = tpu.matmul %107, %106, %cst_50 {dimension_numbers = #tpu.dot_dimension_numbers<[2], [1], [1], [2], [0, 0, 0, 1, 1, 2], [0], [0]>} : vector<1x16x8xf32>, vector<1x8x8xf32>, vector<1x16x8xf32> -> vector<1x16x8xf32>
    "tpu.trace_stop"() : () -> ()
    %109 = vector.shape_cast %108 : vector<1x16x8xf32> to vector<16x8xf32>
    %c0_51 = arith.constant 0 : index
    %c16_52 = arith.constant 16 : index
    %110 = vector.load %arg12[%c0_51, %c16_52] : memref<16x64xf32, #tpu.memory_space<vmem>>, vector<16x8xf32>
    tpu.vector_store %arg12[%c0_51, %c16_52], %109 {strides = array<i32>} : memref<16x64xf32, #tpu.memory_space<vmem>>, vector<16x8xf32>,
    %111 = vector.extract_strided_slice %17 {offsets = [0, 0, 24], sizes = [1, 8, 8], strides = [1, 1, 1]} : vector<1x8x64xf32> to vector<1x8x8xf32>
    %112 = vector.extract_strided_slice %95 {offsets = [0, 0, 24], sizes = [1, 16, 8], strides = [1, 1, 1]} : vector<1x16x64xf32> to vector<1x16x8xf32>
    "tpu.trace_start"() <{level = 10 : i32, message = "bqk,bkd->bqd"}> : () -> ()
    %cst_53 = arith.constant dense<0.000000e+00> : vector<1x16x8xf32>
    %113 = tpu.matmul %112, %111, %cst_53 {dimension_numbers = #tpu.dot_dimension_numbers<[2], [1], [1], [2], [0, 0, 0, 1, 1, 2], [0], [0]>} : vector<1x16x8xf32>, vector<1x8x8xf32>, vector<1x16x8xf32> -> vector<1x16x8xf32>
    "tpu.trace_stop"() : () -> ()
    %114 = vector.shape_cast %113 : vector<1x16x8xf32> to vector<16x8xf32>
    %c0_54 = arith.constant 0 : index
    %c24_55 = arith.constant 24 : index
    %115 = vector.load %arg12[%c0_54, %c24_55] : memref<16x64xf32, #tpu.memory_space<vmem>>, vector<16x8xf32>
    tpu.vector_store %arg12[%c0_54, %c24_55], %114 {strides = array<i32>} : memref<16x64xf32, #tpu.memory_space<vmem>>, vector<16x8xf32>,
    %116 = vector.extract_strided_slice %17 {offsets = [0, 0, 32], sizes = [1, 8, 8], strides = [1, 1, 1]} : vector<1x8x64xf32> to vector<1x8x8xf32>
    %117 = vector.extract_strided_slice %95 {offsets = [0, 0, 32], sizes = [1, 16, 8], strides = [1, 1, 1]} : vector<1x16x64xf32> to vector<1x16x8xf32>
    "tpu.trace_start"() <{level = 10 : i32, message = "bqk,bkd->bqd"}> : () -> ()
    %cst_56 = arith.constant dense<0.000000e+00> : vector<1x16x8xf32>
    %118 = tpu.matmul %117, %116, %cst_56 {dimension_numbers = #tpu.dot_dimension_numbers<[2], [1], [1], [2], [0, 0, 0, 1, 1, 2], [0], [0]>} : vector<1x16x8xf32>, vector<1x8x8xf32>, vector<1x16x8xf32> -> vector<1x16x8xf32>
    "tpu.trace_stop"() : () -> ()
    %119 = vector.shape_cast %118 : vector<1x16x8xf32> to vector<16x8xf32>
    %c0_57 = arith.constant 0 : index
    %c32_58 = arith.constant 32 : index
    %120 = vector.load %arg12[%c0_57, %c32_58] : memref<16x64xf32, #tpu.memory_space<vmem>>, vector<16x8xf32>
    tpu.vector_store %arg12[%c0_57, %c32_58], %119 {strides = array<i32>} : memref<16x64xf32, #tpu.memory_space<vmem>>, vector<16x8xf32>,
    %121 = vector.extract_strided_slice %17 {offsets = [0, 0, 40], sizes = [1, 8, 8], strides = [1, 1, 1]} : vector<1x8x64xf32> to vector<1x8x8xf32>
    %122 = vector.extract_strided_slice %95 {offsets = [0, 0, 40], sizes = [1, 16, 8], strides = [1, 1, 1]} : vector<1x16x64xf32> to vector<1x16x8xf32>
    "tpu.trace_start"() <{level = 10 : i32, message = "bqk,bkd->bqd"}> : () -> ()
    %cst_59 = arith.constant dense<0.000000e+00> : vector<1x16x8xf32>
    %123 = tpu.matmul %122, %121, %cst_59 {dimension_numbers = #tpu.dot_dimension_numbers<[2], [1], [1], [2], [0, 0, 0, 1, 1, 2], [0], [0]>} : vector<1x16x8xf32>, vector<1x8x8xf32>, vector<1x16x8xf32> -> vector<1x16x8xf32>
    "tpu.trace_stop"() : () -> ()
    %124 = vector.shape_cast %123 : vector<1x16x8xf32> to vector<16x8xf32>
    %c0_60 = arith.constant 0 : index
    %c40_61 = arith.constant 40 : index
    %125 = vector.load %arg12[%c0_60, %c40_61] : memref<16x64xf32, #tpu.memory_space<vmem>>, vector<16x8xf32>
    tpu.vector_store %arg12[%c0_60, %c40_61], %124 {strides = array<i32>} : memref<16x64xf32, #tpu.memory_space<vmem>>, vector<16x8xf32>,
    %126 = vector.extract_strided_slice %17 {offsets = [0, 0, 48], sizes = [1, 8, 8], strides = [1, 1, 1]} : vector<1x8x64xf32> to vector<1x8x8xf32>
    %127 = vector.extract_strided_slice %95 {offsets = [0, 0, 48], sizes = [1, 16, 8], strides = [1, 1, 1]} : vector<1x16x64xf32> to vector<1x16x8xf32>
    "tpu.trace_start"() <{level = 10 : i32, message = "bqk,bkd->bqd"}> : () -> ()
    %cst_62 = arith.constant dense<0.000000e+00> : vector<1x16x8xf32>
    %128 = tpu.matmul %127, %126, %cst_62 {dimension_numbers = #tpu.dot_dimension_numbers<[2], [1], [1], [2], [0, 0, 0, 1, 1, 2], [0], [0]>} : vector<1x16x8xf32>, vector<1x8x8xf32>, vector<1x16x8xf32> -> vector<1x16x8xf32>
    "tpu.trace_stop"() : () -> ()
    %129 = vector.shape_cast %128 : vector<1x16x8xf32> to vector<16x8xf32>
    %c0_63 = arith.constant 0 : index
    %c48_64 = arith.constant 48 : index
    %130 = vector.load %arg12[%c0_63, %c48_64] : memref<16x64xf32, #tpu.memory_space<vmem>>, vector<16x8xf32>
    tpu.vector_store %arg12[%c0_63, %c48_64], %129 {strides = array<i32>} : memref<16x64xf32, #tpu.memory_space<vmem>>, vector<16x8xf32>,
    %131 = vector.extract_strided_slice %17 {offsets = [0, 0, 56], sizes = [1, 8, 8], strides = [1, 1, 1]} : vector<1x8x64xf32> to vector<1x8x8xf32>
    %132 = vector.extract_strided_slice %95 {offsets = [0, 0, 56], sizes = [1, 16, 8], strides = [1, 1, 1]} : vector<1x16x64xf32> to vector<1x16x8xf32>
    "tpu.trace_start"() <{level = 10 : i32, message = "bqk,bkd->bqd"}> : () -> ()
    %cst_65 = arith.constant dense<0.000000e+00> : vector<1x16x8xf32>
    %133 = tpu.matmul %132, %131, %cst_65 {dimension_numbers = #tpu.dot_dimension_numbers<[2], [1], [1], [2], [0, 0, 0, 1, 1, 2], [0], [0]>} : vector<1x16x8xf32>, vector<1x8x8xf32>, vector<1x16x8xf32> -> vector<1x16x8xf32>
    "tpu.trace_stop"() : () -> ()
    %134 = vector.shape_cast %133 : vector<1x16x8xf32> to vector<16x8xf32>
    %c0_66 = arith.constant 0 : index
    %c56_67 = arith.constant 56 : index
    %135 = vector.load %arg12[%c0_66, %c56_67] : memref<16x64xf32, #tpu.memory_space<vmem>>, vector<16x8xf32>
    tpu.vector_store %arg12[%c0_66, %c56_67], %134 {strides = array<i32>} : memref<16x64xf32, #tpu.memory_space<vmem>>, vector<16x8xf32>,
    %c0_68 = arith.constant 0 : index
    %c0_69 = arith.constant 0 : index
    %136 = vector.load %arg12[%c0_68, %c0_69] : memref<16x64xf32, #tpu.memory_space<vmem>>, vector<16x64xf32>
    %c0_70 = arith.constant 0 : index
    %c0_71 = arith.constant 0 : index
    %137 = vector.load %arg7[%c0_70, %c0_71] : memref<64x1024xf32, #tpu.memory_space<vmem>>, vector<64x1024xf32>
    %cst_72 = arith.constant dense<0.000000e+00> : vector<16x1024xf32>
    %138 = tpu.matmul %136, %137, %cst_72 {dimension_numbers = #tpu.dot_dimension_numbers<[1], [0], [0], [1], [0, 0, 1, 1], [], []>} : vector<16x64xf32>, vector<64x1024xf32>, vector<16x1024xf32> -> vector<16x1024xf32>
    %c0_73 = arith.constant 0 : index
    %c0_74 = arith.constant 0 : index
    %139 = vector.load %arg8[%c0_73, %c0_74] : memref<1x1024xf32, #tpu.memory_space<vmem>>, vector<1x1024xf32>
    %140 = vector.broadcast %139 : vector<1x1024xf32> to vector<16x1024xf32>
    %141 = arith.addf %138, %140 : vector<16x1024xf32>
    %142 = vector.shape_cast %141 : vector<16x1024xf32> to vector<1x16x1024xf32>
    %c0_75 = arith.constant 0 : index
    %c0_76 = arith.constant 0 : index
    %c0_77 = arith.constant 0 : index
    %143 = vector.load %arg10[%c0_75, %c0_76, %c0_77] : memref<1x16x1024xf32, #tpu.memory_space<vmem>>, vector<1x16x1024xf32>
    tpu.vector_store %arg10[%c0_75, %c0_76, %c0_77], %142 {strides = array<i32>} : memref<1x16x1024xf32, #tpu.memory_space<vmem>>, vector<1x16x1024xf32>,
    return
  }
  func.func @transform_0(%arg0: i32) -> (i32, i32, i32) {
    %c0_i32 = arith.constant 0 : i32
    %c0_i32_0 = arith.constant 0 : i32
    %c0_i32_1 = arith.constant 0 : i32
    return %arg0, %c0_i32, %c0_i32_0 : i32, i32, i32
  }
  func.func @transform_1(%arg0: i32) -> (i32, i32, i32) {
    %c0_i32 = arith.constant 0 : i32
    %c0_i32_0 = arith.constant 0 : i32
    %c0_i32_1 = arith.constant 0 : i32
    return %arg0, %c0_i32, %c0_i32_0 : i32, i32, i32
  }
  func.func @transform_2(%arg0: i32) -> (i32, i32) {
    %c0_i32 = arith.constant 0 : i32
    %c0_i32_0 = arith.constant 0 : i32
    %c0_i32_1 = arith.constant 0 : i32
    return %c0_i32, %c0_i32_0 : i32, i32
  }
  func.func @transform_3(%arg0: i32) -> (i32, i32) {
    %c0_i32 = arith.constant 0 : i32
    %c0_i32_0 = arith.constant 0 : i32
    %c0_i32_1 = arith.constant 0 : i32
    return %c0_i32, %c0_i32_0 : i32, i32
  }
  func.func @transform_4(%arg0: i32) -> (i32, i32) {
    %c0_i32 = arith.constant 0 : i32
    %c0_i32_0 = arith.constant 0 : i32
    %c0_i32_1 = arith.constant 0 : i32
    return %c0_i32, %c0_i32_0 : i32, i32
  }
  func.func @transform_5(%arg0: i32) -> (i32, i32) {
    %c0_i32 = arith.constant 0 : i32
    %c0_i32_0 = arith.constant 0 : i32
    %c0_i32_1 = arith.constant 0 : i32
    return %c0_i32, %c0_i32_0 : i32, i32
  }
  func.func @transform_6(%arg0: i32) -> (i32, i32) {
    %c0_i32 = arith.constant 0 : i32
    %c0_i32_0 = arith.constant 0 : i32
    %c0_i32_1 = arith.constant 0 : i32
    return %c0_i32, %c0_i32_0 : i32, i32
  }
  func.func @transform_7(%arg0: i32) -> (i32, i32) {
    %c0_i32 = arith.constant 0 : i32
    %c0_i32_0 = arith.constant 0 : i32
    %c0_i32_1 = arith.constant 0 : i32
    return %c0_i32, %c0_i32_0 : i32, i32
  }
  func.func @transform_8(%arg0: i32) -> (i32, i32) {
    %c0_i32 = arith.constant 0 : i32
    %c0_i32_0 = arith.constant 0 : i32
    %c0_i32_1 = arith.constant 0 : i32
    return %c0_i32, %c0_i32_0 : i32, i32
  }
  func.func @transform_9(%arg0: i32) -> (i32, i32, i32) {
    %c0_i32 = arith.constant 0 : i32
    %c0_i32_0 = arith.constant 0 : i32
    %c0_i32_1 = arith.constant 0 : i32
    return %arg0, %c0_i32, %c0_i32_0 : i32, i32, i32
  }
}

module attributes {stable_mosaic.version = 11 : i64} {
  func.func @_global_attention_kernel(%arg0: i32, %arg1: memref<1x16x64xf32, #tpu.memory_space<vmem>>, %arg2: memref<1x8x64xf32, #tpu.memory_space<vmem>>, %arg3: memref<64x64xf32, #tpu.memory_space<vmem>>, %arg4: memref<1x64xf32, #tpu.memory_space<vmem>>, %arg5: memref<64x128xf32, #tpu.memory_space<vmem>>, %arg6: memref<1x128xf32, #tpu.memory_space<vmem>>, %arg7: memref<64x1024xf32, #tpu.memory_space<vmem>>, %arg8: memref<1x1024xf32, #tpu.memory_space<vmem>>, %arg9: memref<64x64xf32, #tpu.memory_space<vmem>>, %arg10: memref<1x16x1024xf32, #tpu.memory_space<vmem>>, %arg11: memref<16x64xf32, #tpu.memory_space<vmem>>, %arg12: memref<16x64xf32, #tpu.memory_space<vmem>>) attributes {dimension_semantics = [#tpu.dimension_semantics<parallel>], iteration_bounds = array<i64: 2>, scalar_prefetch = 0 : i64, scratch_operands = 2 : i64, tpu.core_type = #tpu.core_type<tc>, window_params = [{transform_indices = @transform_0, window_bounds = array<i64: 1, 16, 64>}, {transform_indices = @transform_1, window_bounds = array<i64: 1, 8, 64>}, {pipeline_mode = #tpu.pipeline_mode<synchronous>, transform_indices = @transform_2, window_bounds = array<i64: 64, 64>}, {pipeline_mode = #tpu.pipeline_mode<synchronous>, transform_indices = @transform_3, window_bounds = array<i64: 1, 64>}, {pipeline_mode = #tpu.pipeline_mode<synchronous>, transform_indices = @transform_4, window_bounds = array<i64: 64, 128>}, {pipeline_mode = #tpu.pipeline_mode<synchronous>, transform_indices = @transform_5, window_bounds = array<i64: 1, 128>}, {pipeline_mode = #tpu.pipeline_mode<synchronous>, transform_indices = @transform_6, window_bounds = array<i64: 64, 1024>}, {pipeline_mode = #tpu.pipeline_mode<synchronous>, transform_indices = @transform_7, window_bounds = array<i64: 1, 1024>}, {pipeline_mode = #tpu.pipeline_mode<synchronous>, transform_indices = @transform_8, window_bounds = array<i64: 64, 64>}, {transform_indices = @transform_9, window_bounds = array<i64: 1, 16, 1024>}]} {
    %c0 = arith.constant 0 : index
    %c0_0 = arith.constant 0 : index
    %c0_1 = arith.constant 0 : index
    %0 = vector.load %arg1[%c0, %c0_0, %c0_1] : memref<1x16x64xf32, #tpu.memory_space<vmem>>, vector<1x16x64xf32>
    %1 = vector.shape_cast %0 : vector<1x16x64xf32> to vector<16x64xf32>
    %c0_2 = arith.constant 0 : index
    %c0_3 = arith.constant 0 : index
    %c0_4 = arith.constant 0 : index
    %2 = vector.load %arg2[%c0_2, %c0_3, %c0_4] : memref<1x8x64xf32, #tpu.memory_space<vmem>>, vector<1x8x64xf32>
    %3 = vector.shape_cast %2 : vector<1x8x64xf32> to vector<8x64xf32>
    %c0_5 = arith.constant 0 : index
    %c0_6 = arith.constant 0 : index
    %4 = vector.load %arg3[%c0_5, %c0_6] : memref<64x64xf32, #tpu.memory_space<vmem>>, vector<64x64xf32>
    %cst = arith.constant dense<0.000000e+00> : vector<16x64xf32>
    %5 = tpu.matmul %1, %4, %cst {dimension_numbers = #tpu.dot_dimension_numbers<[1], [0], [0], [1], [0, 0, 1, 1], [], []>} : vector<16x64xf32>, vector<64x64xf32>, vector<16x64xf32> -> vector<16x64xf32>
    %c0_7 = arith.constant 0 : index
    %c0_8 = arith.constant 0 : index
    %6 = vector.load %arg4[%c0_7, %c0_8] : memref<1x64xf32, #tpu.memory_space<vmem>>, vector<1x64xf32>
    %7 = vector.broadcast %6 : vector<1x64xf32> to vector<16x64xf32>
    %8 = arith.addf %5, %7 : vector<16x64xf32>
    %c0_9 = arith.constant 0 : index
    %c0_10 = arith.constant 0 : index
    %9 = vector.load %arg5[%c0_9, %c0_10] : memref<64x128xf32, #tpu.memory_space<vmem>>, vector<64x128xf32>
    %cst_11 = arith.constant dense<0.000000e+00> : vector<8x128xf32>
    %10 = tpu.matmul %3, %9, %cst_11 {dimension_numbers = #tpu.dot_dimension_numbers<[1], [0], [0], [1], [0, 0, 1, 1], [], []>} : vector<8x64xf32>, vector<64x128xf32>, vector<8x128xf32> -> vector<8x128xf32>
    %c0_12 = arith.constant 0 : index
    %c0_13 = arith.constant 0 : index
    %11 = vector.load %arg6[%c0_12, %c0_13] : memref<1x128xf32, #tpu.memory_space<vmem>>, vector<1x128xf32>
    %12 = vector.broadcast %11 : vector<1x128xf32> to vector<8x128xf32>
    %13 = arith.addf %10, %12 : vector<8x128xf32>
    %14 = vector.shape_cast %8 : vector<16x64xf32> to vector<1x16x64xf32>
    %15 = vector.shape_cast %13 : vector<8x128xf32> to vector<1x8x128xf32>
    %16 = vector.extract_strided_slice %15 {offsets = [0, 0, 0], sizes = [1, 8, 64], strides = [1, 1, 1]} : vector<1x8x128xf32> to vector<1x8x64xf32>
    %17 = vector.extract_strided_slice %15 {offsets = [0, 0, 64], sizes = [1, 8, 64], strides = [1, 1, 1]} : vector<1x8x128xf32> to vector<1x8x64xf32>
    %18 = vector.extract_strided_slice %14 {offsets = [0, 0, 0], sizes = [1, 16, 8], strides = [1, 1, 1]} : vector<1x16x64xf32> to vector<1x16x8xf32>
    %19 = vector.extract_strided_slice %16 {offsets = [0, 0, 0], sizes = [1, 8, 8], strides = [1, 1, 1]} : vector<1x8x64xf32> to vector<1x8x8xf32>
    "tpu.trace_start"() <{level = 10 : i32, message = "bqd,bkd->bqk"}> : () -> ()
    %cst_14 = arith.constant dense<0.000000e+00> : vector<1x16x8xf32>
    %20 = tpu.matmul %18, %19, %cst_14 {dimension_numbers = #tpu.dot_dimension_numbers<[2], [2], [1], [1], [0, 0, 0, 1, 1, 1], [0], [0]>} : vector<1x16x8xf32>, vector<1x8x8xf32>, vector<1x16x8xf32> -> vector<1x16x8xf32>
    "tpu.trace_stop"() : () -> ()
    %cst_15 = arith.constant dense<0xFF800000> : vector<1x16xf32>
    %21 = vector.multi_reduction <maximumf>, %20, %cst_15 [2] : vector<1x16x8xf32> to vector<1x16xf32>
    %22 = vector.shape_cast %21 : vector<1x16xf32> to vector<1x16x1xf32>
    %23 = vector.broadcast %22 : vector<1x16x1xf32> to vector<1x16x8xf32>
    %24 = arith.subf %20, %23 : vector<1x16x8xf32>
    %25 = vector.shape_cast %24 : vector<1x16x8xf32> to vector<16x8xf32>
    %c0_16 = arith.constant 0 : index
    %c0_17 = arith.constant 0 : index
    %26 = vector.load %arg11[%c0_16, %c0_17] : memref<16x64xf32, #tpu.memory_space<vmem>>, vector<16x8xf32>
    tpu.vector_store %arg11[%c0_16, %c0_17], %25 {strides = array<i32>} : memref<16x64xf32, #tpu.memory_space<vmem>>, vector<16x8xf32>,
    %27 = vector.extract_strided_slice %14 {offsets = [0, 0, 8], sizes = [1, 16, 8], strides = [1, 1, 1]} : vector<1x16x64xf32> to vector<1x16x8xf32>
    %28 = vector.extract_strided_slice %16 {offsets = [0, 0, 8], sizes = [1, 8, 8], strides = [1, 1, 1]} : vector<1x8x64xf32> to vector<1x8x8xf32>
    "tpu.trace_start"() <{level = 10 : i32, message = "bqd,bkd->bqk"}> : () -> ()
    %cst_18 = arith.constant dense<0.000000e+00> : vector<1x16x8xf32>
    %29 = tpu.matmul %27, %28, %cst_18 {dimension_numbers = #tpu.dot_dimension_numbers<[2], [2], [1], [1], [0, 0, 0, 1, 1, 1], [0], [0]>} : vector<1x16x8xf32>, vector<1x8x8xf32>, vector<1x16x8xf32> -> vector<1x16x8xf32>
    "tpu.trace_stop"() : () -> ()
    %cst_19 = arith.constant dense<0xFF800000> : vector<1x16xf32>
    %30 = vector.multi_reduction <maximumf>, %29, %cst_19 [2] : vector<1x16x8xf32> to vector<1x16xf32>
    %31 = vector.shape_cast %30 : vector<1x16xf32> to vector<1x16x1xf32>
    %32 = vector.broadcast %31 : vector<1x16x1xf32> to vector<1x16x8xf32>
    %33 = arith.subf %29, %32 : vector<1x16x8xf32>
    %34 = vector.shape_cast %33 : vector<1x16x8xf32> to vector<16x8xf32>
    %c0_20 = arith.constant 0 : index
    %c8 = arith.constant 8 : index
    %35 = vector.load %arg11[%c0_20, %c8] : memref<16x64xf32, #tpu.memory_space<vmem>>, vector<16x8xf32>
    tpu.vector_store %arg11[%c0_20, %c8], %34 {strides = array<i32>} : memref<16x64xf32, #tpu.memory_space<vmem>>, vector<16x8xf32>,
    %36 = vector.extract_strided_slice %14 {offsets = [0, 0, 16], sizes = [1, 16, 8], strides = [1, 1, 1]} : vector<1x16x64xf32> to vector<1x16x8xf32>
    %37 = vector.extract_strided_slice %16 {offsets = [0, 0, 16], sizes = [1, 8, 8], strides = [1, 1, 1]} : vector<1x8x64xf32> to vector<1x8x8xf32>
    "tpu.trace_start"() <{level = 10 : i32, message = "bqd,bkd->bqk"}> : () -> ()
    %cst_21 = arith.constant dense<0.000000e+00> : vector<1x16x8xf32>
    %38 = tpu.matmul %36, %37, %cst_21 {dimension_numbers = #tpu.dot_dimension_numbers<[2], [2], [1], [1], [0, 0, 0, 1, 1, 1], [0], [0]>} : vector<1x16x8xf32>, vector<1x8x8xf32>, vector<1x16x8xf32> -> vector<1x16x8xf32>
    "tpu.trace_stop"() : () -> ()
    %cst_22 = arith.constant dense<0xFF800000> : vector<1x16xf32>
    %39 = vector.multi_reduction <maximumf>, %38, %cst_22 [2] : vector<1x16x8xf32> to vector<1x16xf32>
    %40 = vector.shape_cast %39 : vector<1x16xf32> to vector<1x16x1xf32>
    %41 = vector.broadcast %40 : vector<1x16x1xf32> to vector<1x16x8xf32>
    %42 = arith.subf %38, %41 : vector<1x16x8xf32>
    %43 = vector.shape_cast %42 : vector<1x16x8xf32> to vector<16x8xf32>
    %c0_23 = arith.constant 0 : index
    %c16 = arith.constant 16 : index
    %44 = vector.load %arg11[%c0_23, %c16] : memref<16x64xf32, #tpu.memory_space<vmem>>, vector<16x8xf32>
    tpu.vector_store %arg11[%c0_23, %c16], %43 {strides = array<i32>} : memref<16x64xf32, #tpu.memory_space<vmem>>, vector<16x8xf32>,
    %45 = vector.extract_strided_slice %14 {offsets = [0, 0, 24], sizes = [1, 16, 8], strides = [1, 1, 1]} : vector<1x16x64xf32> to vector<1x16x8xf32>
    %46 = vector.extract_strided_slice %16 {offsets = [0, 0, 24], sizes = [1, 8, 8], strides = [1, 1, 1]} : vector<1x8x64xf32> to vector<1x8x8xf32>
    "tpu.trace_start"() <{level = 10 : i32, message = "bqd,bkd->bqk"}> : () -> ()
    %cst_24 = arith.constant dense<0.000000e+00> : vector<1x16x8xf32>
    %47 = tpu.matmul %45, %46, %cst_24 {dimension_numbers = #tpu.dot_dimension_numbers<[2], [2], [1], [1], [0, 0, 0, 1, 1, 1], [0], [0]>} : vector<1x16x8xf32>, vector<1x8x8xf32>, vector<1x16x8xf32> -> vector<1x16x8xf32>
    "tpu.trace_stop"() : () -> ()
    %cst_25 = arith.constant dense<0xFF800000> : vector<1x16xf32>
    %48 = vector.multi_reduction <maximumf>, %47, %cst_25 [2] : vector<1x16x8xf32> to vector<1x16xf32>
    %49 = vector.shape_cast %48 : vector<1x16xf32> to vector<1x16x1xf32>
    %50 = vector.broadcast %49 : vector<1x16x1xf32> to vector<1x16x8xf32>
    %51 = arith.subf %47, %50 : vector<1x16x8xf32>
    %52 = vector.shape_cast %51 : vector<1x16x8xf32> to vector<16x8xf32>
    %c0_26 = arith.constant 0 : index
    %c24 = arith.constant 24 : index
    %53 = vector.load %arg11[%c0_26, %c24] : memref<16x64xf32, #tpu.memory_space<vmem>>, vector<16x8xf32>
    tpu.vector_store %arg11[%c0_26, %c24], %52 {strides = array<i32>} : memref<16x64xf32, #tpu.memory_space<vmem>>, vector<16x8xf32>,
    %54 = vector.extract_strided_slice %14 {offsets = [0, 0, 32], sizes = [1, 16, 8], strides = [1, 1, 1]} : vector<1x16x64xf32> to vector<1x16x8xf32>
    %55 = vector.extract_strided_slice %16 {offsets = [0, 0, 32], sizes = [1, 8, 8], strides = [1, 1, 1]} : vector<1x8x64xf32> to vector<1x8x8xf32>
    "tpu.trace_start"() <{level = 10 : i32, message = "bqd,bkd->bqk"}> : () -> ()
    %cst_27 = arith.constant dense<0.000000e+00> : vector<1x16x8xf32>
    %56 = tpu.matmul %54, %55, %cst_27 {dimension_numbers = #tpu.dot_dimension_numbers<[2], [2], [1], [1], [0, 0, 0, 1, 1, 1], [0], [0]>} : vector<1x16x8xf32>, vector<1x8x8xf32>, vector<1x16x8xf32> -> vector<1x16x8xf32>
    "tpu.trace_stop"() : () -> ()
    %cst_28 = arith.constant dense<0xFF800000> : vector<1x16xf32>
    %57 = vector.multi_reduction <maximumf>, %56, %cst_28 [2] : vector<1x16x8xf32> to vector<1x16xf32>
    %58 = vector.shape_cast %57 : vector<1x16xf32> to vector<1x16x1xf32>
    %59 = vector.broadcast %58 : vector<1x16x1xf32> to vector<1x16x8xf32>
    %60 = arith.subf %56, %59 : vector<1x16x8xf32>
    %61 = vector.shape_cast %60 : vector<1x16x8xf32> to vector<16x8xf32>
    %c0_29 = arith.constant 0 : index
    %c32 = arith.constant 32 : index
    %62 = vector.load %arg11[%c0_29, %c32] : memref<16x64xf32, #tpu.memory_space<vmem>>, vector<16x8xf32>
    tpu.vector_store %arg11[%c0_29, %c32], %61 {strides = array<i32>} : memref<16x64xf32, #tpu.memory_space<vmem>>, vector<16x8xf32>,
    %63 = vector.extract_strided_slice %14 {offsets = [0, 0, 40], sizes = [1, 16, 8], strides = [1, 1, 1]} : vector<1x16x64xf32> to vector<1x16x8xf32>
    %64 = vector.extract_strided_slice %16 {offsets = [0, 0, 40], sizes = [1, 8, 8], strides = [1, 1, 1]} : vector<1x8x64xf32> to vector<1x8x8xf32>
    "tpu.trace_start"() <{level = 10 : i32, message = "bqd,bkd->bqk"}> : () -> ()
    %cst_30 = arith.constant dense<0.000000e+00> : vector<1x16x8xf32>
    %65 = tpu.matmul %63, %64, %cst_30 {dimension_numbers = #tpu.dot_dimension_numbers<[2], [2], [1], [1], [0, 0, 0, 1, 1, 1], [0], [0]>} : vector<1x16x8xf32>, vector<1x8x8xf32>, vector<1x16x8xf32> -> vector<1x16x8xf32>
    "tpu.trace_stop"() : () -> ()
    %cst_31 = arith.constant dense<0xFF800000> : vector<1x16xf32>
    %66 = vector.multi_reduction <maximumf>, %65, %cst_31 [2] : vector<1x16x8xf32> to vector<1x16xf32>
    %67 = vector.shape_cast %66 : vector<1x16xf32> to vector<1x16x1xf32>
    %68 = vector.broadcast %67 : vector<1x16x1xf32> to vector<1x16x8xf32>
    %69 = arith.subf %65, %68 : vector<1x16x8xf32>
    %70 = vector.shape_cast %69 : vector<1x16x8xf32> to vector<16x8xf32>
    %c0_32 = arith.constant 0 : index
    %c40 = arith.constant 40 : index
    %71 = vector.load %arg11[%c0_32, %c40] : memref<16x64xf32, #tpu.memory_space<vmem>>, vector<16x8xf32>
    tpu.vector_store %arg11[%c0_32, %c40], %70 {strides = array<i32>} : memref<16x64xf32, #tpu.memory_space<vmem>>, vector<16x8xf32>,
    %72 = vector.extract_strided_slice %14 {offsets = [0, 0, 48], sizes = [1, 16, 8], strides = [1, 1, 1]} : vector<1x16x64xf32> to vector<1x16x8xf32>
    %73 = vector.extract_strided_slice %16 {offsets = [0, 0, 48], sizes = [1, 8, 8], strides = [1, 1, 1]} : vector<1x8x64xf32> to vector<1x8x8xf32>
    "tpu.trace_start"() <{level = 10 : i32, message = "bqd,bkd->bqk"}> : () -> ()
    %cst_33 = arith.constant dense<0.000000e+00> : vector<1x16x8xf32>
    %74 = tpu.matmul %72, %73, %cst_33 {dimension_numbers = #tpu.dot_dimension_numbers<[2], [2], [1], [1], [0, 0, 0, 1, 1, 1], [0], [0]>} : vector<1x16x8xf32>, vector<1x8x8xf32>, vector<1x16x8xf32> -> vector<1x16x8xf32>
    "tpu.trace_stop"() : () -> ()
    %cst_34 = arith.constant dense<0xFF800000> : vector<1x16xf32>
    %75 = vector.multi_reduction <maximumf>, %74, %cst_34 [2] : vector<1x16x8xf32> to vector<1x16xf32>
    %76 = vector.shape_cast %75 : vector<1x16xf32> to vector<1x16x1xf32>
    %77 = vector.broadcast %76 : vector<1x16x1xf32> to vector<1x16x8xf32>
    %78 = arith.subf %74, %77 : vector<1x16x8xf32>
    %79 = vector.shape_cast %78 : vector<1x16x8xf32> to vector<16x8xf32>
    %c0_35 = arith.constant 0 : index
    %c48 = arith.constant 48 : index
    %80 = vector.load %arg11[%c0_35, %c48] : memref<16x64xf32, #tpu.memory_space<vmem>>, vector<16x8xf32>
    tpu.vector_store %arg11[%c0_35, %c48], %79 {strides = array<i32>} : memref<16x64xf32, #tpu.memory_space<vmem>>, vector<16x8xf32>,
    %81 = vector.extract_strided_slice %14 {offsets = [0, 0, 56], sizes = [1, 16, 8], strides = [1, 1, 1]} : vector<1x16x64xf32> to vector<1x16x8xf32>
    %82 = vector.extract_strided_slice %16 {offsets = [0, 0, 56], sizes = [1, 8, 8], strides = [1, 1, 1]} : vector<1x8x64xf32> to vector<1x8x8xf32>
    "tpu.trace_start"() <{level = 10 : i32, message = "bqd,bkd->bqk"}> : () -> ()
    %cst_36 = arith.constant dense<0.000000e+00> : vector<1x16x8xf32>
    %83 = tpu.matmul %81, %82, %cst_36 {dimension_numbers = #tpu.dot_dimension_numbers<[2], [2], [1], [1], [0, 0, 0, 1, 1, 1], [0], [0]>} : vector<1x16x8xf32>, vector<1x8x8xf32>, vector<1x16x8xf32> -> vector<1x16x8xf32>
    "tpu.trace_stop"() : () -> ()
    %cst_37 = arith.constant dense<0xFF800000> : vector<1x16xf32>
    %84 = vector.multi_reduction <maximumf>, %83, %cst_37 [2] : vector<1x16x8xf32> to vector<1x16xf32>
    %85 = vector.shape_cast %84 : vector<1x16xf32> to vector<1x16x1xf32>
    %86 = vector.broadcast %85 : vector<1x16x1xf32> to vector<1x16x8xf32>
    %87 = arith.subf %83, %86 : vector<1x16x8xf32>
    %88 = vector.shape_cast %87 : vector<1x16x8xf32> to vector<16x8xf32>
    %c0_38 = arith.constant 0 : index
    %c56 = arith.constant 56 : index
    %89 = vector.load %arg11[%c0_38, %c56] : memref<16x64xf32, #tpu.memory_space<vmem>>, vector<16x8xf32>
    tpu.vector_store %arg11[%c0_38, %c56], %88 {strides = array<i32>} : memref<16x64xf32, #tpu.memory_space<vmem>>, vector<16x8xf32>,
    %c0_39 = arith.constant 0 : index
    %c0_40 = arith.constant 0 : index
    %90 = vector.load %arg11[%c0_39, %c0_40] : memref<16x64xf32, #tpu.memory_space<vmem>>, vector<16x64xf32>
    %91 = math.exp %90 : vector<16x64xf32>
    %c0_41 = arith.constant 0 : index
    %c0_42 = arith.constant 0 : index
    %92 = vector.load %arg9[%c0_41, %c0_42] : memref<64x64xf32, #tpu.memory_space<vmem>>, vector<64x64xf32>
    %cst_43 = arith.constant dense<0.000000e+00> : vector<16x64xf32>
    %93 = tpu.matmul %91, %92, %cst_43 {dimension_numbers = #tpu.dot_dimension_numbers<[1], [0], [0], [1], [0, 0, 1, 1], [], []>} : vector<16x64xf32>, vector<64x64xf32>, vector<16x64xf32> -> vector<16x64xf32>
    %94 = arith.divf %91, %93 : vector<16x64xf32>
    %95 = vector.shape_cast %94 : vector<16x64xf32> to vector<1x16x64xf32>
    %96 = vector.extract_strided_slice %17 {offsets = [0, 0, 0], sizes = [1, 8, 8], strides = [1, 1, 1]} : vector<1x8x64xf32> to vector<1x8x8xf32>
    %97 = vector.extract_strided_slice %95 {offsets = [0, 0, 0], sizes = [1, 16, 8], strides = [1, 1, 1]} : vector<1x16x64xf32> to vector<1x16x8xf32>
    "tpu.trace_start"() <{level = 10 : i32, message = "bqk,bkd->bqd"}> : () -> ()
    %cst_44 = arith.constant dense<0.000000e+00> : vector<1x16x8xf32>
    %98 = tpu.matmul %97, %96, %cst_44 {dimension_numbers = #tpu.dot_dimension_numbers<[2], [1], [1], [2], [0, 0, 0, 1, 1, 2], [0], [0]>} : vector<1x16x8xf32>, vector<1x8x8xf32>, vector<1x16x8xf32> -> vector<1x16x8xf32>
    "tpu.trace_stop"() : () -> ()
    %99 = vector.shape_cast %98 : vector<1x16x8xf32> to vector<16x8xf32>
    %c0_45 = arith.constant 0 : index
    %c0_46 = arith.constant 0 : index
    %100 = vector.load %arg12[%c0_45, %c0_46] : memref<16x64xf32, #tpu.memory_space<vmem>>, vector<16x8xf32>
    tpu.vector_store %arg12[%c0_45, %c0_46], %99 {strides = array<i32>} : memref<16x64xf32, #tpu.memory_space<vmem>>, vector<16x8xf32>,
    %101 = vector.extract_strided_slice %17 {offsets = [0, 0, 8], sizes = [1, 8, 8], strides = [1, 1, 1]} : vector<1x8x64xf32> to vector<1x8x8xf32>
    %102 = vector.extract_strided_slice %95 {offsets = [0, 0, 8], sizes = [1, 16, 8], strides = [1, 1, 1]} : vector<1x16x64xf32> to vector<1x16x8xf32>
    "tpu.trace_start"() <{level = 10 : i32, message = "bqk,bkd->bqd"}> : () -> ()
    %cst_47 = arith.constant dense<0.000000e+00> : vector<1x16x8xf32>
    %103 = tpu.matmul %102, %101, %cst_47 {dimension_numbers = #tpu.dot_dimension_numbers<[2], [1], [1], [2], [0, 0, 0, 1, 1, 2], [0], [0]>} : vector<1x16x8xf32>, vector<1x8x8xf32>, vector<1x16x8xf32> -> vector<1x16x8xf32>
    "tpu.trace_stop"() : () -> ()
    %104 = vector.shape_cast %103 : vector<1x16x8xf32> to vector<16x8xf32>
    %c0_48 = arith.constant 0 : index
    %c8_49 = arith.constant 8 : index
    %105 = vector.load %arg12[%c0_48, %c8_49] : memref<16x64xf32, #tpu.memory_space<vmem>>, vector<16x8xf32>
    tpu.vector_store %arg12[%c0_48, %c8_49], %104 {strides = array<i32>} : memref<16x64xf32, #tpu.memory_space<vmem>>, vector<16x8xf32>,
    %106 = vector.extract_strided_slice %17 {offsets = [0, 0, 16], sizes = [1, 8, 8], strides = [1, 1, 1]} : vector<1x8x64xf32> to vector<1x8x8xf32>
    %107 = vector.extract_strided_slice %95 {offsets = [0, 0, 16], sizes = [1, 16, 8], strides = [1, 1, 1]} : vector<1x16x64xf32> to vector<1x16x8xf32>
    "tpu.trace_start"() <{level = 10 : i32, message = "bqk,bkd->bqd"}> : () -> ()
    %cst_50 = arith.constant dense<0.000000e+00> : vector<1x16x8xf32>
    %108 = tpu.matmul %107, %106, %cst_50 {dimension_numbers = #tpu.dot_dimension_numbers<[2], [1], [1], [2], [0, 0, 0, 1, 1, 2], [0], [0]>} : vector<1x16x8xf32>, vector<1x8x8xf32>, vector<1x16x8xf32> -> vector<1x16x8xf32>
    "tpu.trace_stop"() : () -> ()
    %109 = vector.shape_cast %108 : vector<1x16x8xf32> to vector<16x8xf32>
    %c0_51 = arith.constant 0 : index
    %c16_52 = arith.constant 16 : index
    %110 = vector.load %arg12[%c0_51, %c16_52] : memref<16x64xf32, #tpu.memory_space<vmem>>, vector<16x8xf32>
    tpu.vector_store %arg12[%c0_51, %c16_52], %109 {strides = array<i32>} : memref<16x64xf32, #tpu.memory_space<vmem>>, vector<16x8xf32>,
    %111 = vector.extract_strided_slice %17 {offsets = [0, 0, 24], sizes = [1, 8, 8], strides = [1, 1, 1]} : vector<1x8x64xf32> to vector<1x8x8xf32>
    %112 = vector.extract_strided_slice %95 {offsets = [0, 0, 24], sizes = [1, 16, 8], strides = [1, 1, 1]} : vector<1x16x64xf32> to vector<1x16x8xf32>
    "tpu.trace_start"() <{level = 10 : i32, message = "bqk,bkd->bqd"}> : () -> ()
    %cst_53 = arith.constant dense<0.000000e+00> : vector<1x16x8xf32>
    %113 = tpu.matmul %112, %111, %cst_53 {dimension_numbers = #tpu.dot_dimension_numbers<[2], [1], [1], [2], [0, 0, 0, 1, 1, 2], [0], [0]>} : vector<1x16x8xf32>, vector<1x8x8xf32>, vector<1x16x8xf32> -> vector<1x16x8xf32>
    "tpu.trace_stop"() : () -> ()
    %114 = vector.shape_cast %113 : vector<1x16x8xf32> to vector<16x8xf32>
    %c0_54 = arith.constant 0 : index
    %c24_55 = arith.constant 24 : index
    %115 = vector.load %arg12[%c0_54, %c24_55] : memref<16x64xf32, #tpu.memory_space<vmem>>, vector<16x8xf32>
    tpu.vector_store %arg12[%c0_54, %c24_55], %114 {strides = array<i32>} : memref<16x64xf32, #tpu.memory_space<vmem>>, vector<16x8xf32>,
    %116 = vector.extract_strided_slice %17 {offsets = [0, 0, 32], sizes = [1, 8, 8], strides = [1, 1, 1]} : vector<1x8x64xf32> to vector<1x8x8xf32>
    %117 = vector.extract_strided_slice %95 {offsets = [0, 0, 32], sizes = [1, 16, 8], strides = [1, 1, 1]} : vector<1x16x64xf32> to vector<1x16x8xf32>
    "tpu.trace_start"() <{level = 10 : i32, message = "bqk,bkd->bqd"}> : () -> ()
    %cst_56 = arith.constant dense<0.000000e+00> : vector<1x16x8xf32>
    %118 = tpu.matmul %117, %116, %cst_56 {dimension_numbers = #tpu.dot_dimension_numbers<[2], [1], [1], [2], [0, 0, 0, 1, 1, 2], [0], [0]>} : vector<1x16x8xf32>, vector<1x8x8xf32>, vector<1x16x8xf32> -> vector<1x16x8xf32>
    "tpu.trace_stop"() : () -> ()
    %119 = vector.shape_cast %118 : vector<1x16x8xf32> to vector<16x8xf32>
    %c0_57 = arith.constant 0 : index
    %c32_58 = arith.constant 32 : index
    %120 = vector.load %arg12[%c0_57, %c32_58] : memref<16x64xf32, #tpu.memory_space<vmem>>, vector<16x8xf32>
    tpu.vector_store %arg12[%c0_57, %c32_58], %119 {strides = array<i32>} : memref<16x64xf32, #tpu.memory_space<vmem>>, vector<16x8xf32>,
    %121 = vector.extract_strided_slice %17 {offsets = [0, 0, 40], sizes = [1, 8, 8], strides = [1, 1, 1]} : vector<1x8x64xf32> to vector<1x8x8xf32>
    %122 = vector.extract_strided_slice %95 {offsets = [0, 0, 40], sizes = [1, 16, 8], strides = [1, 1, 1]} : vector<1x16x64xf32> to vector<1x16x8xf32>
    "tpu.trace_start"() <{level = 10 : i32, message = "bqk,bkd->bqd"}> : () -> ()
    %cst_59 = arith.constant dense<0.000000e+00> : vector<1x16x8xf32>
    %123 = tpu.matmul %122, %121, %cst_59 {dimension_numbers = #tpu.dot_dimension_numbers<[2], [1], [1], [2], [0, 0, 0, 1, 1, 2], [0], [0]>} : vector<1x16x8xf32>, vector<1x8x8xf32>, vector<1x16x8xf32> -> vector<1x16x8xf32>
    "tpu.trace_stop"() : () -> ()
    %124 = vector.shape_cast %123 : vector<1x16x8xf32> to vector<16x8xf32>
    %c0_60 = arith.constant 0 : index
    %c40_61 = arith.constant 40 : index
    %125 = vector.load %arg12[%c0_60, %c40_61] : memref<16x64xf32, #tpu.memory_space<vmem>>, vector<16x8xf32>
    tpu.vector_store %arg12[%c0_60, %c40_61], %124 {strides = array<i32>} : memref<16x64xf32, #tpu.memory_space<vmem>>, vector<16x8xf32>,
    %126 = vector.extract_strided_slice %17 {offsets = [0, 0, 48], sizes = [1, 8, 8], strides = [1, 1, 1]} : vector<1x8x64xf32> to vector<1x8x8xf32>
    %127 = vector.extract_strided_slice %95 {offsets = [0, 0, 48], sizes = [1, 16, 8], strides = [1, 1, 1]} : vector<1x16x64xf32> to vector<1x16x8xf32>
    "tpu.trace_start"() <{level = 10 : i32, message = "bqk,bkd->bqd"}> : () -> ()
    %cst_62 = arith.constant dense<0.000000e+00> : vector<1x16x8xf32>
    %128 = tpu.matmul %127, %126, %cst_62 {dimension_numbers = #tpu.dot_dimension_numbers<[2], [1], [1], [2], [0, 0, 0, 1, 1, 2], [0], [0]>} : vector<1x16x8xf32>, vector<1x8x8xf32>, vector<1x16x8xf32> -> vector<1x16x8xf32>
    "tpu.trace_stop"() : () -> ()
    %129 = vector.shape_cast %128 : vector<1x16x8xf32> to vector<16x8xf32>
    %c0_63 = arith.constant 0 : index
    %c48_64 = arith.constant 48 : index
    %130 = vector.load %arg12[%c0_63, %c48_64] : memref<16x64xf32, #tpu.memory_space<vmem>>, vector<16x8xf32>
    tpu.vector_store %arg12[%c0_63, %c48_64], %129 {strides = array<i32>} : memref<16x64xf32, #tpu.memory_space<vmem>>, vector<16x8xf32>,
    %131 = vector.extract_strided_slice %17 {offsets = [0, 0, 56], sizes = [1, 8, 8], strides = [1, 1, 1]} : vector<1x8x64xf32> to vector<1x8x8xf32>
    %132 = vector.extract_strided_slice %95 {offsets = [0, 0, 56], sizes = [1, 16, 8], strides = [1, 1, 1]} : vector<1x16x64xf32> to vector<1x16x8xf32>
    "tpu.trace_start"() <{level = 10 : i32, message = "bqk,bkd->bqd"}> : () -> ()
    %cst_65 = arith.constant dense<0.000000e+00> : vector<1x16x8xf32>
    %133 = tpu.matmul %132, %131, %cst_65 {dimension_numbers = #tpu.dot_dimension_numbers<[2], [1], [1], [2], [0, 0, 0, 1, 1, 2], [0], [0]>} : vector<1x16x8xf32>, vector<1x8x8xf32>, vector<1x16x8xf32> -> vector<1x16x8xf32>
    "tpu.trace_stop"() : () -> ()
    %134 = vector.shape_cast %133 : vector<1x16x8xf32> to vector<16x8xf32>
    %c0_66 = arith.constant 0 : index
    %c56_67 = arith.constant 56 : index
    %135 = vector.load %arg12[%c0_66, %c56_67] : memref<16x64xf32, #tpu.memory_space<vmem>>, vector<16x8xf32>
    tpu.vector_store %arg12[%c0_66, %c56_67], %134 {strides = array<i32>} : memref<16x64xf32, #tpu.memory_space<vmem>>, vector<16x8xf32>,
    %c0_68 = arith.constant 0 : index
    %c0_69 = arith.constant 0 : index
    %136 = vector.load %arg12[%c0_68, %c0_69] : memref<16x64xf32, #tpu.memory_space<vmem>>, vector<16x64xf32>
    %c0_70 = arith.constant 0 : index
    %c0_71 = arith.constant 0 : index
    %137 = vector.load %arg7[%c0_70, %c0_71] : memref<64x1024xf32, #tpu.memory_space<vmem>>, vector<64x1024xf32>
    %cst_72 = arith.constant dense<0.000000e+00> : vector<16x1024xf32>
    %138 = tpu.matmul %136, %137, %cst_72 {dimension_numbers = #tpu.dot_dimension_numbers<[1], [0], [0], [1], [0, 0, 1, 1], [], []>} : vector<16x64xf32>, vector<64x1024xf32>, vector<16x1024xf32> -> vector<16x1024xf32>
    %c0_73 = arith.constant 0 : index
    %c0_74 = arith.constant 0 : index
    %139 = vector.load %arg8[%c0_73, %c0_74] : memref<1x1024xf32, #tpu.memory_space<vmem>>, vector<1x1024xf32>
    %140 = vector.broadcast %139 : vector<1x1024xf32> to vector<16x1024xf32>
    %141 = arith.addf %138, %140 : vector<16x1024xf32>
    %142 = vector.shape_cast %141 : vector<16x1024xf32> to vector<1x16x1024xf32>
    %c0_75 = arith.constant 0 : index
    %c0_76 = arith.constant 0 : index
    %c0_77 = arith.constant 0 : index
    %143 = vector.load %arg10[%c0_75, %c0_76, %c0_77] : memref<1x16x1024xf32, #tpu.memory_space<vmem>>, vector<1x16x1024xf32>
    tpu.vector_store %arg10[%c0_75, %c0_76, %c0_77], %142 {strides = array<i32>} : memref<1x16x1024xf32, #tpu.memory_space<vmem>>, vector<1x16x1024xf32>,
    return
  }
  func.func @transform_0(%arg0: i32) -> (i32, i32, i32) {
    %c0_i32 = arith.constant 0 : i32
    %c0_i32_0 = arith.constant 0 : i32
    %c0_i32_1 = arith.constant 0 : i32
    return %arg0, %c0_i32, %c0_i32_0 : i32, i32, i32
  }
  func.func @transform_1(%arg0: i32) -> (i32, i32, i32) {
    %c0_i32 = arith.constant 0 : i32
    %c0_i32_0 = arith.constant 0 : i32
    %c0_i32_1 = arith.constant 0 : i32
    return %arg0, %c0_i32, %c0_i32_0 : i32, i32, i32
  }
  func.func @transform_2(%arg0: i32) -> (i32, i32) {
    %c0_i32 = arith.constant 0 : i32
    %c0_i32_0 = arith.constant 0 : i32
    %c0_i32_1 = arith.constant 0 : i32
    return %c0_i32, %c0_i32_0 : i32, i32
  }
  func.func @transform_3(%arg0: i32) -> (i32, i32) {
    %c0_i32 = arith.constant 0 : i32
    %c0_i32_0 = arith.constant 0 : i32
    %c0_i32_1 = arith.constant 0 : i32
    return %c0_i32, %c0_i32_0 : i32, i32
  }
  func.func @transform_4(%arg0: i32) -> (i32, i32) {
    %c0_i32 = arith.constant 0 : i32
    %c0_i32_0 = arith.constant 0 : i32
    %c0_i32_1 = arith.constant 0 : i32
    return %c0_i32, %c0_i32_0 : i32, i32
  }
  func.func @transform_5(%arg0: i32) -> (i32, i32) {
    %c0_i32 = arith.constant 0 : i32
    %c0_i32_0 = arith.constant 0 : i32
    %c0_i32_1 = arith.constant 0 : i32
    return %c0_i32, %c0_i32_0 : i32, i32
  }
  func.func @transform_6(%arg0: i32) -> (i32, i32) {
    %c0_i32 = arith.constant 0 : i32
    %c0_i32_0 = arith.constant 0 : i32
    %c0_i32_1 = arith.constant 0 : i32
    return %c0_i32, %c0_i32_0 : i32, i32
  }
  func.func @transform_7(%arg0: i32) -> (i32, i32) {
    %c0_i32 = arith.constant 0 : i32
    %c0_i32_0 = arith.constant 0 : i32
    %c0_i32_1 = arith.constant 0 : i32
    return %c0_i32, %c0_i32_0 : i32, i32
  }
  func.func @transform_8(%arg0: i32) -> (i32, i32) {
    %c0_i32 = arith.constant 0 : i32
    %c0_i32_0 = arith.constant 0 : i32
    %c0_i32_1 = arith.constant 0 : i32
    return %c0_i32, %c0_i32_0 : i32, i32
  }
  func.func @transform_9(%arg0: i32) -> (i32, i32, i32) {
    %c0_i32 = arith.constant 0 : i32
    %c0_i32_0 = arith.constant 0 : i32
    %c0_i32_1 = arith.constant 0 : i32
    return %arg0, %c0_i32, %c0_i32_0 : i32, i32, i32
  }
}

</mosaic_0001>

<bundles_post_ra>
// kernel: tpu_custom_call.1
= control target key start
LH: loop header
LB: loop body
LE: loop exit
PB: predicated region body
PF: predicated region fallthrough
CT: control target
= control target key end

     0   :  { %s4398_s0 = inlined_call_operand.hbm [shape: f32[2,16,64], index: 0, kind: input, shape index: {}]   ;;  %s4399_s1 = inlined_call_operand.hbm [shape: f32[2,8,64], index: 1, kind: input, shape index: {}]   ;;  %s4400_s2 = inlined_call_operand.hbm [shape: f32[64,64], index: 2, kind: input, shape index: {}]   ;;  %s4401_s3 = inlined_call_operand.vmem [shape: f32[1,64], index: 3, kind: input, shape index: {}]   ;;  %s4402_s4 = inlined_call_operand.hbm [shape: f32[64,128], index: 4, kind: input, shape index: {}]   ;;  %s4403_s5 = inlined_call_operand.vmem [shape: f32[1,128], index: 5, kind: input, shape index: {}]   ;;  %s4404_s6 = inlined_call_operand.hbm [shape: f32[64,1024], index: 6, kind: input, shape index: {}]   ;;  %s4405_s7 = inlined_call_operand.vmem [shape: f32[1,1024], index: 7, kind: input, shape index: {}]   ;;  %s4406_s8 = inlined_call_operand.hbm [shape: f32[64,64], index: 8, kind: input, shape index: {}]   ;;  %s4407_s9 = inlined_call_operand.hbm [shape: f32[2,16,1024], index: 9, kind: output, shape index: {}]  }
   0x1   :  { %4419 = sst [smem:[#allocation24_spill]] %s4398_s0 }
   0x2   :  { %4420 = sst [smem:[#allocation25_spill]] %s4400_s2 }
   0x3   :  { %4421 = sst [smem:[#allocation26_spill]] %s4402_s4 }
   0x4   :  { %4422 = sst [smem:[#allocation27_spill]] %s4404_s6 }
   0x5   :  { %4423 = sst [smem:[#allocation28_spill]] %s4407_s9 }
   0x6   :  { %14 = vsyncpa [#allocation5], 0 }
   0x7   :  { %16 = vsyncpa [#allocation5 + $0x1], 0 }
   0x8   :  { %17 = vsyncpa [#allocation8], 0 }
   0x9   :  { %19 = vsyncpa [#allocation8 + $0x1], 0 }
   0xa   :  { %20 = vsyncpa [#allocation11], 0 }
   0xb   :  { %21 = vsyncpa [#allocation14], 0 }
   0xc   :  { %22 = vsyncpa [#allocation6], 0 }
   0xd   :  { %24 = vsyncpa [#allocation6 + $0x1], 0  ;;  %s3777_s30 = smov 0   ;;  %s3779_s10 = smov 0  }
   0xe   :  { %s3781_s11 = smov 0   ;;  %s3783_s12 = smov 0  }
   0xf LB: > { %4424 = sst [smem:[#allocation22_spill]] %s3683_s30  ;;  %s3798_s13 = sadd.s32 4294967295, %s3695_s12   ;;  %s3695_s12 = sphi %s3783_s12, %s4458_s12   ;;  %s3691_s11 = sphi %s3781_s11, %s4457_s11   ;;  %s3687_s10 = sphi %s3779_s10, %s4456_s10   ;;  %s3683_s30 = sphi %s3777_s30, %s4455_s30  }
  0x10   : > { %s2914_s14 = sadd.s32 4294967294, %s3695_s12   ;;  %p50_p0 = scmp.ne.s32.totalorder %s3687_s10, %s3683_s30 }
  0x11   : > { %p4408_p1 = scmp.eq.s32.totalorder %s3798_s13, 0  ;;  %p253_p3 = scmp.eq.s32.totalorder %s2914_s14, 1 }
  0x12   : > { %p2915_p5 = scmp.ge.s32.totalorder %s3695_s12, 1  ;;  %p260_p7 = scmp.lt.s32.totalorder %s3695_s12, 3 }
  0x13   : > { %p3807_p4 = por %p4408_p1, %p50_p0  ;;  %p3812_p6 = por %p253_p3, %p50_p0 }
  0x14   : > { %p3817_p8 = pnand %p2915_p5, %p260_p7  ;;  %s3697_s18 = smov [#allocation9]  }
  0x15   : > { %s4425_s15 = scalar_select %p3807_p4, 1, 0 }
  0x16   : > { %s4426_s16 = scalar_select %p3812_p6, 1, 0 }
  0x17   : > { %s4428_s17 = scalar_select %p3817_p8, 1, 0 }
  0x18   : > { %4427 = sst [smem:[#allocation23_spill]] %s4426_s16  ;;  %s272_s19 = sshll.u32 %s3697_s18, 4  ;;  %s3821_s19 = int_to_ptr.vmem [resolvable:$true] %s272_s19 }
  0x19   : > { %p3340_p9 = pneg %p3817_p8  ;;  %s3698_s21 = smov [#allocation10]  }
  0x1a   : > { %s288_s22 = sshll.u32 %s3698_s21, 4  ;;  %s3699_s23 = smov [#allocation12]   ;;  %s3832_s22 = int_to_ptr.vmem [resolvable:$true] %s288_s22 }
  0x1b   : > { %p3828_p11 = pnand %p3340_p9, %p4408_p1  ;;  %s3834_s24 = sshll.u32 %s3699_s23, 4  ;;  %s305_s24 = int_to_ptr.vmem [resolvable:$true] %s3834_s24 }
  0x1c   : > { %s4430_s2 = sld [smem:[#allocation25_spill]] }
  0x1d   : > { %p3844_p13 = pneg %p3828_p11 }
  0x22   : > { %s3441_s27 = scalar_lea.hbm %s4430_s2, 1024 }
  0x23   : > { %p3442_p12 = scmp.ne.s32.totalorder %s4430_s2, %s3441_s27  ;;  %p3448_p5 = scmp.lt.u32.totalorder %s3441_s27, %s4430_s2 }
  0x25   : > { %p3444_p0 = pnand %p3844_p13, %p3442_p12 }
  0x27   : > { %p3445_p3 = pneg %p3444_p0 }
  0x29   : > { %p3450_p7 = pnand %p3448_p5, %p3445_p3 }
  0x2b   : > { %3453 = shalt.err (!%p3450_p7)
}
  0x2c   : > { %s3454_s23 = scalar_lea.vmem %s3821_s19, 1024  ;;  %p3462_p2 = scmp.lt.s32.totalorder %s3821_s19, %s3821_s19 }
  0x2d   : > { %p3455_p9 = scmp.ne.s32.totalorder %s3821_s19, %s3454_s23  ;;  %p3463_p6 = scmp.lt.s32.totalorder %s3454_s23, %s3454_s23 }
  0x2f   : > { %p3457_p10 = pnand %p3455_p9, %p3844_p13  ;;  %p3464_p12 = por %p3463_p6, %p3462_p2 }
  0x31   : > { %p3458_p1 = pneg %p3457_p10 }
  0x33   : > { %p3465_p0 = pnand %p3464_p12, %p3458_p1 }
  0x35   : > { %3468 = shalt.err (!%p3465_p0)
}
  0x36   : > { %s4414_s25 = smov 128   ;;  %s4416_s26 = smov 8  }
  0x37   : > { %3343 = dma.hbm_to_vmem [thread:$0]  (!%p3828_p11), %s4430_s2, 1024, %s3821_s19, [#allocation8], %s4414_s25, %s4414_s25, %s4416_s26  }
  0x38   : > { %s4432_s4 = sld [smem:[#allocation26_spill]] }
  0x3e   : > { %s3469_s21 = scalar_lea.hbm %s4432_s4, 1024 }
  0x3f   : > { %p3470_p1 = scmp.ne.s32.totalorder %s4432_s4, %s3469_s21  ;;  %p3476_p10 = scmp.lt.u32.totalorder %s3469_s21, %s4432_s4 }
  0x41   : > { %p3472_p2 = pnand %p3470_p1, %p3844_p13 }
  0x43   : > { %p3473_p6 = pneg %p3472_p2 }
  0x45   : > { %p3478_p3 = pnand %p3476_p10, %p3473_p6 }
  0x47   : > { %3481 = shalt.err (!%p3478_p3)
}
  0x48   : > { %s3482_s19 = scalar_lea.vmem %s3832_s22, 1024  ;;  %p3490_p12 = scmp.lt.s32.totalorder %s3832_s22, %s3832_s22 }
  0x49   : > { %p3483_p5 = scmp.ne.s32.totalorder %s3832_s22, %s3482_s19  ;;  %p3491_p0 = scmp.lt.s32.totalorder %s3482_s19, %s3482_s19 }
  0x4b   : > { %p3485_p7 = pnand %p3483_p5, %p3844_p13  ;;  %p3492_p1 = por %p3491_p0, %p3490_p12 }
  0x4d   : > { %p3486_p9 = pneg %p3485_p7 }
  0x4f   : > { %p3493_p2 = pnand %p3492_p1, %p3486_p9 }
  0x51   : > { %3496 = shalt.err (!%p3493_p2)
}
  0x52   : > { %3346 = dma.hbm_to_vmem [thread:$0]  (!%p3828_p11), %s4432_s4, 1024, %s3832_s22, [#allocation11], %s4414_s25, %s4414_s25, %s4416_s26  }
  0x53   : > { %s4433_s6 = sld [smem:[#allocation27_spill]] }
  0x59   : > { %s3497_s28 = scalar_lea.hbm %s4433_s6, 8192 }
  0x5a   : > { %p3498_p6 = scmp.ne.s32.totalorder %s4433_s6, %s3497_s28  ;;  %p3504_p5 = scmp.lt.u32.totalorder %s3497_s28, %s4433_s6 }
  0x5c   : > { %p3500_p10 = pnand %p3498_p6, %p3844_p13 }
  0x5e   : > { %p3501_p3 = pneg %p3500_p10 }
  0x60   : > { %p3506_p7 = pnand %p3504_p5, %p3501_p3 }
  0x62   : > { %3509 = shalt.err (!%p3506_p7)
}
  0x63   : > { %s3510_s19 = scalar_lea.vmem %s305_s24, 8192  ;;  %p3518_p1 = scmp.lt.s32.totalorder %s305_s24, %s305_s24 }
  0x64   : > { %p3511_p9 = scmp.ne.s32.totalorder %s305_s24, %s3510_s19  ;;  %p3519_p2 = scmp.lt.s32.totalorder %s3510_s19, %s3510_s19 }
  0x66   : > { %p3513_p12 = pnand %p3511_p9, %p3844_p13  ;;  %p3520_p4 = por %p3519_p2, %p3518_p1 }
  0x68   : > { %p3514_p0 = pneg %p3513_p12 }
  0x6a   : > { %p3521_p8 = pnand %p3520_p4, %p3514_p0 }
  0x6c   : > { %3524 = shalt.err (!%p3521_p8)
}
  0x6d   : > { %s3702_s22 = smov 1024   ;;  %s3703_s9 = smov 64  }
  0x6e   : > { %3349 = dma.hbm_to_vmem [thread:$0]  (!%p3828_p11), %s4433_s6, 8192, %s305_s24, [#allocation11], %s3702_s22, %s3702_s22, %s3703_s9  }
  0x6f   : > { %s3704_s27 = smov [#allocation13]   ;;  %s3525_s21 = scalar_lea.hbm %s4406_s8, 1024 }
  0x70   : > { %s320_s28 = sshll.u32 %s3704_s27, 4  ;;  %p3526_p4 = scmp.ne.s32.totalorder %s4406_s8, %s3525_s21  ;;  %s321_s28 = int_to_ptr.vmem [resolvable:$true] %s320_s28 }
  0x71   : > { %p3532_p10 = scmp.lt.u32.totalorder %s3525_s21, %s4406_s8 }
  0x72   : > { %p3528_p8 = pnand %p3526_p4, %p3844_p13 }
  0x74   : > { %p3529_p6 = pneg %p3528_p8 }
  0x76   : > { %p3534_p3 = pnand %p3532_p10, %p3529_p6 }
  0x78   : > { %3537 = shalt.err (!%p3534_p3)
}
  0x79   : > { %s3538_s24 = scalar_lea.vmem %s321_s28, 1024  ;;  %p3546_p12 = scmp.lt.s32.totalorder %s321_s28, %s321_s28 }
  0x7a   : > { %p3539_p5 = scmp.ne.s32.totalorder %s321_s28, %s3538_s24  ;;  %p3547_p0 = scmp.lt.s32.totalorder %s3538_s24, %s3538_s24 }
  0x7c   : > { %p3541_p7 = pnand %p3539_p5, %p3844_p13  ;;  %p3548_p1 = por %p3547_p0, %p3546_p12 }
  0x7e   : > { %p3542_p9 = pneg %p3541_p7 }
  0x80   : > { %p3549_p2 = pnand %p3548_p1, %p3542_p9 }
  0x82   : > { %3552 = shalt.err (!%p3549_p2)
}
  0x83   : > { %s4434_s22 = smov 8   ;;  %s4435_s9 = smov 128  }
  0x84   : > { %3352 = dma.hbm_to_vmem [thread:$0]  (!%p3828_p11), %s4406_s8, 1024, %s321_s28, [#allocation14], %s4435_s9, %s4435_s9, %s4434_s22  }
  0x85   : > { %s3935_s14 = sadd.s32 1, %s3695_s12   ;;  %s37_s20 = sadd.s32 1, %s3691_s11 }
  0x86   : > { %s34_s30 = ssub.s32 %s3695_s12, %s3935_s14  ;;  %p44_p13 = scmp.ne.s32.totalorder %s3691_s11, %s3687_s10 }
  0x87   : > { %p35_p4 = scmp.eq.s32.totalorder %s34_s30, 0  ;;  %p45_p8 = scmp.eq.s32.totalorder %s3695_s12, 0 }
  0x88   : > { %p4436_p6 = scmp.eq.s32.totalorder %s3798_s13, 1  ;;  %p3368_p3 = scmp.lt.s32.totalorder %s3695_s12, 2 }
  0x89   : > { %s3951_s27 = scalar_select %p35_p4, %s3691_s11, %s37_s20  }
  0x8a   : > { %p3945_p10 = por %p4436_p6, %p44_p13  ;;  %p46_p5 = por %p45_p8, %p44_p13 }
  0x8b   : > { %s3954_s29 = sand.u32 1, %s3691_s11   ;;  %s2994_s18 = sshll.u32 %s3695_s12, 8 }
  0x8c   : > { %s4437_s16 = scalar_select %p3945_p10, 1, 0 }
  0x8d   : > { %s2921_s28 = sshll.u32 %s3954_s29, 4  ;;  %s4438_s0 = sld [smem:[#allocation24_spill]] }
  0x8e   : > { %s338_s24 = scalar_lea.vmem [#allocation4], %s2921_s28  ;;  %p3965_p11 = pnand %p3368_p3, %p46_p5 }
  0x8f   : > { %s345_s25 = sshll.u32 %s338_s24, 4  ;;  %s2924_s30 = sshll.u32 %s3954_s29, 3  ;;  %s3963_s25 = int_to_ptr.vmem [resolvable:$true] %s345_s25 }
  0x90   : > { %s335_s2 = scalar_lea.sflag [#allocation5], %s3954_s29  ;;  %p3555_p9 = pneg %p3965_p11 }
  0x93   : > { %s3961_s19 = scalar_lea.hbm %s4438_s0, %s2994_s18  ;;  %s3558_s23 = scalar_lea.hbm %s4438_s0, 512 }
  0x94   : > { %s3553_s21 = scalar_lea.hbm %s3961_s19, 256  ;;  %p3559_p1 = scmp.lt.u32.totalorder %s3961_s19, %s4438_s0 }
  0x95   : > { %p3554_p7 = scmp.ne.s32.totalorder %s3961_s19, %s3553_s21  ;;  %p3560_p2 = scmp.lt.u32.totalorder %s3558_s23, %s3553_s21 }
  0x96   : > { %p3562_p4 = scmp.lt.u32.totalorder %s3553_s21, %s3961_s19 }
  0x97   : > { %p3556_p12 = pnand %p3555_p9, %p3554_p7  ;;  %p3561_p13 = por %p3560_p2, %p3559_p1 }
  0x99   : > { %p3557_p0 = pneg %p3556_p12  ;;  %p3563_p8 = por %p3562_p4, %p3561_p13 }
  0x9b   : > { %p3564_p6 = pnand %p3563_p8, %p3557_p0 }
  0x9d   : > { %3567 = shalt.err (!%p3564_p6)
}
  0x9e   : > { %s3568_s20 = scalar_lea.vmem %s3963_s25, 256  ;;  %s3705_s28 = smov [#allocation4]  }
  0x9f   : > { %p3569_p3 = scmp.ne.s32.totalorder %s3963_s25, %s3568_s20  ;;  %s3573_s18 = sshll.u32 %s3705_s28, 4  ;;  %s3574_s18 = int_to_ptr.vmem [resolvable:$false] %s3573_s18 }
  0xa0   : > { %s3575_s4 = scalar_lea.vmem %s3574_s18, 512  ;;  %p3576_p12 = scmp.lt.s32.totalorder %s3963_s25, %s3574_s18 }
  0xa1   : > { %p3571_p5 = pnand %p3569_p3, %p3555_p9  ;;  %p3577_p1 = scmp.lt.s32.totalorder %s3575_s4, %s3568_s20 }
  0xa3   : > { %p3572_p7 = pneg %p3571_p5  ;;  %p3578_p2 = por %p3577_p1, %p3576_p12 }
  0xa5   : > { %p3579_p13 = pnand %p3578_p2, %p3572_p7 }
  0xa7   : > { %3582 = shalt.err (!%p3579_p13)
}
  0xa8   : > { %3356 = dma.hbm_to_vmem [thread:$0]  (!%p3965_p11), %s3961_s19, 256, %s3963_s25, %s335_s2, %s4435_s9, %s4435_s9, %s4434_s22  }
  0xa9   : > { %s2925_s21 = sshll.u32 %s3695_s12, 7  ;;  %s359_s28 = scalar_lea.vmem [#allocation7], %s2924_s30 }
  0xaa   : > { %s4006_s24 = scalar_lea.hbm %s4399_s1, %s2925_s21  ;;  %s366_s18 = sshll.u32 %s359_s28, 4  ;;  %s367_s18 = int_to_ptr.vmem [resolvable:$true] %s366_s18 }
  0xab   : > { %s4440_s4 = sand.u32 1, %s3695_s12   ;;  %s3583_s6 = scalar_lea.hbm %s4006_s24, 128 }
  0xac   : > { %s356_s0 = scalar_lea.sflag [#allocation8], %s4440_s4  ;;  %p3584_p0 = scmp.ne.s32.totalorder %s4006_s24, %s3583_s6 }
  0xad   : > { %s3588_s9 = scalar_lea.hbm %s4399_s1, 256  ;;  %p3589_p6 = scmp.lt.u32.totalorder %s4006_s24, %s4399_s1 }
  0xae   : > { %p3586_p4 = pnand %p3584_p0, %p3555_p9  ;;  %p3590_p3 = scmp.lt.u32.totalorder %s3588_s9, %s3583_s6 }
  0xaf   : > { %p3592_p7 = scmp.lt.u32.totalorder %s3583_s6, %s4006_s24 }
  0xb0   : > { %p3587_p8 = pneg %p3586_p4  ;;  %p3591_p5 = por %p3590_p3, %p3589_p6 }
  0xb2   : > { %p3593_p12 = por %p3592_p7, %p3591_p5 }
  0xb4   : > { %p3594_p1 = pnand %p3593_p12, %p3587_p8 }
  0xb6   : > { %3597 = shalt.err (!%p3594_p1)
}
  0xb7   : > { %s3598_s25 = scalar_lea.vmem %s367_s18, 128  ;;  %s3706_s30 = smov [#allocation7]  }
  0xb8   : > { %p3599_p2 = scmp.ne.s32.totalorder %s367_s18, %s3598_s25  ;;  %s3603_s21 = sshll.u32 %s3706_s30, 4  ;;  %s3604_s21 = int_to_ptr.vmem [resolvable:$false] %s3603_s21 }
  0xb9   : > { %s3605_s23 = scalar_lea.vmem %s3604_s21, 256  ;;  %p3606_p4 = scmp.lt.s32.totalorder %s367_s18, %s3604_s21 }
  0xba   : > { %p3601_p13 = pnand %p3599_p2, %p3555_p9  ;;  %p3607_p10 = scmp.lt.s32.totalorder %s3605_s23, %s3598_s25 }
  0xbc   : > { %p3602_p0 = pneg %p3601_p13  ;;  %p3608_p3 = por %p3607_p10, %p3606_p4 }
  0xbe   : > { %p3609_p6 = pnand %p3608_p3, %p3602_p0 }
  0xc0   : > { %3612 = shalt.err (!%p3609_p6)
}
  0xc1   : > { %3359 = dma.hbm_to_vmem [thread:$0]  (!%p3965_p11), %s4006_s24, 128, %s367_s18, %s356_s0  }
  0xc2   : > { %p4441_p8 = scmp.ne.s32.totalorder %s4428_s17, 0 }
  0xc3   : > { %s4034_s6 = sand.u32 (!%p4441_p8), 1, %s3687_s10   ;;  %p4442_p10 = scmp.ne.s32.totalorder (!%p4441_p8), %s4425_s15, 0 }
  0xc4   : > { %375 = sbr.rel (%p4441_p8) target bundleno = 2067 (0x813), region = 56  ;;  %s2927_s20 = sshll.u32 (!%p4441_p8), %s4034_s6, 4 }
  0xc5   : > { %s378_s28 = scalar_lea.sflag (!%p4441_p8), [#allocation5], %s4034_s6  ;;  %s4038_s4 = scalar_lea.vmem (!%p4441_p8), [#allocation4], %s2927_s20 }
  0xcb   : > { %3658 = dma.done.wait (%p4442_p10), %s378_s28, 256  }
  0xcc   : > { %3660 = vsyncadd (%p4442_p10), %s378_s28, 4294967040  ;;  %s386_s0 = sand.u32 1, %s3798_s13   ;;  %s2928_s17 = sshll.u32 %s4034_s6, 3 }
  0xcd   : > { %s387_s26 = scalar_lea.sflag [#allocation8], %s386_s0  ;;  %s4046_s24 = scalar_lea.vmem [#allocation7], %s2928_s17 }
  0xce   : > { %3662 = dma.done.wait (%p4442_p10), %s387_s26, 128  }
  0xcf   : > { %3664 = vsyncadd (%p4442_p10), %s387_s26, 4294967168  ;;  %p4443_p11 = scmp.eq.s32.totalorder %s3798_s13, 0 }
  0xd1   : > { %3666 = dma.done.wait (%p4443_p11), [#allocation8], 1024   ;;  %p4444_p9 = pmov %p4443_p11 }
  0xd3   : > { %3668 = vsyncadd (%p4444_p9), [#allocation8], 4294966272  ;;  %p4445_p5 = pmov %p4444_p9 }
  0xd5   : > { %3670 = dma.done.wait (%p4445_p5), [#allocation11], 9216   ;;  %p4446_p7 = pmov %p4445_p5 }
  0xd6   : > { %p4447_p12 = pmov %p4445_p5 }
  0xd7   : > { %3672 = vsyncadd (%p4446_p7), [#allocation11], 4294958080 }
  0xd8   : > { %3674 = dma.done.wait (%p4447_p12), [#allocation14], 1024   ;;  %p4448_p1 = pmov %p4445_p5 }
  0xd9   : > { %v3707_v0 = vmov 0.0|0.0   ;;  %vm3708_vm0 = vmmov 0   ;;  %v3709_v1 = vmov 0.0   ;;  %v546_v2 = vld [vmem:[#allocation10] sm:$0xff]  ;;  %v547_v3 = vld [vmem:[#allocation10 + $0x8] sm:$0xff]  ;;  %v548_v7 = vld [vmem:[#allocation10 + $0x10] sm:$0xff] }
  0xda   : > { %3676 = vsyncadd (%p4448_p1), [#allocation14], 4294966272  ;;  %3226 = vmatprep.subr.bf16.mxu1 %v3707_v0  ;;  %3108 = vmatprep.mubr.msk.f32.mxu1 %vm3708_vm0, %v3709_v1  ;;  %v449_v4 = vld [vmem:[#allocation9] sm:$0xff]  ;;  %v3227_v5 = vpack.c.bf16 %v547_v3, %v546_v2  ;;  %v450_v6 = vld [vmem:[#allocation9 + $0x8] sm:$0xff]  ;;  %vm464_vm1 = vcmask 523264   ;;  %vm634_vm2 = vcmask 64512  }
  0xdb   : > { %v549_v8 = vld [vmem:[#allocation10 + $0x18] sm:$0xff]  ;;  %v3210_v9 = vpack.c.bf16 %v450_v6, %v449_v4  ;;  %v451_v10 = vld [vmem:[#allocation9 + $0x10] sm:$0xff]  ;;  %v453_v14 = vld [vmem:[#allocation9 + $0x20] sm:$0xff]  ;;  %s3710_s9 = smov 112   ;;  %s3711_s29 = smov 120   ;;  %vm832_vm3 = vcmask 130112  }
  0xdc   : > { %v452_v11 = vld [vmem:[#allocation9 + $0x18] sm:$0xff]  ;;  %3228 = vmatpush3.bf16.msra.mxu1 %v3227_v5  ;;  %v3230_v12 = vpack.c.bf16 %v549_v8, %v548_v7  ;;  %v454_v15 = vld [vmem:[#allocation9 + $0x28] sm:$0xff]  ;;  %v550_v16 = vld [vmem:[#allocation10 + $0x20] sm:$0xff]  ;;  %s3712_s19 = smov 104   ;;  %s3713_s25 = smov 96   ;;  %vm938_vm4 = vcmask 195712  }
  0xdd   : > { %v3214_v13 = vpack.c.bf16 %v452_v11, %v451_v10  ;;  %3211 = vmatprep.subr.bf16.mxu0 %v3210_v9  ;;  %3229 = vmatprep.subr.bf16.mxu1 %v3707_v0  ;;  %v551_v17 = vld [vmem:[#allocation10 + $0x28] sm:$0xff]  ;;  %v446_v18 = vld [vmem:[%s4038_s4] sm:$0xff]  ;;  %v3218_v19 = vpack.c.bf16 %v454_v15, %v453_v14  ;;  %v456_v22 = vld [vmem:[#allocation9 + $0x38] sm:$0xff]  ;;  %s3714_s30 = smov 88   ;;  %s3715_s21 = smov 80   ;;  %vm1044_vm5 = vcmask 261312  }
  0xde   : > { %3213 = vmatpush3.bf16.msra.mxu0 %v3210_v9  ;;  %3089 = vmatprep.mubr.msk.f32.mxu0 %vm464_vm1, %v446_v18  ;;  %v3233_v20 = vpack.c.bf16 %v551_v17, %v550_v16  ;;  %v455_v21 = vld [vmem:[#allocation9 + $0x30] sm:$0xff]  ;;  %v553_v24 = vld [vmem:[#allocation10 + $0x38] sm:$0xff]  ;;  %s3716_s23 = smov 72   ;;  %s3717_s20 = smov 16   ;;  %vm1150_vm6 = vcmask 326912   ;;  %vm1256_vm7 = vcmask 392512  }
  0xdf   : > { %3215 = vmatprep.subr.bf16.mxu0 %v3214_v13  ;;  %v552_v23 = vld [vmem:[#allocation10 + $0x30] sm:$0xff]  ;;  %v3222_v25 = vpack.c.bf16 %v456_v22, %v455_v21  ;;  %v447_v28 = vld [vmem:[%s4038_s4 + $0x8] sm:$0xff]  ;;  %s3718_s28 = smov 8   ;;  %s3719_s4 = smov 24   ;;  %vm1362_vm8 = vcmask 458112   ;;  %vm1468_vm9 = vcmask 523712  }
  0xe0   : > { %3231 = vmatpush3.bf16.msra.mxu1 %v3230_v12  ;;  %v3236_v26 = vpack.c.bf16 %v553_v24, %v552_v23  ;;  %v448_v27 = vld [vmem:[%s4046_s24] sm:$0xff]  ;;  %s3720_s0 = smov 32   ;;  %s3721_s17 = smov 40  }
  0xe1   : > { %3232 = vmatprep.subr.bf16.mxu1 %v3707_v0  ;;  %v2937_v29 = vld [vmem:[%s4403_s5] ss:$0 sm:$0xff]  ;;  %s3722_s26 = smov 48   ;;  %s3723_s24 = smov 56  }
  0xe2   : > { %3217 = vmatpush3.bf16.msra.mxu0 %v3214_v13  ;;  %v2934_v31 = vld [vmem:[%s4401_s3] ss:$0 sm:$0xff]  ;;  %s3724_s15 = smov 64   ;;  %s2933_s22 = sshll.u32 %s4034_s6, 7 }
  0xe3   : > { %3219 = vmatprep.subr.bf16.mxu0 %v3218_v19  ;;  %p4450_p13 = scmp.ne.s32.totalorder %s4437_s16, 0 }
  0xe4   : > { %3234 = vmatpush3.bf16.msra.mxu1 %v3233_v20 }
  0xe5   : > { %3235 = vmatprep.subr.bf16.mxu1 %v3707_v0 }
  0xe6   : > { %3221 = vmatpush3.bf16.msra.mxu0 %v3218_v19 }
  0xe7   : > { %3223 = vmatprep.subr.bf16.mxu0 %v3222_v25 }
  0xe8   : > { %3237 = vmatpush3.bf16.msra.mxu1 %v3236_v26 }
  0xea   : > { %3225 = vmatpush3.bf16.msra.mxu0 %v3222_v25 }
  0xeb   : > { %3109 = vmatmul.mubr.msk.f32.vlgmr.msra.gmra.mrb[0].mxu1 %vm464_vm1, %v448_v27 }
  0xed   : > { %3090 = vmatmul.mubr.msk.f32.vlgmr.msra.gmra.mrb[0].mxu0 %vm464_vm1, %v447_v28 }
 0x1be   : > { %v630_v30 = vpop.f32.mrb[0].mxu1 }
 0x1bf   : > { %v4077_v32 = vadd.f32 %v2937_v29, %v630_v30  ;;  %v3110_v33 = vpop.f32.mrb[1].mxu1 }
 0x1c0   : > { %v3091_v34 = vpop.f32.mrb[0].mxu0 }
 0x1c1   : > { %839 = vrot.lane.b32.xlu1 %v4077_v32, %s3710_s9  ;;  %733 = vrot.lane.b32.xlu0 %v4077_v32, %s3711_s29  ;;  %v543_v35 = vadd.f32 %v3091_v34, %v2934_v31  ;;  %v537_v36 = vpop.f32.mrb[1].mxu0 }
 0x1c2   : > { %3111 = vmatprep.subr.msk.mxu0 %vm634_vm2, %v4077_v32  ;;  %v538_v37 = vadd.f32 %v2934_v31, %v537_v36 }
 0x1c3   : > { %3112 = vmatpush3.xpose.msk.msra.mxu0 %vm634_vm2, %v4077_v32 }
 0x1c4   : > { %3113 = vmatprep.mubr.msk.f32.mxu0 %vm634_vm2, %v538_v37 }
 0x1c5   : > { %945 = vrot.lane.b32.xlu0 %v4077_v32, %s3712_s19  ;;  %731 = vrot.lane.b32.xlu1 %v543_v35, %s3711_s29 }
 0x1c6   : > { %3114 = vmatmul.mubr.msk.f32.vlgmr.msra.gmra.mrb[2].mxu0 %vm634_vm2, %v543_v35 }
 0x1c9   : > { %1051 = vrot.lane.b32.xlu0 %v4077_v32, %s3713_s25  ;;  %943 = vrot.lane.b32.xlu1 %v543_v35, %s3712_s19 }
 0x1cd   : > { %1157 = vrot.lane.b32.xlu0 %v4077_v32, %s3714_s30  ;;  %1155 = vrot.lane.b32.xlu1 %v543_v35, %s3714_s30 }
 0x1d1   : > { %837 = vrot.lane.b32.xlu0 %v543_v35, %s3710_s9  ;;  %835 = vrot.lane.b32.xlu1 %v538_v37, %s3710_s9 }
 0x1d5   : > { %1049 = vrot.lane.b32.xlu0 %v543_v35, %s3713_s25  ;;  %941 = vrot.lane.b32.xlu1 %v538_v37, %s3712_s19 }
 0x1d9   : > { %1047 = vrot.lane.b32.xlu1 %v538_v37, %s3713_s25  ;;  %729 = vrot.lane.b32.xlu0 %v538_v37, %s3711_s29 }
 0x1dd   : > { %1153 = vrot.lane.b32.xlu1 %v538_v37, %s3714_s30  ;;  %1263 = vrot.lane.b32.xlu0 %v4077_v32, %s3715_s21 }
 0x1e1   : > { %1259 = vrot.lane.b32.xlu1 %v538_v37, %s3715_s21  ;;  %1369 = vrot.lane.b32.xlu0 %v4077_v32, %s3716_s23 }
 0x1e5   : > { %1365 = vrot.lane.b32.xlu1 %v538_v37, %s3716_s23  ;;  %1261 = vrot.lane.b32.xlu0 %v543_v35, %s3715_s21 }
 0x1e9   : > { %1367 = vrot.lane.b32.xlu0 %v543_v35, %s3716_s23 }
 0x233   : > { %v840_v38 = vpop.permute.xlu1 %839  ;;  %v734_v39 = vpop.permute.xlu0 %733 }
 0x234   : > { %3116 = vmatprep.subr.msk.mxu1 %vm634_vm2, %v734_v39  ;;  %3121 = vmatprep.subr.msk.mxu0 %vm634_vm2, %v840_v38 }
 0x235   : > { %3117 = vmatpush3.xpose.msk.msra.mxu1 %vm634_vm2, %v734_v39  ;;  %3122 = vmatpush3.xpose.msk.msra.mxu0 %vm634_vm2, %v840_v38 }
 0x237   : > { %v946_v40 = vpop.permute.xlu0 %945  ;;  %v732_v41 = vpop.permute.xlu1 %731 }
 0x238   : > { %3126 = vmatprep.subr.msk.mxu1 %vm634_vm2, %v946_v40 }
 0x23b   : > { %v1052_v42 = vpop.permute.xlu0 %1051  ;;  %v944_v43 = vpop.permute.xlu1 %943 }
 0x23c   : > { %3131 = vmatprep.subr.msk.mxu0 %vm634_vm2, %v1052_v42 }
 0x23f   : > { %v1158_v44 = vpop.permute.xlu0 %1157  ;;  %v1156_v45 = vpop.permute.xlu1 %1155 }
 0x243   : > { %v838_v46 = vpop.permute.xlu0 %837  ;;  %v836_v47 = vpop.permute.xlu1 %835 }
 0x244   : > { %3123 = vmatprep.mubr.msk.f32.mxu0 %vm634_vm2, %v836_v47 }
 0x245   : > { %3124 = vmatmul.mubr.msk.f32.vlgmr.msra.gmra.mrb[4].mxu0 %vm634_vm2, %v838_v46 }
 0x246   : > { %3132 = vmatpush3.xpose.msk.msra.mxu0 %vm634_vm2, %v1052_v42 }
 0x247   : > { %v1050_v48 = vpop.permute.xlu0 %1049  ;;  %v942_v49 = vpop.permute.xlu1 %941 }
 0x24b   : > { %v1048_v50 = vpop.permute.xlu1 %1047  ;;  %v730_v51 = vpop.permute.xlu0 %729 }
 0x24c   : > { %3118 = vmatprep.mubr.msk.f32.mxu1 %vm634_vm2, %v730_v51  ;;  %3133 = vmatprep.mubr.msk.f32.mxu0 %vm634_vm2, %v1048_v50  ;;  %v1479_v50 = vld [vmem:[#allocation13 + $0x10] sm:$0xff]  ;;  %v1480_v51 = vld [vmem:[#allocation13 + $0x18] sm:$0xff] }
 0x24d   : > { %3119 = vmatmul.mubr.msk.f32.vlgmr.msra.gmra.mrb[2].mxu1 %vm634_vm2, %v732_v41  ;;  %3134 = vmatmul.mubr.msk.f32.vlgmr.msra.gmra.mrb[6].mxu0 %vm634_vm2, %v1050_v48 }
 0x24e   : > { %3127 = vmatpush3.xpose.msk.msra.mxu1 %vm634_vm2, %v946_v40  ;;  %3128 = vmatprep.mubr.msk.f32.mxu1 %vm634_vm2, %v942_v49 }
 0x24f   : > { %3136 = vmatprep.subr.msk.mxu1 %vm634_vm2, %v1158_v44  ;;  %v1154_v52 = vpop.permute.xlu1 %1153  ;;  %v1264_v53 = vpop.permute.xlu0 %1263 }
 0x250   : > { %3141 = vmatprep.subr.msk.mxu0 %vm634_vm2, %v1264_v53 }
 0x251   : > { %3129 = vmatmul.mubr.msk.f32.vlgmr.msra.gmra.mrb[4].mxu1 %vm634_vm2, %v944_v43  ;;  %3142 = vmatpush3.xpose.msk.msra.mxu0 %vm634_vm2, %v1264_v53  ;;  %v1477_v43 = vld [vmem:[#allocation13] sm:$0xff] }
 0x252   : > { %3137 = vmatpush3.xpose.msk.msra.mxu1 %vm634_vm2, %v1158_v44  ;;  %3138 = vmatprep.mubr.msk.f32.mxu1 %vm634_vm2, %v1154_v52  ;;  %v1478_v44 = vld [vmem:[#allocation13 + $0x8] sm:$0xff]  ;;  %v3242_v52 = vpack.c.bf16 %v1480_v51, %v1479_v50 }
 0x253   : > { %v1260_v54 = vpop.permute.xlu1 %1259  ;;  %v1370_v55 = vpop.permute.xlu0 %1369 }
 0x254   : > { %3143 = vmatprep.mubr.msk.f32.mxu0 %vm634_vm2, %v1260_v54  ;;  %3146 = vmatprep.subr.msk.mxu1 %vm634_vm2, %v1370_v55 }
 0x255   : > { %3139 = vmatmul.mubr.msk.f32.vlgmr.msra.gmra.mrb[6].mxu1 %vm634_vm2, %v1156_v45  ;;  %v3238_v45 = vpack.c.bf16 %v1478_v44, %v1477_v43 }
 0x256   : > { %3147 = vmatpush3.xpose.msk.msra.mxu1 %vm634_vm2, %v1370_v55 }
 0x257   : > { %v1366_v56 = vpop.permute.xlu1 %1365  ;;  %v1262_v57 = vpop.permute.xlu0 %1261  ;;  %3239 = vmatprep.subr.bf16.mxu0 %v3238_v45 }
 0x258   : > { %3144 = vmatmul.mubr.msk.f32.vlgmr.msra.gmra.mrb[8].mxu0 %vm634_vm2, %v1262_v57  ;;  %3148 = vmatprep.mubr.msk.f32.mxu1 %vm634_vm2, %v1366_v56  ;;  %v1481_v57 = vld [vmem:[#allocation13 + $0x20] sm:$0xff] }
 0x259   : > { %3241 = vmatpush3.bf16.msra.mxu0 %v3238_v45 }
 0x25a   : > { %3243 = vmatprep.subr.bf16.mxu0 %v3242_v52 }
 0x25b   : > { %v1368_v58 = vpop.permute.xlu0 %1367 }
 0x25c   : > { %3149 = vmatmul.mubr.msk.f32.vlgmr.msra.gmra.mrb[8].mxu1 %vm634_vm2, %v1368_v58  ;;  %v1482_v58 = vld [vmem:[#allocation13 + $0x28] sm:$0xff] }
 0x25d   : > { %3245 = vmatpush3.bf16.msra.mxu0 %v3242_v52 }
 0x299   : > { %v4141_v59 = vpop.f32.mrb[2].mxu0 }
 0x29a   : > { %v4143_v60 = vpop.f32.mrb[3].mxu0  ;;  %v722_v26 = vsel %vm634_vm2, %v4141_v59, -inf }
 0x29b   : > { %v719_v27 = vsel %vm634_vm2, %v4143_v60, -inf }
 0x318   : > { %v3125_v61 = vpop.f32.mrb[4].mxu0 }
 0x319   : > { %v913_v62 = vpop.f32.mrb[5].mxu0  ;;  %v925_v63 = vsel %vm634_vm2, %v3125_v61, -inf }
 0x31a   : > { %926 = vmax.xlane.f32.xlu1 %v925_v63  ;;  %v922_v9 = vsel %vm634_vm2, %v913_v62, -inf }
 0x320   : > { %v3120_v0 = vpop.f32.mrb[2].mxu1  ;;  %v4146_v2 = vpop.f32.mrb[6].mxu0 }
 0x321   : > { %v807_v3 = vpop.f32.mrb[3].mxu1  ;;  %v4148_v4 = vpop.f32.mrb[7].mxu0  ;;  %v819_v5 = vsel %vm634_vm2, %v3120_v0, -inf  ;;  %v1137_v14 = vsel %vm634_vm2, %v4146_v2, -inf }
 0x322   : > { %820 = vmax.xlane.f32.xlu0 %v819_v5  ;;  %v816_v6 = vsel %vm634_vm2, %v807_v3, -inf  ;;  %v1134_v17 = vsel %vm634_vm2, %v4148_v4, -inf }
 0x323   : > { %817 = vmax.xlane.f32.xlu1 %v816_v6 }
 0x324   : > { %v3130_v7 = vpop.f32.mrb[4].mxu1 }
 0x325   : > { %v1019_v8 = vpop.f32.mrb[5].mxu1  ;;  %v1031_v10 = vsel %vm634_vm2, %v3130_v7, -inf }
 0x326   : > { %923 = vmax.xlane.f32.xlu0 %v922_v9  ;;  %v1028_v13 = vsel %vm634_vm2, %v1019_v8, -inf }
 0x327   : > { %1032 = vmax.xlane.f32.xlu1 %v1031_v10 }
 0x328   : > { %v4154_v11 = vpop.f32.mrb[6].mxu1 }
 0x329   : > { %v4156_v12 = vpop.f32.mrb[7].mxu1  ;;  %v1243_v18 = vsel %vm634_vm2, %v4154_v11, -inf }
 0x32a   : > { %1029 = vmax.xlane.f32.xlu0 %v1028_v13  ;;  %v1240_v21 = vsel %vm634_vm2, %v4156_v12, -inf }
 0x32b   : > { %1138 = vmax.xlane.f32.xlu1 %v1137_v14  ;;  %v4161_v15 = vpop.f32.mrb[8].mxu0 }
 0x32c   : > { %v4163_v16 = vpop.f32.mrb[9].mxu0  ;;  %v1349_v22 = vsel %vm634_vm2, %v4161_v15, -inf }
 0x32d   : > { %v1346_v23 = vsel %vm634_vm2, %v4163_v16, -inf }
 0x32e   : > { %1135 = vmax.xlane.f32.xlu0 %v1134_v17 }
 0x32f   : > { %v4169_v19 = vpop.f32.mrb[8].mxu1  ;;  %1244 = vmax.xlane.f32.xlu1 %v1243_v18 }
 0x330   : > { %v4171_v20 = vpop.f32.mrb[9].mxu1  ;;  %v1455_v24 = vsel %vm634_vm2, %v4169_v19, -inf }
 0x331   : > { %v1452_v25 = vsel %vm634_vm2, %v4171_v20, -inf }
 0x332   : > { %1241 = vmax.xlane.f32.xlu0 %v1240_v21 }
 0x333   : > { %1350 = vmax.xlane.f32.xlu1 %v1349_v22 }
 0x336   : > { %1347 = vmax.xlane.f32.xlu0 %v1346_v23 }
 0x337   : > { %1456 = vmax.xlane.f32.xlu1 %v1455_v24 }
 0x33a   : > { %1453 = vmax.xlane.f32.xlu0 %v1452_v25 }
 0x33b   : > { %723 = vmax.xlane.f32.xlu1 %v722_v26 }
 0x33e   : > { %720 = vmax.xlane.f32.xlu0 %v719_v27 }
 0x3a7   : > { %v927_v28 = vpop.xlane.xlu1 %926 }
 0x3a8   : > { %v929_v29 = vsub.f32 %v3125_v61, %v927_v28  ;;  %v3246_v61 = vpack.c.bf16 %v1482_v58, %v1481_v57 }
 0x3aa   : > { %934 = vrot.lane.b32.xlu0 %v929_v29, %s3717_s20  ;;  %3247 = vmatprep.subr.bf16.mxu0 %v3246_v61 }
 0x3ab   : > { %3249 = vmatpush3.bf16.msra.mxu0 %v3246_v61 }
 0x3af   : > { %v821_v30 = vpop.xlane.xlu0 %820 }
 0x3b0   : > { %v823_v31 = vsub.f32 %v3120_v0, %v821_v30  ;;  %v818_v33 = vpop.xlane.xlu1 %817 }
 0x3b1   : > { %v822_v34 = vsub.f32 %v807_v3, %v818_v33  ;;  %v1483_v3 = vld [vmem:[#allocation13 + $0x30] sm:$0xff] }
 0x3b2   : > { %828 = vrot.lane.b32.xlu1 %v823_v31, %s3718_s28 }
 0x3b3   : > { %v924_v35 = vpop.xlane.xlu0 %923  ;;  %826 = vrot.lane.b32.xlu0 %v822_v34, %s3718_s28 }
 0x3b4   : > { %v928_v36 = vsub.f32 %v913_v62, %v924_v35  ;;  %v1033_v37 = vpop.xlane.xlu1 %1032 }
 0x3b5   : > { %v1035_v38 = vsub.f32 %v3130_v7, %v1033_v37 }
 0x3b6   : > { %932 = vrot.lane.b32.xlu1 %v928_v36, %s3717_s20 }
 0x3b7   : > { %v1030_v39 = vpop.xlane.xlu0 %1029  ;;  %1040 = vrot.lane.b32.xlu0 %v1035_v38, %s3719_s4 }
 0x3b8   : > { %v1034_v40 = vsub.f32 %v1019_v8, %v1030_v39  ;;  %v1139_v41 = vpop.xlane.xlu1 %1138 }
 0x3b9   : > { %v1141_v42 = vsub.f32 %v4146_v2, %v1139_v41 }
 0x3ba   : > { %1038 = vrot.lane.b32.xlu1 %v1034_v40, %s3719_s4 }
 0x3bb   : > { %v1136_v46 = vpop.xlane.xlu0 %1135  ;;  %1146 = vrot.lane.b32.xlu0 %v1141_v42, %s3720_s0 }
 0x3bc   : > { %v1140_v47 = vsub.f32 %v4148_v4, %v1136_v46  ;;  %v1245_v48 = vpop.xlane.xlu1 %1244  ;;  %v1484_v4 = vld [vmem:[#allocation13 + $0x38] sm:$0xff] }
 0x3bd   : > { %v1247_v49 = vsub.f32 %v4154_v11, %v1245_v48  ;;  %v3250_v5 = vpack.c.bf16 %v1484_v4, %v1483_v3  ;;  %v2333_v3 = vld [vmem:[#allocation12 + $0x18] sm:$0xff] }
 0x3be   : > { %1144 = vrot.lane.b32.xlu1 %v1140_v47, %s3720_s0 }
 0x3bf   : > { %v1242_v53 = vpop.xlane.xlu0 %1241  ;;  %1252 = vrot.lane.b32.xlu0 %v1247_v49, %s3721_s17  ;;  %3251 = vmatprep.subr.bf16.mxu0 %v3250_v5 }
 0x3c0   : > { %v1246_v54 = vsub.f32 %v4156_v12, %v1242_v53  ;;  %v1351_v55 = vpop.xlane.xlu1 %1350  ;;  %3253 = vmatpush3.bf16.msra.mxu0 %v3250_v5  ;;  %v2341_v5 = vld [vmem:[#allocation12 + $0x58] sm:$0xff] }
 0x3c1   : > { %v1353_v56 = vsub.f32 %v4161_v15, %v1351_v55 }
 0x3c2   : > { %1250 = vrot.lane.b32.xlu1 %v1246_v54, %s3721_s17 }
 0x3c3   : > { %v1348_v62 = vpop.xlane.xlu0 %1347  ;;  %1358 = vrot.lane.b32.xlu0 %v1353_v56, %s3722_s26 }
 0x3c4   : > { %v1352_v63 = vsub.f32 %v4163_v16, %v1348_v62  ;;  %v1457_v0 = vpop.xlane.xlu1 %1456 }
 0x3c5   : > { %v1459_v2 = vsub.f32 %v4169_v19, %v1457_v0  ;;  %v2331_v0 = vld [vmem:[#allocation12 + $0x8] sm:$0xff] }
 0x3c6   : > { %1356 = vrot.lane.b32.xlu1 %v1352_v63, %s3722_s26 }
 0x3c7   : > { %v1454_v6 = vpop.xlane.xlu0 %1453  ;;  %1464 = vrot.lane.b32.xlu0 %v1459_v2, %s3723_s24  ;;  %v2339_v2 = vld [vmem:[#allocation12 + $0x48] sm:$0xff] }
 0x3c8   : > { %v1458_v7 = vsub.f32 %v4171_v20, %v1454_v6  ;;  %v724_v8 = vpop.xlane.xlu1 %723  ;;  %v3254_v4 = vpack.c.bf16 %v2339_v2, %v2331_v0  ;;  %v2330_v6 = vld [vmem:[#allocation12] sm:$0xff] }
 0x3c9   : > { %v726_v9 = vsub.f32 %v4141_v59, %v724_v8  ;;  %v3270_v8 = vpack.c.bf16 %v2341_v5, %v2333_v3 }
 0x3ca   : > { %1462 = vrot.lane.b32.xlu1 %v1458_v7, %s3723_s24  ;;  %v2338_v7 = vld [vmem:[#allocation12 + $0x40] sm:$0xff] }
 0x3cb   : > { %728 = vst.msk [vmem:[#allocation2 + $0x8] sm:$0xff] %vm634_vm2, %v726_v9  ;;  %1660 = vrot.lane.b32.xlu0 %v4077_v32, %s3723_s24  ;;  %v721_v10 = vpop.xlane.xlu0 %720  ;;  %v3256_v9 = vpack.c.bf16 %v2338_v7, %v2330_v6 }
 0x3cc   : > { %v725_v11 = vsub.f32 %v4143_v60, %v721_v10  ;;  %v2332_v10 = vld [vmem:[#allocation12 + $0x10] sm:$0xff] }
 0x3ce   : > { %727 = vst.msk [vmem:[#allocation2] sm:$0xff] %vm634_vm2, %v725_v11  ;;  %1570 = vrot.lane.b32.xlu1 %v4077_v32, %s3724_s15  ;;  %v2340_v11 = vld [vmem:[#allocation12 + $0x50] sm:$0xff] }
 0x3cf   : > { %1852 = vrot.lane.b32.xlu0 %v4077_v32, %s3721_s17 }
 0x3d2   : > { %1756 = vrot.lane.b32.xlu1 %v4077_v32, %s3722_s26 }
 0x3d6   : > { %1948 = vrot.lane.b32.xlu1 %v4077_v32, %s3720_s0 }
 0x3da   : > { %2044 = vrot.lane.b32.xlu1 %v4077_v32, %s3719_s4 }
 0x3de   : > { %2140 = vrot.lane.b32.xlu1 %v4077_v32, %s3717_s20 }
 0x41c   : > { %v935_v59 = vpop.permute.xlu0 %934 }
 0x424   : > { %v829_v60 = vpop.permute.xlu1 %828 }
 0x425   : > { %834 = vst.msk [vmem:[#allocation2 + $0x8] sm:$0xff] %vm832_vm3, %v829_v60  ;;  %v827_v12 = vpop.permute.xlu0 %826 }
 0x426   : > { %833 = vst.msk [vmem:[#allocation2] sm:$0xff] %vm832_vm3, %v827_v12  ;;  %v2347_v12 = vld [vmem:[#allocation12 + $0x88] sm:$0xff] }
 0x427   : > { %940 = vst.msk [vmem:[#allocation2 + $0x8] sm:$0xff] %vm938_vm4, %v935_v59  ;;  %v3272_v59 = vpack.c.bf16 %v2340_v11, %v2332_v10 }
 0x428   : > { %v933_v13 = vpop.permute.xlu1 %932 }
 0x429   : > { %939 = vst.msk [vmem:[#allocation2] sm:$0xff] %vm938_vm4, %v933_v13  ;;  %v1041_v14 = vpop.permute.xlu0 %1040  ;;  %v2355_v13 = vld [vmem:[#allocation12 + $0xc8] sm:$0xff] }
 0x42a   : > { %1046 = vst.msk [vmem:[#allocation2 + $0x8] sm:$0xff] %vm1044_vm5, %v1041_v14  ;;  %v2349_v14 = vld [vmem:[#allocation12 + $0x98] sm:$0xff] }
 0x42c   : > { %v1039_v15 = vpop.permute.xlu1 %1038 }
 0x42d   : > { %1045 = vst.msk [vmem:[#allocation2] sm:$0xff] %vm1044_vm5, %v1039_v15  ;;  %v1147_v16 = vpop.permute.xlu0 %1146 }
 0x42e   : > { %1152 = vst.msk [vmem:[#allocation2 + $0x8] sm:$0xff] %vm1150_vm6, %v1147_v16  ;;  %v3258_v16 = vpack.c.bf16 %v2355_v13, %v2347_v12  ;;  %v2342_v12 = vld [vmem:[#allocation12 + $0x60] sm:$0xff] }
 0x430   : > { %v1145_v17 = vpop.permute.xlu1 %1144 }
 0x431   : > { %1151 = vst.msk [vmem:[#allocation2] sm:$0xff] %vm1150_vm6, %v1145_v17  ;;  %v1253_v18 = vpop.permute.xlu0 %1252  ;;  %v2357_v17 = vld [vmem:[#allocation12 + $0xd8] sm:$0xff] }
 0x432   : > { %1258 = vst.msk [vmem:[#allocation2 + $0x8] sm:$0xff] %vm1256_vm7, %v1253_v18  ;;  %v2346_v18 = vld [vmem:[#allocation12 + $0x80] sm:$0xff] }
 0x434   : > { %v1251_v19 = vpop.permute.xlu1 %1250 }
 0x435   : > { %1257 = vst.msk [vmem:[#allocation2] sm:$0xff] %vm1256_vm7, %v1251_v19  ;;  %v1359_v20 = vpop.permute.xlu0 %1358  ;;  %v2354_v19 = vld [vmem:[#allocation12 + $0xc0] sm:$0xff] }
 0x436   : > { %1364 = vst.msk [vmem:[#allocation2 + $0x8] sm:$0xff] %vm1362_vm8, %v1359_v20  ;;  %v3274_v20 = vpack.c.bf16 %v2357_v17, %v2349_v14  ;;  %v2336_v14 = vld [vmem:[#allocation12 + $0x30] sm:$0xff]  ;;  %v2359_v17 = vld [vmem:[#allocation12 + $0xe8] sm:$0xff] }
 0x438   : > { %v1357_v21 = vpop.permute.xlu1 %1356 }
 0x439   : > { %1363 = vst.msk [vmem:[#allocation2] sm:$0xff] %vm1362_vm8, %v1357_v21  ;;  %v1465_v22 = vpop.permute.xlu0 %1464  ;;  %v3260_v21 = vpack.c.bf16 %v2354_v19, %v2346_v18  ;;  %v2353_v18 = vld [vmem:[#allocation12 + $0xb8] sm:$0xff] }
 0x43a   : > { %1470 = vst.msk [vmem:[#allocation2 + $0x8] sm:$0xff] %vm1468_vm9, %v1465_v22  ;;  %v2348_v22 = vld [vmem:[#allocation12 + $0x90] sm:$0xff]  ;;  %v2361_v19 = vld [vmem:[#allocation12 + $0xf8] sm:$0xff] }
 0x43c   : > { %v1463_v23 = vpop.permute.xlu1 %1462 }
 0x43d   : > { %1469 = vst.msk [vmem:[#allocation2] sm:$0xff] %vm1468_vm9, %v1463_v23  ;;  %v1661_v26 = vpop.permute.xlu0 %1660  ;;  %v2356_v23 = vld [vmem:[#allocation12 + $0xd0] sm:$0xff] }
 0x440   : > { %v1571_v24 = vpop.permute.xlu1 %1570 }
 0x441   : > { %v1472_v25 = vld [vmem:[#allocation2 + $0x8] sm:$0xff]  ;;  %3170 = vmatprep.subr.mxu1 %v1571_v24  ;;  %v1853_v43 = vpop.permute.xlu0 %1852 }
 0x442   : > { %3171 = vmatpush3.msra.mxu1 %v1571_v24  ;;  %v1475_v27 = vmul.f32 1.442695, %v1472_v25  ;;  %v3276_v24 = vpack.c.bf16 %v2356_v23, %v2348_v22  ;;  %v2350_v23 = vld [vmem:[#allocation12 + $0xa0] sm:$0xff] }
 0x443   : > { %3175 = vmatprep.subr.mxu1 %v1661_v26 }
 0x444   : > { %v1471_v28 = vld [vmem:[#allocation2] sm:$0xff]  ;;  %v1757_v29 = vpop.permute.xlu1 %1756 }
 0x445   : > { %v1473_v30 = vmul.f32 1.442695, %v1471_v28  ;;  %v2365_v28 = vld [vmem:[#allocation12 + $0x118] sm:$0xff] }
 0x447   : > { %3433 = vpow2.f32 %v1473_v30 }
 0x448   : > { %3435 = vpow2.f32 %v1475_v27  ;;  %v1949_v31 = vpop.permute.xlu1 %1948  ;;  %v2371_v27 = vld [vmem:[#allocation12 + $0x148] sm:$0xff] }
 0x449   : > { %3190 = vmatprep.subr.mxu0 %v1949_v31 }
 0x44c   : > { %v2045_v33 = vpop.permute.xlu1 %2044 }
 0x450   : > { %v2141_v36 = vpop.permute.xlu1 %2140 }
 0x451   : > { %v3434_v34 = vpop.eup %3433 }
 0x452   : > { %v3436_v35 = vpop.eup %3435  ;;  %3167 = vmatprep.mubr.msk.f32.mxu0 %vm464_vm1, %v3434_v34 }
 0x453   : > { %3168 = vmatmul.mubr.msk.f32.vlgmr.msra.gmra.mrb[10].mxu0 %vm464_vm1, %v3436_v35 }
 0x454   : > { %3191 = vmatpush3.msra.mxu0 %v1949_v31  ;;  %v2373_v31 = vld [vmem:[#allocation12 + $0x158] sm:$0xff] }
 0x455   : > { %3200 = vmatprep.subr.mxu0 %v2141_v36 }
 0x526   : > { %v3169_v37 = vpop.f32.mrb[10].mxu0 }
 0x527   : > { %3437 = vrcp.f32 %v3169_v37  ;;  %v1557_v38 = vpop.f32.mrb[11].mxu0  ;;  %v2364_v37 = vld [vmem:[#allocation12 + $0x110] sm:$0xff] }
 0x528   : > { %3439 = vrcp.f32 %v1557_v38  ;;  %v2372_v38 = vld [vmem:[#allocation12 + $0x150] sm:$0xff] }
 0x531   : > { %v3438_v39 = vpop.eup %3437 }
 0x532   : > { %v3440_v40 = vpop.eup %3439  ;;  %v1569_v41 = vmul.f32 %v3438_v39, %v3436_v35  ;;  %v3278_v35 = vpack.c.bf16 %v2373_v31, %v2365_v28  ;;  %v3280_v39 = vpack.c.bf16 %v2372_v38, %v2364_v37  ;;  %v3306_v28 = vpack.c.bf16 %v2361_v19, %v2353_v18  ;;  %v2375_v31 = vld [vmem:[#allocation12 + $0x168] sm:$0xff] }
 0x533   : > { %v1567_v42 = vmul.f32 %v3440_v40, %v3434_v34  ;;  %v2370_v34 = vld [vmem:[#allocation12 + $0x140] sm:$0xff] }
 0x534   : > { %1754 = vrot.lane.b32.xlu1 %v1569_v41, %s3710_s9  ;;  %1658 = vrot.lane.b32.xlu0 %v1569_v41, %s3711_s29 }
 0x535   : > { %3172 = vmatprep.mubr.msk.f32.mxu1 %vm634_vm2, %v1567_v42 }
 0x536   : > { %3173 = vmatmul.mubr.msk.f32.vlgmr.msra.gmra.mrb[10].mxu1 %vm634_vm2, %v1569_v41 }
 0x537   : > { %3176 = vmatpush3.msra.mxu1 %v1661_v26  ;;  %v2363_v26 = vld [vmem:[#allocation12 + $0x108] sm:$0xff] }
 0x538   : > { %3180 = vmatprep.subr.mxu1 %v1757_v29  ;;  %1850 = vrot.lane.b32.xlu0 %v1569_v41, %s3712_s19  ;;  %v3262_v30 = vpack.c.bf16 %v2371_v27, %v2363_v26 }
 0x539   : > { %1656 = vrot.lane.b32.xlu1 %v1567_v42, %s3711_s29  ;;  %s2995_s29 = sshll.u32 %s3798_s13, 11  ;;  %s4449_s13 = sld [smem:[#allocation28_spill]] }
 0x53c   : > { %1946 = vrot.lane.b32.xlu0 %v1569_v41, %s3713_s25 }
 0x53d   : > { %2236 = vrot.lane.b32.xlu1 %v4077_v32, %s3718_s28 }
 0x540   : > { %2042 = vrot.lane.b32.xlu0 %v1569_v41, %s3714_s30 }
 0x541   : > { %1848 = vrot.lane.b32.xlu1 %v1567_v42, %s3712_s19 }
 0x544   : > { %1752 = vrot.lane.b32.xlu0 %v1567_v42, %s3710_s9  ;;  %s4328_s9 = scalar_lea.vmem [#allocation15], %s2933_s22 }
 0x545   : > { %2040 = vrot.lane.b32.xlu1 %v1567_v42, %s3714_s30  ;;  %s2780_s19 = sshll.u32 %s4328_s9, 4  ;;  %s4349_s19 = int_to_ptr.vmem [resolvable:$true] %s2780_s19 }
 0x548   : > { %2138 = vrot.lane.b32.xlu0 %v1569_v41, %s3715_s21 }
 0x549   : > { %2232 = vrot.lane.b32.xlu1 %v1567_v42, %s3716_s23 }
 0x54c   : > { %1944 = vrot.lane.b32.xlu0 %v1567_v42, %s3713_s25 }
 0x550   : > { %2136 = vrot.lane.b32.xlu0 %v1567_v42, %s3715_s21  ;;  %v2379_v42 = vld [vmem:[#allocation12 + $0x188] sm:$0xff]  ;;  %s4347_s21 = scalar_lea.hbm %s4449_s13, %s2995_s29 }
 0x554   : > { %2234 = vrot.lane.b32.xlu0 %v1569_v41, %s3716_s23  ;;  %s2767_s23 = scalar_lea.sflag [#allocation6], %s4034_s6 }
 0x5a6   : > { %v1755_v32 = vpop.permute.xlu1 %1754  ;;  %v1659_v44 = vpop.permute.xlu0 %1658 }
 0x5aa   : > { %v1851_v45 = vpop.permute.xlu0 %1850 }
 0x5ab   : > { %v1657_v46 = vpop.permute.xlu1 %1656 }
 0x5ac   : > { %3177 = vmatprep.mubr.msk.f32.mxu1 %vm634_vm2, %v1657_v46 }
 0x5ad   : > { %3178 = vmatmul.mubr.msk.f32.vlgmr.msra.gmra.mrb[12].mxu1 %vm634_vm2, %v1659_v44 }
 0x5ae   : > { %3181 = vmatpush3.msra.mxu1 %v1757_v29  ;;  %v1947_v47 = vpop.permute.xlu0 %1946 }
 0x5af   : > { %3185 = vmatprep.subr.mxu1 %v1853_v43  ;;  %v2237_v48 = vpop.permute.xlu1 %2236 }
 0x5b2   : > { %v2043_v49 = vpop.permute.xlu0 %2042 }
 0x5b3   : > { %v1849_v50 = vpop.permute.xlu1 %1848 }
 0x5b6   : > { %v1753_v51 = vpop.permute.xlu0 %1752 }
 0x5b7   : > { %3182 = vmatprep.mubr.msk.f32.mxu1 %vm634_vm2, %v1753_v51  ;;  %v2041_v53 = vpop.permute.xlu1 %2040 }
 0x5b8   : > { %3183 = vmatmul.mubr.msk.f32.vlgmr.msra.gmra.mrb[14].mxu1 %vm634_vm2, %v1755_v32  ;;  %v2381_v32 = vld [vmem:[#allocation12 + $0x198] sm:$0xff] }
 0x5b9   : > { %3186 = vmatpush3.msra.mxu1 %v1853_v43  ;;  %3187 = vmatprep.mubr.msk.f32.mxu1 %vm634_vm2, %v1849_v50  ;;  %v2387_v43 = vld [vmem:[#allocation12 + $0x1c8] sm:$0xff] }
 0x5ba   : > { %3195 = vmatprep.subr.mxu1 %v2045_v33  ;;  %v2139_v52 = vpop.permute.xlu0 %2138  ;;  %v3266_v46 = vpack.c.bf16 %v2387_v43, %v2379_v42 }
 0x5bb   : > { %v2233_v55 = vpop.permute.xlu1 %2232 }
 0x5bc   : > { %3188 = vmatmul.mubr.msk.f32.vlgmr.msra.gmra.mrb[16].mxu1 %vm634_vm2, %v1851_v45 }
 0x5bd   : > { %3196 = vmatpush3.msra.mxu1 %v2045_v33  ;;  %3197 = vmatprep.mubr.msk.f32.mxu1 %vm634_vm2, %v2041_v53  ;;  %v2362_v33 = vld [vmem:[#allocation12 + $0x100] sm:$0xff]  ;;  %v2388_v53 = vld [vmem:[#allocation12 + $0x1d0] sm:$0xff] }
 0x5be   : > { %3205 = vmatprep.subr.mxu1 %v2237_v48  ;;  %v1945_v54 = vpop.permute.xlu0 %1944 }
 0x5bf   : > { %3192 = vmatprep.mubr.msk.f32.mxu0 %vm634_vm2, %v1945_v54 }
 0x5c0   : > { %3193 = vmatmul.mubr.msk.f32.vlgmr.msra.gmra.mrb[12].mxu0 %vm634_vm2, %v1947_v47  ;;  %3198 = vmatmul.mubr.msk.f32.vlgmr.msra.gmra.mrb[18].mxu1 %vm634_vm2, %v2043_v49  ;;  %v2389_v47 = vld [vmem:[#allocation12 + $0x1d8] sm:$0xff]  ;;  %v2386_v49 = vld [vmem:[#allocation12 + $0x1c0] sm:$0xff] }
 0x5c1   : > { %3201 = vmatpush3.msra.mxu0 %v2141_v36  ;;  %3206 = vmatpush3.msra.mxu1 %v2237_v48  ;;  %v3264_v36 = vpack.c.bf16 %v2370_v34, %v2362_v33  ;;  %v2378_v48 = vld [vmem:[#allocation12 + $0x180] sm:$0xff]  ;;  %v3282_v50 = vpack.c.bf16 %v2389_v47, %v2381_v32  ;;  %v2369_v34 = vld [vmem:[#allocation12 + $0x138] sm:$0xff]  ;;  %v2368_v32 = vld [vmem:[#allocation12 + $0x130] sm:$0xff] }
 0x5c2   : > { %3207 = vmatprep.mubr.msk.f32.mxu1 %vm634_vm2, %v2233_v55  ;;  %v2137_v56 = vpop.permute.xlu0 %2136  ;;  %3255 = vmatprep.subr.bf16.mxu0 %v3254_v4  ;;  %v3268_v51 = vpack.c.bf16 %v2386_v49, %v2378_v48  ;;  %v2385_v47 = vld [vmem:[#allocation12 + $0x1b8] sm:$0xff] }
 0x5c3   : > { %3202 = vmatprep.mubr.msk.f32.mxu0 %vm634_vm2, %v2137_v56  ;;  %3271 = vmatprep.subr.bf16.mxu1 %v3270_v8  ;;  %v2335_v56 = vld [vmem:[#allocation12 + $0x28] sm:$0xff]  ;;  %v2393_v48 = vld [vmem:[#allocation12 + $0x1f8] sm:$0xff] }
 0x5c4   : > { %3203 = vmatmul.mubr.msk.f32.vlgmr.msra.gmra.mrb[14].mxu0 %vm634_vm2, %v2139_v52  ;;  %v2380_v52 = vld [vmem:[#allocation12 + $0x190] sm:$0xff] }
 0x5c5   : > { %2506 = vmatprep.mubr.f32.mxu0 %v3709_v1  ;;  %3257 = vmatpush1.bf16.msra.mxu0 %v3256_v9  ;;  %v3284_v54 = vpack.c.bf16 %v2388_v53, %v2380_v52  ;;  %v3314_v53 = vpack.c.bf16 %v2393_v48, %v2385_v47 }
 0x5c6   : > { %v2235_v57 = vpop.permute.xlu0 %2234  ;;  %3259 = vmatprep.subr.bf16.mxu0 %v3258_v16  ;;  %v2351_v16 = vld [vmem:[#allocation12 + $0xa8] sm:$0xff] }
 0x5c7   : > { %3208 = vmatmul.mubr.msk.f32.vlgmr.msra.gmra.mrb[20].mxu1 %vm634_vm2, %v2235_v57  ;;  %v2343_v57 = vld [vmem:[#allocation12 + $0x68] sm:$0xff]  ;;  %v3290_v27 = vpack.c.bf16 %v2359_v17, %v2351_v16 }
 0x5c8   : > { %2583 = vmatprep.mubr.f32.mxu1 %v3709_v1  ;;  %3273 = vmatpush1.bf16.msra.mxu1 %v3272_v59 }
 0x5c9   : > { %3275 = vmatprep.subr.bf16.mxu1 %v3274_v20  ;;  %3261 = vmatpush1.bf16.msra.mxu0 %v3260_v21 }
 0x5ca   : > { %3263 = vmatprep.subr.bf16.mxu0 %v3262_v30  ;;  %v2367_v30 = vld [vmem:[#allocation12 + $0x128] sm:$0xff] }
 0x5cb   : > { %v3294_v42 = vpack.c.bf16 %v2375_v31, %v2367_v30 }
 0x5cc   : > { %3277 = vmatpush1.bf16.msra.mxu1 %v3276_v24  ;;  %v2358_v24 = vld [vmem:[#allocation12 + $0xe0] sm:$0xff] }
 0x5cd   : > { %3279 = vmatprep.subr.bf16.mxu1 %v3278_v35  ;;  %3265 = vmatpush1.bf16.msra.mxu0 %v3264_v36  ;;  %v2377_v35 = vld [vmem:[#allocation12 + $0x178] sm:$0xff]  ;;  %v3292_v37 = vpack.c.bf16 %v2358_v24, %v2350_v23 }
 0x5ce   : > { %3267 = vmatprep.subr.bf16.mxu0 %v3266_v46  ;;  %v3310_v43 = vpack.c.bf16 %v2377_v35, %v2369_v34  ;;  %v2391_v46 = vld [vmem:[#allocation12 + $0x1e8] sm:$0xff] }
 0x5d0   : > { %3281 = vmatpush1.bf16.msra.mxu1 %v3280_v39  ;;  %v2366_v39 = vld [vmem:[#allocation12 + $0x120] sm:$0xff] }
 0x5d1   : > { %3283 = vmatprep.subr.bf16.mxu1 %v3282_v50  ;;  %3269 = vmatpush1.bf16.msra.mxu0 %v3268_v51  ;;  %v2382_v51 = vld [vmem:[#allocation12 + $0x1a0] sm:$0xff] }
 0x5d4   : > { %3285 = vmatpush1.bf16.msra.mxu1 %v3284_v54  ;;  %v2390_v54 = vld [vmem:[#allocation12 + $0x1e0] sm:$0xff] }
 0x609   : > { %v3174_v58 = vpop.f32.mrb[10].mxu1 }
 0x60a   : > { %1655 = vst.msk [vmem:[#allocation3 + $0x8] sm:$0xff] %vm634_vm2, %v3174_v58  ;;  %v1645_v61 = vpop.f32.mrb[11].mxu1  ;;  %v2337_v58 = vld [vmem:[#allocation12 + $0x38] sm:$0xff] }
 0x60b   : > { %1654 = vst.msk [vmem:[#allocation3] sm:$0xff] %vm634_vm2, %v1645_v61 }
 0x680   : > { %v3179_v62 = vpop.f32.mrb[12].mxu1 }
 0x681   : > { %1746 = vrot.lane.b32.xlu0 %v3179_v62, %s3718_s28  ;;  %v1733_v63 = vpop.f32.mrb[13].mxu1  ;;  %v3286_v62 = vpack.c.bf16 %v2343_v57, %v2335_v56  ;;  %v2392_v56 = vld [vmem:[#allocation12 + $0x1f0] sm:$0xff]  ;;  %v3300_v57 = vpack.c.bf16 %v2390_v54, %v2382_v51 }
 0x682   : > { %1744 = vrot.lane.b32.xlu1 %v1733_v63, %s3718_s28  ;;  %v2345_v63 = vld [vmem:[#allocation12 + $0x78] sm:$0xff]  ;;  %s3725_s28 = smov [#allocation15]  }
 0x683   : > { %v3302_v0 = vpack.c.bf16 %v2345_v63, %v2337_v58  ;;  %3287 = vmatprep.subr.bf16.mxu0 %v3286_v62  ;;  %v2396_v62 = vlaneseq }
 0x685   : > { %3303 = vmatprep.subr.bf16.mxu1 %v3302_v0  ;;  %v2397_v63 = vshrl.u32 %v2396_v62, 7 }
 0x687   : > { %v2398_v0 = vsub.s32 0, %v2397_v63  ;;  %v2422_v16 = vsub.s32 6, %v2397_v63  ;;  %v2418_v17 = vsub.s32 5, %v2397_v63  ;;  %v2426_v18 = vsub.s32 7, %v2397_v63 }
 0x68b   : > { %v4281_v60 = vpop.f32.mrb[14].mxu1 }
 0x68c   : > { %v1829_v15 = vpop.f32.mrb[15].mxu1 }
 0x68f   : > { %v3189_v25 = vpop.f32.mrb[16].mxu1 }
 0x690   : > { %v1925_v29 = vpop.f32.mrb[17].mxu1 }
 0x691   : > { %1936 = vrot.lane.b32.xlu1 %v1925_v29, %s3719_s4  ;;  %v2360_v29 = vld [vmem:[#allocation12 + $0xf0] sm:$0xff] }
 0x693   : > { %v3194_v40 = vpop.f32.mrb[12].mxu0  ;;  %v3199_v41 = vpop.f32.mrb[18].mxu1 }
 0x694   : > { %v2021_v44 = vpop.f32.mrb[13].mxu0  ;;  %v2117_v45 = vpop.f32.mrb[19].mxu1 }
 0x695   : > { %2128 = vrot.lane.b32.xlu1 %v2117_v45, %s3721_s17  ;;  %2032 = vrot.lane.b32.xlu0 %v2021_v44, %s3720_s0  ;;  %v2376_v44 = vld [vmem:[#allocation12 + $0x170] sm:$0xff]  ;;  %v2383_v45 = vld [vmem:[#allocation12 + $0x1a8] sm:$0xff] }
 0x696   : > { %v3312_v50 = vpack.c.bf16 %v2376_v44, %v2368_v32  ;;  %v3298_v52 = vpack.c.bf16 %v2391_v46, %v2383_v45 }
 0x697   : > { %v3204_v55 = vpop.f32.mrb[14].mxu0 }
 0x698   : > { %v2213_v61 = vpop.f32.mrb[15].mxu0 }
 0x699   : > { %1840 = vrot.lane.b32.xlu0 %v1829_v15, %s3717_s20  ;;  %v2344_v15 = vld [vmem:[#allocation12 + $0x70] sm:$0xff] }
 0x69a   : > { %v3209_v2 = vpop.f32.mrb[20].mxu1  ;;  %v3304_v22 = vpack.c.bf16 %v2344_v15, %v2336_v14  ;;  %v2414_v15 = vsub.s32 4, %v2397_v63 }
 0x69b   : > { %v2309_v3 = vpop.f32.mrb[21].mxu1 }
 0x69c   : > { %2320 = vrot.lane.b32.xlu1 %v2309_v3, %s3723_s24  ;;  %v2394_v3 = vld [vmem:[%s4405_s7] sm:$0xff] }
 0x69d   : > { %2224 = vrot.lane.b32.xlu0 %v2213_v61, %s3722_s26  ;;  %v2427_v30 = vrot.slane %v2394_v3, %v2426_v18 }
 0x6a0   : > { %1842 = vrot.lane.b32.xlu1 %v4281_v60, %s3717_s20  ;;  %v2334_v60 = vld [vmem:[#allocation12 + $0x20] sm:$0xff]  ;;  %s3613_s20 = scalar_lea.vmem %s4349_s19, 2048 }
 0x6a1   : > { %1938 = vrot.lane.b32.xlu0 %v3189_v25, %s3719_s4  ;;  %v3288_v21 = vpack.c.bf16 %v2342_v12, %v2334_v60  ;;  %v2352_v25 = vld [vmem:[#allocation12 + $0xb0] sm:$0xff]  ;;  %p3614_p2 = scmp.ne.s32.totalorder %s4349_s19, %s3613_s20  ;;  %s3617_s4 = sshll.u32 %s3725_s28, 4  ;;  %s3618_s4 = int_to_ptr.vmem [resolvable:$false] %s3617_s4 }
 0x6a2   : > { %v3308_v38 = vpack.c.bf16 %v2360_v29, %v2352_v25  ;;  %v2419_v29 = vrot.slane %v2394_v3, %v2418_v17  ;;  %p3620_p3 = scmp.lt.s32.totalorder %s4349_s19, %s3618_s4 }
 0x6a3   : > { %p3615_p0 = pnand %p3614_p2, %p4450_p13 }
 0x6a4   : > { %2034 = vrot.lane.b32.xlu1 %v3194_v40, %s3720_s0  ;;  %v2374_v40 = vld [vmem:[#allocation12 + $0x160] sm:$0xff]  ;;  %s3619_s0 = scalar_lea.vmem %s3618_s4, 4096 }
 0x6a5   : > { %2130 = vrot.lane.b32.xlu0 %v3199_v41, %s3721_s17  ;;  %v3296_v49 = vpack.c.bf16 %v2374_v40, %v2366_v39  ;;  %p3616_p4 = pneg %p3615_p0  ;;  %p3621_p6 = scmp.lt.s32.totalorder %s3619_s0, %s3613_s20 }
 0x6a7   : > { %p3622_p8 = por %p3621_p6, %p3620_p3 }
 0x6a8   : > { %2226 = vrot.lane.b32.xlu1 %v3204_v55, %s3722_s26  ;;  %v2384_v55 = vld [vmem:[#allocation12 + $0x1b0] sm:$0xff] }
 0x6a9   : > { %2322 = vrot.lane.b32.xlu0 %v3209_v2, %s3723_s24  ;;  %v3316_v58 = vpack.c.bf16 %v2392_v56, %v2384_v55  ;;  %v2406_v2 = vsub.s32 2, %v2397_v63  ;;  %p3623_p10 = pnand %p3622_p8, %p3616_p4 }
 0x6f3   : > { %v1747_v4 = vpop.permute.xlu0 %1746 }
 0x6f4   : > { %1751 = vst.msk [vmem:[#allocation3 + $0x8] sm:$0xff] %vm832_vm3, %v1747_v4  ;;  %v1745_v5 = vpop.permute.xlu1 %1744  ;;  %v2402_v4 = vsub.s32 1, %v2397_v63 }
 0x6f5   : > { %1750 = vst.msk [vmem:[#allocation3] sm:$0xff] %vm832_vm3, %v1745_v5  ;;  %v2410_v5 = vsub.s32 3, %v2397_v63 }
 0x703   : > { %v1937_v6 = vpop.permute.xlu1 %1936 }
 0x707   : > { %v2033_v7 = vpop.permute.xlu0 %2032  ;;  %v2129_v8 = vpop.permute.xlu1 %2128 }
 0x70b   : > { %v1841_v9 = vpop.permute.xlu0 %1840 }
 0x70c   : > { %1846 = vst.msk [vmem:[#allocation3] sm:$0xff] %vm938_vm4, %v1841_v9  ;;  %v2411_v9 = vrot.slane %v2394_v3, %v2410_v5 }
 0x70d   : > { %1942 = vst.msk [vmem:[#allocation3] sm:$0xff] %vm1044_vm5, %v1937_v6  ;;  %v2399_v6 = vrot.slane %v2394_v3, %v2398_v0 }
 0x70e   : > { %2038 = vst.msk [vmem:[#allocation3] sm:$0xff] %vm1150_vm6, %v2033_v7  ;;  %v2321_v10 = vpop.permute.xlu1 %2320  ;;  %v2407_v7 = vrot.slane %v2394_v3, %v2406_v2 }
 0x70f   : > { %2134 = vst.msk [vmem:[#allocation3] sm:$0xff] %vm1256_vm7, %v2129_v8  ;;  %v2225_v11 = vpop.permute.xlu0 %2224  ;;  %v2403_v8 = vrot.slane %v2394_v3, %v2402_v4 }
 0x710   : > { %2230 = vst.msk [vmem:[#allocation3] sm:$0xff] %vm1362_vm8, %v2225_v11 }
 0x711   : > { %2326 = vst.msk [vmem:[#allocation3] sm:$0xff] %vm1468_vm9, %v2321_v10 }
 0x712   : > { %v1843_v59 = vpop.permute.xlu1 %1842 }
 0x713   : > { %1847 = vst.msk [vmem:[#allocation3 + $0x8] sm:$0xff] %vm938_vm4, %v1843_v59  ;;  %v1939_v13 = vpop.permute.xlu0 %1938 }
 0x714   : > { %1943 = vst.msk [vmem:[#allocation3 + $0x8] sm:$0xff] %vm1044_vm5, %v1939_v13 }
 0x716   : > { %v2035_v20 = vpop.permute.xlu1 %2034 }
 0x717   : > { %2039 = vst.msk [vmem:[#allocation3 + $0x8] sm:$0xff] %vm1150_vm6, %v2035_v20  ;;  %v2131_v26 = vpop.permute.xlu0 %2130 }
 0x718   : > { %2135 = vst.msk [vmem:[#allocation3 + $0x8] sm:$0xff] %vm1256_vm7, %v2131_v26  ;;  %v2328_v33 = vld [vmem:[#allocation3] sm:$0xff] }
 0x719   : > { %2981 = vmatmul.mubr.msk.f32.vlgmr.msra.gmra.mrb[16].mxu0 %vm464_vm1, %v2328_v33  ;;  %2983 = vmatmul.mubr.msk.f32.vlgmr.msra.gmra.mrb[22].mxu1 %vm464_vm1, %v2328_v33 }
 0x71a   : > { %3289 = vmatpush1.bf16.msra.mxu0 %v3288_v21  ;;  %3305 = vmatpush1.bf16.msra.mxu1 %v3304_v22  ;;  %v2227_v36 = vpop.permute.xlu1 %2226 }
 0x71b   : > { %2231 = vst.msk [vmem:[#allocation3 + $0x8] sm:$0xff] %vm1362_vm8, %v2227_v36  ;;  %v2323_v41 = vpop.permute.xlu0 %2322  ;;  %3291 = vmatprep.subr.bf16.mxu0 %v3290_v27  ;;  %3307 = vmatprep.subr.bf16.mxu1 %v3306_v28  ;;  %v2415_v27 = vrot.slane %v2394_v3, %v2414_v15  ;;  %v2423_v28 = vrot.slane %v2394_v3, %v2422_v16 }
 0x71c   : > { %2327 = vst.msk [vmem:[#allocation3 + $0x8] sm:$0xff] %vm1468_vm9, %v2323_v41  ;;  %2512 = vmatprep.mubr.f32.mxu0 %v3709_v1  ;;  %2589 = vmatprep.mubr.f32.mxu1 %v3709_v1 }
 0x71e   : > { %3293 = vmatpush1.bf16.msra.mxu0 %v3292_v37  ;;  %3309 = vmatpush1.bf16.msra.mxu1 %v3308_v38 }
 0x71f   : > { %3295 = vmatprep.subr.bf16.mxu0 %v3294_v42  ;;  %3311 = vmatprep.subr.bf16.mxu1 %v3310_v43 }
 0x722   : > { %3297 = vmatpush1.bf16.msra.mxu0 %v3296_v49  ;;  %3313 = vmatpush1.bf16.msra.mxu1 %v3312_v50 }
 0x723   : > { %v2329_v61 = vld [vmem:[#allocation3 + $0x8] sm:$0xff]  ;;  %3299 = vmatprep.subr.bf16.mxu0 %v3298_v52  ;;  %3315 = vmatprep.subr.bf16.mxu1 %v3314_v53 }
 0x724   : > { %2982 = vmatmul.mubr.msk.f32.gmra.mrb[18].mxu0 %vm464_vm1, %v2329_v61  ;;  %2984 = vmatmul.mubr.msk.f32.gmra.mrb[24].mxu1 %vm464_vm1, %v2329_v61 }
 0x725   : > { %2660 = vmatprep.mubr.f32.mxu0 %v3709_v1  ;;  %2737 = vmatprep.mubr.f32.mxu1 %v3709_v1 }
 0x726   : > { %3301 = vmatpush1.bf16.msra.mxu0 %v3300_v57  ;;  %3317 = vmatpush1.bf16.msra.mxu1 %v3316_v58 }
 0x729   : > { %2985 = vmatmul.mubr.msk.f32.vlgmr.msra.gmra.mrb[20].mxu0 %vm464_vm1, %v2328_v33  ;;  %2987 = vmatmul.mubr.msk.f32.vlgmr.msra.gmra.mrb[26].mxu1 %vm464_vm1, %v2328_v33 }
 0x72a   : > { %2666 = vmatprep.mubr.f32.mxu0 %v3709_v1  ;;  %2743 = vmatprep.mubr.f32.mxu1 %v3709_v1 }
 0x72d   : > { %2986 = vmatmul.mubr.msk.f32.gmra.mrb[22].mxu0 %vm464_vm1, %v2329_v61  ;;  %2988 = vmatmul.mubr.msk.f32.gmra.mrb[28].mxu1 %vm464_vm1, %v2329_v61 }
 0x7ec   : > { %v2508_v1 = vpop.f32.mrb[16].mxu0  ;;  %v2585_v10 = vpop.f32.mrb[22].mxu1 }
 0x7ed   : > { %v2509_v11 = vadd.f32 %v2508_v1, %v2399_v6  ;;  %v2586_v59 = vadd.f32 %v2585_v10, %v2407_v7  ;;  %v2510_v60 = vpop.f32.mrb[17].mxu0  ;;  %v2587_v12 = vpop.f32.mrb[23].mxu1 }
 0x7ee   : > { %v2511_v13 = vadd.f32 %v2510_v60, %v2403_v8  ;;  %v2588_v14 = vadd.f32 %v2587_v12, %v2411_v9 }
 0x7ef   : > { %2750 = vst [vmem:[%s4328_s9] sm:$0xff] %v2509_v11  ;;  %2752 = vst [vmem:[%s4328_s9 + $0x10] sm:$0xff] %v2586_v59 }
 0x7f0   : > { %2751 = vst [vmem:[%s4328_s9 + $0x8] sm:$0xff] %v2511_v13  ;;  %2753 = vst [vmem:[%s4328_s9 + $0x18] sm:$0xff] %v2588_v14 }
 0x7f7   : > { %v2514_v19 = vpop.f32.mrb[18].mxu0  ;;  %v2591_v20 = vpop.f32.mrb[24].mxu1 }
 0x7f8   : > { %v2515_v21 = vadd.f32 %v2514_v19, %v2399_v6  ;;  %v2592_v22 = vadd.f32 %v2591_v20, %v2407_v7  ;;  %v2516_v23 = vpop.f32.mrb[19].mxu0  ;;  %v2593_v24 = vpop.f32.mrb[25].mxu1 }
 0x7f9   : > { %v2517_v25 = vadd.f32 %v2516_v23, %v2403_v8  ;;  %v2594_v26 = vadd.f32 %v2593_v24, %v2411_v9 }
 0x7fa   : > { %2758 = vst [vmem:[%s4328_s9 + $0x40] sm:$0xff] %v2515_v21  ;;  %2760 = vst [vmem:[%s4328_s9 + $0x50] sm:$0xff] %v2592_v22 }
 0x7fb   : > { %2759 = vst [vmem:[%s4328_s9 + $0x48] sm:$0xff] %v2517_v25  ;;  %2761 = vst [vmem:[%s4328_s9 + $0x58] sm:$0xff] %v2594_v26 }
 0x7fc   : > { %v2662_v31 = vpop.f32.mrb[20].mxu0  ;;  %v2739_v33 = vpop.f32.mrb[26].mxu1 }
 0x7fd   : > { %v2663_v34 = vadd.f32 %v2662_v31, %v2415_v27  ;;  %v2740_v35 = vadd.f32 %v2739_v33, %v2423_v28  ;;  %v2664_v36 = vpop.f32.mrb[21].mxu0  ;;  %v2741_v37 = vpop.f32.mrb[27].mxu1 }
 0x7fe   : > { %v2665_v38 = vadd.f32 %v2664_v36, %v2419_v29  ;;  %v2742_v39 = vadd.f32 %v2741_v37, %v2427_v30 }
 0x7ff   : > { %2754 = vst [vmem:[%s4328_s9 + $0x20] sm:$0xff] %v2663_v34  ;;  %2756 = vst [vmem:[%s4328_s9 + $0x30] sm:$0xff] %v2740_v35 }
 0x800   : > { %2755 = vst [vmem:[%s4328_s9 + $0x28] sm:$0xff] %v2665_v38  ;;  %2757 = vst [vmem:[%s4328_s9 + $0x38] sm:$0xff] %v2742_v39  ;;  %v2668_v40 = vpop.f32.mrb[22].mxu0  ;;  %v2745_v41 = vpop.f32.mrb[28].mxu1 }
 0x801   : > { %v2669_v42 = vadd.f32 %v2668_v40, %v2415_v27  ;;  %v2746_v43 = vadd.f32 %v2745_v41, %v2423_v28  ;;  %v2670_v32 = vpop.f32.mrb[23].mxu0  ;;  %v2747_v44 = vpop.f32.mrb[29].mxu1 }
 0x802   : > { %v2671_v45 = vadd.f32 %v2670_v32, %v2419_v29  ;;  %v2748_v46 = vadd.f32 %v2747_v44, %v2427_v30 }
 0x803   : > { %2762 = vst [vmem:[%s4328_s9 + $0x60] sm:$0xff] %v2669_v42  ;;  %2764 = vst [vmem:[%s4328_s9 + $0x70] sm:$0xff] %v2746_v43 }
 0x804   : > { %2763 = vst [vmem:[%s4328_s9 + $0x68] sm:$0xff] %v2671_v45  ;;  %2765 = vst [vmem:[%s4328_s9 + $0x78] sm:$0xff] %v2748_v46 }
 0x805   : > { %3626 = shalt.err (!%p3623_p10)
}
 0x806   : > { %s3627_s17 = scalar_lea.hbm %s4347_s21, 2048  ;;  %s3631_s18 = scalar_lea.hbm %s4449_s13, 4096 }
 0x807   : > { %p3628_p11 = scmp.ne.s32.totalorder %s4347_s21, %s3627_s17  ;;  %p3632_p7 = scmp.lt.u32.totalorder %s4347_s21, %s4449_s13 }
 0x808   : > { %p3633_p12 = scmp.lt.u32.totalorder %s3631_s18, %s3627_s17  ;;  %p3635_p2 = scmp.lt.u32.totalorder %s3627_s17, %s4347_s21 }
 0x809   : > { %p3629_p9 = pnand %p3628_p11, %p4450_p13 }
 0x80a   : > { %p3634_p1 = por %p3633_p12, %p3632_p7 }
 0x80b   : > { %p3630_p5 = pneg %p3629_p9 }
 0x80c   : > { %p3636_p0 = por %p3635_p2, %p3634_p1 }
 0x80e   : > { %p3637_p4 = pnand %p3636_p0, %p3630_p5 }
 0x810   : > { %3640 = shalt.err (!%p3637_p4)
}
 0x811   : > { %s3726_s9 = smov 1024  }
 0x812   : > { %3338 = dma.vmem_to_hbm [thread:$0]  (%p4450_p13), %s4349_s19, 2048, %s4347_s21, %s2767_s23, %s3726_s9, %s3726_s9, %s3724_s15  }
 0x813 PF: > { %s4451_s29 = sld [smem:[#allocation22_spill]]  ;;  %s4452_s25 = sld [smem:[#allocation23_spill]] }
 0x814   : > { %p4454_p6 = scmp.ge.s32.totalorder %s3695_s12, 2 }
 0x819   : > { %s2795_s30 = sand.u32 1, %s4451_s29   ;;  %p4453_p3 = scmp.ne.s32.totalorder %s4452_s25, 0 }
 0x81a   : > { %s2796_s20 = scalar_lea.sflag [#allocation6], %s2795_s30 }
 0x81b   : > { %p3361_p8 = pnand %p4454_p6, %p4453_p3 }
 0x81d   : > { %3678 = dma.done.wait (!%p3361_p8), %s2796_s20, 2048  }
 0x81e   : > { %3680 = vsyncadd (!%p3361_p8), %s2796_s20, 4294965248  ;;  %p27_p10 = scmp.ge.s32.totalorder %s3935_s14, 4   ;;  %s4455_s30 = smov %s3687_s10 }
 0x81f   : > { %s4456_s10 = smov %s3691_s11  ;;  %s4457_s11 = smov %s3951_s27 }
 0x820   : > { %s4458_s12 = smov %s3935_s14  ;;  %29 = sbr.rel (!%p27_p10) target bundleno = 15 (0xf), region = 130 }
 0x827   :  { %2801 = vsyncpa [#allocation5], 1 }
 0x828   :  { %2803 = vsyncpa [#allocation5 + $0x1], 1 }
 0x829   :  { %2804 = vsyncpa [#allocation8], 1 }
 0x82a   :  { %2806 = vsyncpa [#allocation8 + $0x1], 1 }
 0x82b   :  { %2807 = vsyncpa [#allocation11], 1 }
 0x82c   :  { %2808 = vsyncpa [#allocation14], 1 }
 0x82d   :  { %2809 = vsyncpa [#allocation6], 1 }
 0x82e   :  { %2811 = vsyncpa [#allocation6 + $0x1], 1 }

// kernel: tpu_custom_call.1
= control target key start
LH: loop header
LB: loop body
LE: loop exit
PB: predicated region body
PF: predicated region fallthrough
CT: control target
= control target key end

     0   :  { %s4398_s0 = inlined_call_operand.hbm [shape: f32[2,16,64], index: 0, kind: input, shape index: {}]   ;;  %s4399_s1 = inlined_call_operand.hbm [shape: f32[2,8,64], index: 1, kind: input, shape index: {}]   ;;  %s4400_s2 = inlined_call_operand.hbm [shape: f32[64,64], index: 2, kind: input, shape index: {}]   ;;  %s4401_s3 = inlined_call_operand.vmem [shape: f32[1,64], index: 3, kind: input, shape index: {}]   ;;  %s4402_s4 = inlined_call_operand.hbm [shape: f32[64,128], index: 4, kind: input, shape index: {}]   ;;  %s4403_s5 = inlined_call_operand.vmem [shape: f32[1,128], index: 5, kind: input, shape index: {}]   ;;  %s4404_s6 = inlined_call_operand.hbm [shape: f32[64,1024], index: 6, kind: input, shape index: {}]   ;;  %s4405_s7 = inlined_call_operand.vmem [shape: f32[1,1024], index: 7, kind: input, shape index: {}]   ;;  %s4406_s8 = inlined_call_operand.hbm [shape: f32[64,64], index: 8, kind: input, shape index: {}]   ;;  %s4407_s9 = inlined_call_operand.hbm [shape: f32[2,16,1024], index: 9, kind: output, shape index: {}]  }
   0x1   :  { %4419 = sst [smem:[#allocation24_spill]] %s4398_s0 }
   0x2   :  { %4420 = sst [smem:[#allocation25_spill]] %s4400_s2 }
   0x3   :  { %4421 = sst [smem:[#allocation26_spill]] %s4402_s4 }
   0x4   :  { %4422 = sst [smem:[#allocation27_spill]] %s4404_s6 }
   0x5   :  { %4423 = sst [smem:[#allocation28_spill]] %s4407_s9 }
   0x6   :  { %14 = vsyncpa [#allocation5], 0 }
   0x7   :  { %16 = vsyncpa [#allocation5 + $0x1], 0 }
   0x8   :  { %17 = vsyncpa [#allocation8], 0 }
   0x9   :  { %19 = vsyncpa [#allocation8 + $0x1], 0 }
   0xa   :  { %20 = vsyncpa [#allocation11], 0 }
   0xb   :  { %21 = vsyncpa [#allocation14], 0 }
   0xc   :  { %22 = vsyncpa [#allocation6], 0 }
   0xd   :  { %24 = vsyncpa [#allocation6 + $0x1], 0  ;;  %s3777_s30 = smov 0   ;;  %s3779_s10 = smov 0  }
   0xe   :  { %s3781_s11 = smov 0   ;;  %s3783_s12 = smov 0  }
   0xf LB: > { %4424 = sst [smem:[#allocation22_spill]] %s3683_s30  ;;  %s3798_s13 = sadd.s32 4294967295, %s3695_s12   ;;  %s3695_s12 = sphi %s3783_s12, %s4458_s12   ;;  %s3691_s11 = sphi %s3781_s11, %s4457_s11   ;;  %s3687_s10 = sphi %s3779_s10, %s4456_s10   ;;  %s3683_s30 = sphi %s3777_s30, %s4455_s30  }
  0x10   : > { %s2914_s14 = sadd.s32 4294967294, %s3695_s12   ;;  %p50_p0 = scmp.ne.s32.totalorder %s3687_s10, %s3683_s30 }
  0x11   : > { %p4408_p1 = scmp.eq.s32.totalorder %s3798_s13, 0  ;;  %p253_p3 = scmp.eq.s32.totalorder %s2914_s14, 1 }
  0x12   : > { %p2915_p5 = scmp.ge.s32.totalorder %s3695_s12, 1  ;;  %p260_p7 = scmp.lt.s32.totalorder %s3695_s12, 3 }
  0x13   : > { %p3807_p4 = por %p4408_p1, %p50_p0  ;;  %p3812_p6 = por %p253_p3, %p50_p0 }
  0x14   : > { %p3817_p8 = pnand %p2915_p5, %p260_p7  ;;  %s3697_s18 = smov [#allocation9]  }
  0x15   : > { %s4425_s15 = scalar_select %p3807_p4, 1, 0 }
  0x16   : > { %s4426_s16 = scalar_select %p3812_p6, 1, 0 }
  0x17   : > { %s4428_s17 = scalar_select %p3817_p8, 1, 0 }
  0x18   : > { %4427 = sst [smem:[#allocation23_spill]] %s4426_s16  ;;  %s272_s19 = sshll.u32 %s3697_s18, 4  ;;  %s3821_s19 = int_to_ptr.vmem [resolvable:$true] %s272_s19 }
  0x19   : > { %p3340_p9 = pneg %p3817_p8  ;;  %s3698_s21 = smov [#allocation10]  }
  0x1a   : > { %s288_s22 = sshll.u32 %s3698_s21, 4  ;;  %s3699_s23 = smov [#allocation12]   ;;  %s3832_s22 = int_to_ptr.vmem [resolvable:$true] %s288_s22 }
  0x1b   : > { %p3828_p11 = pnand %p3340_p9, %p4408_p1  ;;  %s3834_s24 = sshll.u32 %s3699_s23, 4  ;;  %s305_s24 = int_to_ptr.vmem [resolvable:$true] %s3834_s24 }
  0x1c   : > { %s4430_s2 = sld [smem:[#allocation25_spill]] }
  0x1d   : > { %p3844_p13 = pneg %p3828_p11 }
  0x22   : > { %s3441_s27 = scalar_lea.hbm %s4430_s2, 1024 }
  0x23   : > { %p3442_p12 = scmp.ne.s32.totalorder %s4430_s2, %s3441_s27  ;;  %p3448_p5 = scmp.lt.u32.totalorder %s3441_s27, %s4430_s2 }
  0x25   : > { %p3444_p0 = pnand %p3844_p13, %p3442_p12 }
  0x27   : > { %p3445_p3 = pneg %p3444_p0 }
  0x29   : > { %p3450_p7 = pnand %p3448_p5, %p3445_p3 }
  0x2b   : > { %3453 = shalt.err (!%p3450_p7)
}
  0x2c   : > { %s3454_s23 = scalar_lea.vmem %s3821_s19, 1024  ;;  %p3462_p2 = scmp.lt.s32.totalorder %s3821_s19, %s3821_s19 }
  0x2d   : > { %p3455_p9 = scmp.ne.s32.totalorder %s3821_s19, %s3454_s23  ;;  %p3463_p6 = scmp.lt.s32.totalorder %s3454_s23, %s3454_s23 }
  0x2f   : > { %p3457_p10 = pnand %p3455_p9, %p3844_p13  ;;  %p3464_p12 = por %p3463_p6, %p3462_p2 }
  0x31   : > { %p3458_p1 = pneg %p3457_p10 }
  0x33   : > { %p3465_p0 = pnand %p3464_p12, %p3458_p1 }
  0x35   : > { %3468 = shalt.err (!%p3465_p0)
}
  0x36   : > { %s4414_s25 = smov 128   ;;  %s4416_s26 = smov 8  }
  0x37   : > { %3343 = dma.hbm_to_vmem [thread:$0]  (!%p3828_p11), %s4430_s2, 1024, %s3821_s19, [#allocation8], %s4414_s25, %s4414_s25, %s4416_s26  }
  0x38   : > { %s4432_s4 = sld [smem:[#allocation26_spill]] }
  0x3e   : > { %s3469_s21 = scalar_lea.hbm %s4432_s4, 1024 }
  0x3f   : > { %p3470_p1 = scmp.ne.s32.totalorder %s4432_s4, %s3469_s21  ;;  %p3476_p10 = scmp.lt.u32.totalorder %s3469_s21, %s4432_s4 }
  0x41   : > { %p3472_p2 = pnand %p3470_p1, %p3844_p13 }
  0x43   : > { %p3473_p6 = pneg %p3472_p2 }
  0x45   : > { %p3478_p3 = pnand %p3476_p10, %p3473_p6 }
  0x47   : > { %3481 = shalt.err (!%p3478_p3)
}
  0x48   : > { %s3482_s19 = scalar_lea.vmem %s3832_s22, 1024  ;;  %p3490_p12 = scmp.lt.s32.totalorder %s3832_s22, %s3832_s22 }
  0x49   : > { %p3483_p5 = scmp.ne.s32.totalorder %s3832_s22, %s3482_s19  ;;  %p3491_p0 = scmp.lt.s32.totalorder %s3482_s19, %s3482_s19 }
  0x4b   : > { %p3485_p7 = pnand %p3483_p5, %p3844_p13  ;;  %p3492_p1 = por %p3491_p0, %p3490_p12 }
  0x4d   : > { %p3486_p9 = pneg %p3485_p7 }
  0x4f   : > { %p3493_p2 = pnand %p3492_p1, %p3486_p9 }
  0x51   : > { %3496 = shalt.err (!%p3493_p2)
}
  0x52   : > { %3346 = dma.hbm_to_vmem [thread:$0]  (!%p3828_p11), %s4432_s4, 1024, %s3832_s22, [#allocation11], %s4414_s25, %s4414_s25, %s4416_s26  }
  0x53   : > { %s4433_s6 = sld [smem:[#allocation27_spill]] }
  0x59   : > { %s3497_s28 = scalar_lea.hbm %s4433_s6, 8192 }
  0x5a   : > { %p3498_p6 = scmp.ne.s32.totalorder %s4433_s6, %s3497_s28  ;;  %p3504_p5 = scmp.lt.u32.totalorder %s3497_s28, %s4433_s6 }
  0x5c   : > { %p3500_p10 = pnand %p3498_p6, %p3844_p13 }
  0x5e   : > { %p3501_p3 = pneg %p3500_p10 }
  0x60   : > { %p3506_p7 = pnand %p3504_p5, %p3501_p3 }
  0x62   : > { %3509 = shalt.err (!%p3506_p7)
}
  0x63   : > { %s3510_s19 = scalar_lea.vmem %s305_s24, 8192  ;;  %p3518_p1 = scmp.lt.s32.totalorder %s305_s24, %s305_s24 }
  0x64   : > { %p3511_p9 = scmp.ne.s32.totalorder %s305_s24, %s3510_s19  ;;  %p3519_p2 = scmp.lt.s32.totalorder %s3510_s19, %s3510_s19 }
  0x66   : > { %p3513_p12 = pnand %p3511_p9, %p3844_p13  ;;  %p3520_p4 = por %p3519_p2, %p3518_p1 }
  0x68   : > { %p3514_p0 = pneg %p3513_p12 }
  0x6a   : > { %p3521_p8 = pnand %p3520_p4, %p3514_p0 }
  0x6c   : > { %3524 = shalt.err (!%p3521_p8)
}
  0x6d   : > { %s3702_s22 = smov 1024   ;;  %s3703_s9 = smov 64  }
  0x6e   : > { %3349 = dma.hbm_to_vmem [thread:$0]  (!%p3828_p11), %s4433_s6, 8192, %s305_s24, [#allocation11], %s3702_s22, %s3702_s22, %s3703_s9  }
  0x6f   : > { %s3704_s27 = smov [#allocation13]   ;;  %s3525_s21 = scalar_lea.hbm %s4406_s8, 1024 }
  0x70   : > { %s320_s28 = sshll.u32 %s3704_s27, 4  ;;  %p3526_p4 = scmp.ne.s32.totalorder %s4406_s8, %s3525_s21  ;;  %s321_s28 = int_to_ptr.vmem [resolvable:$true] %s320_s28 }
  0x71   : > { %p3532_p10 = scmp.lt.u32.totalorder %s3525_s21, %s4406_s8 }
  0x72   : > { %p3528_p8 = pnand %p3526_p4, %p3844_p13 }
  0x74   : > { %p3529_p6 = pneg %p3528_p8 }
  0x76   : > { %p3534_p3 = pnand %p3532_p10, %p3529_p6 }
  0x78   : > { %3537 = shalt.err (!%p3534_p3)
}
  0x79   : > { %s3538_s24 = scalar_lea.vmem %s321_s28, 1024  ;;  %p3546_p12 = scmp.lt.s32.totalorder %s321_s28, %s321_s28 }
  0x7a   : > { %p3539_p5 = scmp.ne.s32.totalorder %s321_s28, %s3538_s24  ;;  %p3547_p0 = scmp.lt.s32.totalorder %s3538_s24, %s3538_s24 }
  0x7c   : > { %p3541_p7 = pnand %p3539_p5, %p3844_p13  ;;  %p3548_p1 = por %p3547_p0, %p3546_p12 }
  0x7e   : > { %p3542_p9 = pneg %p3541_p7 }
  0x80   : > { %p3549_p2 = pnand %p3548_p1, %p3542_p9 }
  0x82   : > { %3552 = shalt.err (!%p3549_p2)
}
  0x83   : > { %s4434_s22 = smov 8   ;;  %s4435_s9 = smov 128  }
  0x84   : > { %3352 = dma.hbm_to_vmem [thread:$0]  (!%p3828_p11), %s4406_s8, 1024, %s321_s28, [#allocation14], %s4435_s9, %s4435_s9, %s4434_s22  }
  0x85   : > { %s3935_s14 = sadd.s32 1, %s3695_s12   ;;  %s37_s20 = sadd.s32 1, %s3691_s11 }
  0x86   : > { %s34_s30 = ssub.s32 %s3695_s12, %s3935_s14  ;;  %p44_p13 = scmp.ne.s32.totalorder %s3691_s11, %s3687_s10 }
  0x87   : > { %p35_p4 = scmp.eq.s32.totalorder %s34_s30, 0  ;;  %p45_p8 = scmp.eq.s32.totalorder %s3695_s12, 0 }
  0x88   : > { %p4436_p6 = scmp.eq.s32.totalorder %s3798_s13, 1  ;;  %p3368_p3 = scmp.lt.s32.totalorder %s3695_s12, 2 }
  0x89   : > { %s3951_s27 = scalar_select %p35_p4, %s3691_s11, %s37_s20  }
  0x8a   : > { %p3945_p10 = por %p4436_p6, %p44_p13  ;;  %p46_p5 = por %p45_p8, %p44_p13 }
  0x8b   : > { %s3954_s29 = sand.u32 1, %s3691_s11   ;;  %s2994_s18 = sshll.u32 %s3695_s12, 8 }
  0x8c   : > { %s4437_s16 = scalar_select %p3945_p10, 1, 0 }
  0x8d   : > { %s2921_s28 = sshll.u32 %s3954_s29, 4  ;;  %s4438_s0 = sld [smem:[#allocation24_spill]] }
  0x8e   : > { %s338_s24 = scalar_lea.vmem [#allocation4], %s2921_s28  ;;  %p3965_p11 = pnand %p3368_p3, %p46_p5 }
  0x8f   : > { %s345_s25 = sshll.u32 %s338_s24, 4  ;;  %s2924_s30 = sshll.u32 %s3954_s29, 3  ;;  %s3963_s25 = int_to_ptr.vmem [resolvable:$true] %s345_s25 }
  0x90   : > { %s335_s2 = scalar_lea.sflag [#allocation5], %s3954_s29  ;;  %p3555_p9 = pneg %p3965_p11 }
  0x93   : > { %s3961_s19 = scalar_lea.hbm %s4438_s0, %s2994_s18  ;;  %s3558_s23 = scalar_lea.hbm %s4438_s0, 512 }
  0x94   : > { %s3553_s21 = scalar_lea.hbm %s3961_s19, 256  ;;  %p3559_p1 = scmp.lt.u32.totalorder %s3961_s19, %s4438_s0 }
  0x95   : > { %p3554_p7 = scmp.ne.s32.totalorder %s3961_s19, %s3553_s21  ;;  %p3560_p2 = scmp.lt.u32.totalorder %s3558_s23, %s3553_s21 }
  0x96   : > { %p3562_p4 = scmp.lt.u32.totalorder %s3553_s21, %s3961_s19 }
  0x97   : > { %p3556_p12 = pnand %p3555_p9, %p3554_p7  ;;  %p3561_p13 = por %p3560_p2, %p3559_p1 }
  0x99   : > { %p3557_p0 = pneg %p3556_p12  ;;  %p3563_p8 = por %p3562_p4, %p3561_p13 }
  0x9b   : > { %p3564_p6 = pnand %p3563_p8, %p3557_p0 }
  0x9d   : > { %3567 = shalt.err (!%p3564_p6)
}
  0x9e   : > { %s3568_s20 = scalar_lea.vmem %s3963_s25, 256  ;;  %s3705_s28 = smov [#allocation4]  }
  0x9f   : > { %p3569_p3 = scmp.ne.s32.totalorder %s3963_s25, %s3568_s20  ;;  %s3573_s18 = sshll.u32 %s3705_s28, 4  ;;  %s3574_s18 = int_to_ptr.vmem [resolvable:$false] %s3573_s18 }
  0xa0   : > { %s3575_s4 = scalar_lea.vmem %s3574_s18, 512  ;;  %p3576_p12 = scmp.lt.s32.totalorder %s3963_s25, %s3574_s18 }
  0xa1   : > { %p3571_p5 = pnand %p3569_p3, %p3555_p9  ;;  %p3577_p1 = scmp.lt.s32.totalorder %s3575_s4, %s3568_s20 }
  0xa3   : > { %p3572_p7 = pneg %p3571_p5  ;;  %p3578_p2 = por %p3577_p1, %p3576_p12 }
  0xa5   : > { %p3579_p13 = pnand %p3578_p2, %p3572_p7 }
  0xa7   : > { %3582 = shalt.err (!%p3579_p13)
}
  0xa8   : > { %3356 = dma.hbm_to_vmem [thread:$0]  (!%p3965_p11), %s3961_s19, 256, %s3963_s25, %s335_s2, %s4435_s9, %s4435_s9, %s4434_s22  }
  0xa9   : > { %s2925_s21 = sshll.u32 %s3695_s12, 7  ;;  %s359_s28 = scalar_lea.vmem [#allocation7], %s2924_s30 }
  0xaa   : > { %s4006_s24 = scalar_lea.hbm %s4399_s1, %s2925_s21  ;;  %s366_s18 = sshll.u32 %s359_s28, 4  ;;  %s367_s18 = int_to_ptr.vmem [resolvable:$true] %s366_s18 }
  0xab   : > { %s4440_s4 = sand.u32 1, %s3695_s12   ;;  %s3583_s6 = scalar_lea.hbm %s4006_s24, 128 }
  0xac   : > { %s356_s0 = scalar_lea.sflag [#allocation8], %s4440_s4  ;;  %p3584_p0 = scmp.ne.s32.totalorder %s4006_s24, %s3583_s6 }
  0xad   : > { %s3588_s9 = scalar_lea.hbm %s4399_s1, 256  ;;  %p3589_p6 = scmp.lt.u32.totalorder %s4006_s24, %s4399_s1 }
  0xae   : > { %p3586_p4 = pnand %p3584_p0, %p3555_p9  ;;  %p3590_p3 = scmp.lt.u32.totalorder %s3588_s9, %s3583_s6 }
  0xaf   : > { %p3592_p7 = scmp.lt.u32.totalorder %s3583_s6, %s4006_s24 }
  0xb0   : > { %p3587_p8 = pneg %p3586_p4  ;;  %p3591_p5 = por %p3590_p3, %p3589_p6 }
  0xb2   : > { %p3593_p12 = por %p3592_p7, %p3591_p5 }
  0xb4   : > { %p3594_p1 = pnand %p3593_p12, %p3587_p8 }
  0xb6   : > { %3597 = shalt.err (!%p3594_p1)
}
  0xb7   : > { %s3598_s25 = scalar_lea.vmem %s367_s18, 128  ;;  %s3706_s30 = smov [#allocation7]  }
  0xb8   : > { %p3599_p2 = scmp.ne.s32.totalorder %s367_s18, %s3598_s25  ;;  %s3603_s21 = sshll.u32 %s3706_s30, 4  ;;  %s3604_s21 = int_to_ptr.vmem [resolvable:$false] %s3603_s21 }
  0xb9   : > { %s3605_s23 = scalar_lea.vmem %s3604_s21, 256  ;;  %p3606_p4 = scmp.lt.s32.totalorder %s367_s18, %s3604_s21 }
  0xba   : > { %p3601_p13 = pnand %p3599_p2, %p3555_p9  ;;  %p3607_p10 = scmp.lt.s32.totalorder %s3605_s23, %s3598_s25 }
  0xbc   : > { %p3602_p0 = pneg %p3601_p13  ;;  %p3608_p3 = por %p3607_p10, %p3606_p4 }
  0xbe   : > { %p3609_p6 = pnand %p3608_p3, %p3602_p0 }
  0xc0   : > { %3612 = shalt.err (!%p3609_p6)
}
  0xc1   : > { %3359 = dma.hbm_to_vmem [thread:$0]  (!%p3965_p11), %s4006_s24, 128, %s367_s18, %s356_s0  }
  0xc2   : > { %p4441_p8 = scmp.ne.s32.totalorder %s4428_s17, 0 }
  0xc3   : > { %s4034_s6 = sand.u32 (!%p4441_p8), 1, %s3687_s10   ;;  %p4442_p10 = scmp.ne.s32.totalorder (!%p4441_p8), %s4425_s15, 0 }
  0xc4   : > { %375 = sbr.rel (%p4441_p8) target bundleno = 2067 (0x813), region = 56  ;;  %s2927_s20 = sshll.u32 (!%p4441_p8), %s4034_s6, 4 }
  0xc5   : > { %s378_s28 = scalar_lea.sflag (!%p4441_p8), [#allocation5], %s4034_s6  ;;  %s4038_s4 = scalar_lea.vmem (!%p4441_p8), [#allocation4], %s2927_s20 }
  0xcb   : > { %3658 = dma.done.wait (%p4442_p10), %s378_s28, 256  }
  0xcc   : > { %3660 = vsyncadd (%p4442_p10), %s378_s28, 4294967040  ;;  %s386_s0 = sand.u32 1, %s3798_s13   ;;  %s2928_s17 = sshll.u32 %s4034_s6, 3 }
  0xcd   : > { %s387_s26 = scalar_lea.sflag [#allocation8], %s386_s0  ;;  %s4046_s24 = scalar_lea.vmem [#allocation7], %s2928_s17 }
  0xce   : > { %3662 = dma.done.wait (%p4442_p10), %s387_s26, 128  }
  0xcf   : > { %3664 = vsyncadd (%p4442_p10), %s387_s26, 4294967168  ;;  %p4443_p11 = scmp.eq.s32.totalorder %s3798_s13, 0 }
  0xd1   : > { %3666 = dma.done.wait (%p4443_p11), [#allocation8], 1024   ;;  %p4444_p9 = pmov %p4443_p11 }
  0xd3   : > { %3668 = vsyncadd (%p4444_p9), [#allocation8], 4294966272  ;;  %p4445_p5 = pmov %p4444_p9 }
  0xd5   : > { %3670 = dma.done.wait (%p4445_p5), [#allocation11], 9216   ;;  %p4446_p7 = pmov %p4445_p5 }
  0xd6   : > { %p4447_p12 = pmov %p4445_p5 }
  0xd7   : > { %3672 = vsyncadd (%p4446_p7), [#allocation11], 4294958080 }
  0xd8   : > { %3674 = dma.done.wait (%p4447_p12), [#allocation14], 1024   ;;  %p4448_p1 = pmov %p4445_p5 }
  0xd9   : > { %v3707_v0 = vmov 0.0|0.0   ;;  %vm3708_vm0 = vmmov 0   ;;  %v3709_v1 = vmov 0.0   ;;  %v546_v2 = vld [vmem:[#allocation10] sm:$0xff]  ;;  %v547_v3 = vld [vmem:[#allocation10 + $0x8] sm:$0xff]  ;;  %v548_v7 = vld [vmem:[#allocation10 + $0x10] sm:$0xff] }
  0xda   : > { %3676 = vsyncadd (%p4448_p1), [#allocation14], 4294966272  ;;  %3226 = vmatprep.subr.bf16.mxu1 %v3707_v0  ;;  %3108 = vmatprep.mubr.msk.f32.mxu1 %vm3708_vm0, %v3709_v1  ;;  %v449_v4 = vld [vmem:[#allocation9] sm:$0xff]  ;;  %v3227_v5 = vpack.c.bf16 %v547_v3, %v546_v2  ;;  %v450_v6 = vld [vmem:[#allocation9 + $0x8] sm:$0xff]  ;;  %vm464_vm1 = vcmask 523264   ;;  %vm634_vm2 = vcmask 64512  }
  0xdb   : > { %v549_v8 = vld [vmem:[#allocation10 + $0x18] sm:$0xff]  ;;  %v3210_v9 = vpack.c.bf16 %v450_v6, %v449_v4  ;;  %v451_v10 = vld [vmem:[#allocation9 + $0x10] sm:$0xff]  ;;  %v453_v14 = vld [vmem:[#allocation9 + $0x20] sm:$0xff]  ;;  %s3710_s9 = smov 112   ;;  %s3711_s29 = smov 120   ;;  %vm832_vm3 = vcmask 130112  }
  0xdc   : > { %v452_v11 = vld [vmem:[#allocation9 + $0x18] sm:$0xff]  ;;  %3228 = vmatpush3.bf16.msra.mxu1 %v3227_v5  ;;  %v3230_v12 = vpack.c.bf16 %v549_v8, %v548_v7  ;;  %v454_v15 = vld [vmem:[#allocation9 + $0x28] sm:$0xff]  ;;  %v550_v16 = vld [vmem:[#allocation10 + $0x20] sm:$0xff]  ;;  %s3712_s19 = smov 104   ;;  %s3713_s25 = smov 96   ;;  %vm938_vm4 = vcmask 195712  }
  0xdd   : > { %v3214_v13 = vpack.c.bf16 %v452_v11, %v451_v10  ;;  %3211 = vmatprep.subr.bf16.mxu0 %v3210_v9  ;;  %3229 = vmatprep.subr.bf16.mxu1 %v3707_v0  ;;  %v551_v17 = vld [vmem:[#allocation10 + $0x28] sm:$0xff]  ;;  %v446_v18 = vld [vmem:[%s4038_s4] sm:$0xff]  ;;  %v3218_v19 = vpack.c.bf16 %v454_v15, %v453_v14  ;;  %v456_v22 = vld [vmem:[#allocation9 + $0x38] sm:$0xff]  ;;  %s3714_s30 = smov 88   ;;  %s3715_s21 = smov 80   ;;  %vm1044_vm5 = vcmask 261312  }
  0xde   : > { %3213 = vmatpush3.bf16.msra.mxu0 %v3210_v9  ;;  %3089 = vmatprep.mubr.msk.f32.mxu0 %vm464_vm1, %v446_v18  ;;  %v3233_v20 = vpack.c.bf16 %v551_v17, %v550_v16  ;;  %v455_v21 = vld [vmem:[#allocation9 + $0x30] sm:$0xff]  ;;  %v553_v24 = vld [vmem:[#allocation10 + $0x38] sm:$0xff]  ;;  %s3716_s23 = smov 72   ;;  %s3717_s20 = smov 16   ;;  %vm1150_vm6 = vcmask 326912   ;;  %vm1256_vm7 = vcmask 392512  }
  0xdf   : > { %3215 = vmatprep.subr.bf16.mxu0 %v3214_v13  ;;  %v552_v23 = vld [vmem:[#allocation10 + $0x30] sm:$0xff]  ;;  %v3222_v25 = vpack.c.bf16 %v456_v22, %v455_v21  ;;  %v447_v28 = vld [vmem:[%s4038_s4 + $0x8] sm:$0xff]  ;;  %s3718_s28 = smov 8   ;;  %s3719_s4 = smov 24   ;;  %vm1362_vm8 = vcmask 458112   ;;  %vm1468_vm9 = vcmask 523712  }
  0xe0   : > { %3231 = vmatpush3.bf16.msra.mxu1 %v3230_v12  ;;  %v3236_v26 = vpack.c.bf16 %v553_v24, %v552_v23  ;;  %v448_v27 = vld [vmem:[%s4046_s24] sm:$0xff]  ;;  %s3720_s0 = smov 32   ;;  %s3721_s17 = smov 40  }
  0xe1   : > { %3232 = vmatprep.subr.bf16.mxu1 %v3707_v0  ;;  %v2937_v29 = vld [vmem:[%s4403_s5] ss:$0 sm:$0xff]  ;;  %s3722_s26 = smov 48   ;;  %s3723_s24 = smov 56  }
  0xe2   : > { %3217 = vmatpush3.bf16.msra.mxu0 %v3214_v13  ;;  %v2934_v31 = vld [vmem:[%s4401_s3] ss:$0 sm:$0xff]  ;;  %s3724_s15 = smov 64   ;;  %s2933_s22 = sshll.u32 %s4034_s6, 7 }
  0xe3   : > { %3219 = vmatprep.subr.bf16.mxu0 %v3218_v19  ;;  %p4450_p13 = scmp.ne.s32.totalorder %s4437_s16, 0 }
  0xe4   : > { %3234 = vmatpush3.bf16.msra.mxu1 %v3233_v20 }
  0xe5   : > { %3235 = vmatprep.subr.bf16.mxu1 %v3707_v0 }
  0xe6   : > { %3221 = vmatpush3.bf16.msra.mxu0 %v3218_v19 }
  0xe7   : > { %3223 = vmatprep.subr.bf16.mxu0 %v3222_v25 }
  0xe8   : > { %3237 = vmatpush3.bf16.msra.mxu1 %v3236_v26 }
  0xea   : > { %3225 = vmatpush3.bf16.msra.mxu0 %v3222_v25 }
  0xeb   : > { %3109 = vmatmul.mubr.msk.f32.vlgmr.msra.gmra.mrb[0].mxu1 %vm464_vm1, %v448_v27 }
  0xed   : > { %3090 = vmatmul.mubr.msk.f32.vlgmr.msra.gmra.mrb[0].mxu0 %vm464_vm1, %v447_v28 }
 0x1be   : > { %v630_v30 = vpop.f32.mrb[0].mxu1 }
 0x1bf   : > { %v4077_v32 = vadd.f32 %v2937_v29, %v630_v30  ;;  %v3110_v33 = vpop.f32.mrb[1].mxu1 }
 0x1c0   : > { %v3091_v34 = vpop.f32.mrb[0].mxu0 }
 0x1c1   : > { %839 = vrot.lane.b32.xlu1 %v4077_v32, %s3710_s9  ;;  %733 = vrot.lane.b32.xlu0 %v4077_v32, %s3711_s29  ;;  %v543_v35 = vadd.f32 %v3091_v34, %v2934_v31  ;;  %v537_v36 = vpop.f32.mrb[1].mxu0 }
 0x1c2   : > { %3111 = vmatprep.subr.msk.mxu0 %vm634_vm2, %v4077_v32  ;;  %v538_v37 = vadd.f32 %v2934_v31, %v537_v36 }
 0x1c3   : > { %3112 = vmatpush3.xpose.msk.msra.mxu0 %vm634_vm2, %v4077_v32 }
 0x1c4   : > { %3113 = vmatprep.mubr.msk.f32.mxu0 %vm634_vm2, %v538_v37 }
 0x1c5   : > { %945 = vrot.lane.b32.xlu0 %v4077_v32, %s3712_s19  ;;  %731 = vrot.lane.b32.xlu1 %v543_v35, %s3711_s29 }
 0x1c6   : > { %3114 = vmatmul.mubr.msk.f32.vlgmr.msra.gmra.mrb[2].mxu0 %vm634_vm2, %v543_v35 }
 0x1c9   : > { %1051 = vrot.lane.b32.xlu0 %v4077_v32, %s3713_s25  ;;  %943 = vrot.lane.b32.xlu1 %v543_v35, %s3712_s19 }
 0x1cd   : > { %1157 = vrot.lane.b32.xlu0 %v4077_v32, %s3714_s30  ;;  %1155 = vrot.lane.b32.xlu1 %v543_v35, %s3714_s30 }
 0x1d1   : > { %837 = vrot.lane.b32.xlu0 %v543_v35, %s3710_s9  ;;  %835 = vrot.lane.b32.xlu1 %v538_v37, %s3710_s9 }
 0x1d5   : > { %1049 = vrot.lane.b32.xlu0 %v543_v35, %s3713_s25  ;;  %941 = vrot.lane.b32.xlu1 %v538_v37, %s3712_s19 }
 0x1d9   : > { %1047 = vrot.lane.b32.xlu1 %v538_v37, %s3713_s25  ;;  %729 = vrot.lane.b32.xlu0 %v538_v37, %s3711_s29 }
 0x1dd   : > { %1153 = vrot.lane.b32.xlu1 %v538_v37, %s3714_s30  ;;  %1263 = vrot.lane.b32.xlu0 %v4077_v32, %s3715_s21 }
 0x1e1   : > { %1259 = vrot.lane.b32.xlu1 %v538_v37, %s3715_s21  ;;  %1369 = vrot.lane.b32.xlu0 %v4077_v32, %s3716_s23 }
 0x1e5   : > { %1365 = vrot.lane.b32.xlu1 %v538_v37, %s3716_s23  ;;  %1261 = vrot.lane.b32.xlu0 %v543_v35, %s3715_s21 }
 0x1e9   : > { %1367 = vrot.lane.b32.xlu0 %v543_v35, %s3716_s23 }
 0x233   : > { %v840_v38 = vpop.permute.xlu1 %839  ;;  %v734_v39 = vpop.permute.xlu0 %733 }
 0x234   : > { %3116 = vmatprep.subr.msk.mxu1 %vm634_vm2, %v734_v39  ;;  %3121 = vmatprep.subr.msk.mxu0 %vm634_vm2, %v840_v38 }
 0x235   : > { %3117 = vmatpush3.xpose.msk.msra.mxu1 %vm634_vm2, %v734_v39  ;;  %3122 = vmatpush3.xpose.msk.msra.mxu0 %vm634_vm2, %v840_v38 }
 0x237   : > { %v946_v40 = vpop.permute.xlu0 %945  ;;  %v732_v41 = vpop.permute.xlu1 %731 }
 0x238   : > { %3126 = vmatprep.subr.msk.mxu1 %vm634_vm2, %v946_v40 }
 0x23b   : > { %v1052_v42 = vpop.permute.xlu0 %1051  ;;  %v944_v43 = vpop.permute.xlu1 %943 }
 0x23c   : > { %3131 = vmatprep.subr.msk.mxu0 %vm634_vm2, %v1052_v42 }
 0x23f   : > { %v1158_v44 = vpop.permute.xlu0 %1157  ;;  %v1156_v45 = vpop.permute.xlu1 %1155 }
 0x243   : > { %v838_v46 = vpop.permute.xlu0 %837  ;;  %v836_v47 = vpop.permute.xlu1 %835 }
 0x244   : > { %3123 = vmatprep.mubr.msk.f32.mxu0 %vm634_vm2, %v836_v47 }
 0x245   : > { %3124 = vmatmul.mubr.msk.f32.vlgmr.msra.gmra.mrb[4].mxu0 %vm634_vm2, %v838_v46 }
 0x246   : > { %3132 = vmatpush3.xpose.msk.msra.mxu0 %vm634_vm2, %v1052_v42 }
 0x247   : > { %v1050_v48 = vpop.permute.xlu0 %1049  ;;  %v942_v49 = vpop.permute.xlu1 %941 }
 0x24b   : > { %v1048_v50 = vpop.permute.xlu1 %1047  ;;  %v730_v51 = vpop.permute.xlu0 %729 }
 0x24c   : > { %3118 = vmatprep.mubr.msk.f32.mxu1 %vm634_vm2, %v730_v51  ;;  %3133 = vmatprep.mubr.msk.f32.mxu0 %vm634_vm2, %v1048_v50  ;;  %v1479_v50 = vld [vmem:[#allocation13 + $0x10] sm:$0xff]  ;;  %v1480_v51 = vld [vmem:[#allocation13 + $0x18] sm:$0xff] }
 0x24d   : > { %3119 = vmatmul.mubr.msk.f32.vlgmr.msra.gmra.mrb[2].mxu1 %vm634_vm2, %v732_v41  ;;  %3134 = vmatmul.mubr.msk.f32.vlgmr.msra.gmra.mrb[6].mxu0 %vm634_vm2, %v1050_v48 }
 0x24e   : > { %3127 = vmatpush3.xpose.msk.msra.mxu1 %vm634_vm2, %v946_v40  ;;  %3128 = vmatprep.mubr.msk.f32.mxu1 %vm634_vm2, %v942_v49 }
 0x24f   : > { %3136 = vmatprep.subr.msk.mxu1 %vm634_vm2, %v1158_v44  ;;  %v1154_v52 = vpop.permute.xlu1 %1153  ;;  %v1264_v53 = vpop.permute.xlu0 %1263 }
 0x250   : > { %3141 = vmatprep.subr.msk.mxu0 %vm634_vm2, %v1264_v53 }
 0x251   : > { %3129 = vmatmul.mubr.msk.f32.vlgmr.msra.gmra.mrb[4].mxu1 %vm634_vm2, %v944_v43  ;;  %3142 = vmatpush3.xpose.msk.msra.mxu0 %vm634_vm2, %v1264_v53  ;;  %v1477_v43 = vld [vmem:[#allocation13] sm:$0xff] }
 0x252   : > { %3137 = vmatpush3.xpose.msk.msra.mxu1 %vm634_vm2, %v1158_v44  ;;  %3138 = vmatprep.mubr.msk.f32.mxu1 %vm634_vm2, %v1154_v52  ;;  %v1478_v44 = vld [vmem:[#allocation13 + $0x8] sm:$0xff]  ;;  %v3242_v52 = vpack.c.bf16 %v1480_v51, %v1479_v50 }
 0x253   : > { %v1260_v54 = vpop.permute.xlu1 %1259  ;;  %v1370_v55 = vpop.permute.xlu0 %1369 }
 0x254   : > { %3143 = vmatprep.mubr.msk.f32.mxu0 %vm634_vm2, %v1260_v54  ;;  %3146 = vmatprep.subr.msk.mxu1 %vm634_vm2, %v1370_v55 }
 0x255   : > { %3139 = vmatmul.mubr.msk.f32.vlgmr.msra.gmra.mrb[6].mxu1 %vm634_vm2, %v1156_v45  ;;  %v3238_v45 = vpack.c.bf16 %v1478_v44, %v1477_v43 }
 0x256   : > { %3147 = vmatpush3.xpose.msk.msra.mxu1 %vm634_vm2, %v1370_v55 }
 0x257   : > { %v1366_v56 = vpop.permute.xlu1 %1365  ;;  %v1262_v57 = vpop.permute.xlu0 %1261  ;;  %3239 = vmatprep.subr.bf16.mxu0 %v3238_v45 }
 0x258   : > { %3144 = vmatmul.mubr.msk.f32.vlgmr.msra.gmra.mrb[8].mxu0 %vm634_vm2, %v1262_v57  ;;  %3148 = vmatprep.mubr.msk.f32.mxu1 %vm634_vm2, %v1366_v56  ;;  %v1481_v57 = vld [vmem:[#allocation13 + $0x20] sm:$0xff] }
 0x259   : > { %3241 = vmatpush3.bf16.msra.mxu0 %v3238_v45 }
 0x25a   : > { %3243 = vmatprep.subr.bf16.mxu0 %v3242_v52 }
 0x25b   : > { %v1368_v58 = vpop.permute.xlu0 %1367 }
 0x25c   : > { %3149 = vmatmul.mubr.msk.f32.vlgmr.msra.gmra.mrb[8].mxu1 %vm634_vm2, %v1368_v58  ;;  %v1482_v58 = vld [vmem:[#allocation13 + $0x28] sm:$0xff] }
 0x25d   : > { %3245 = vmatpush3.bf16.msra.mxu0 %v3242_v52 }
 0x299   : > { %v4141_v59 = vpop.f32.mrb[2].mxu0 }
 0x29a   : > { %v4143_v60 = vpop.f32.mrb[3].mxu0  ;;  %v722_v26 = vsel %vm634_vm2, %v4141_v59, -inf }
 0x29b   : > { %v719_v27 = vsel %vm634_vm2, %v4143_v60, -inf }
 0x318   : > { %v3125_v61 = vpop.f32.mrb[4].mxu0 }
 0x319   : > { %v913_v62 = vpop.f32.mrb[5].mxu0  ;;  %v925_v63 = vsel %vm634_vm2, %v3125_v61, -inf }
 0x31a   : > { %926 = vmax.xlane.f32.xlu1 %v925_v63  ;;  %v922_v9 = vsel %vm634_vm2, %v913_v62, -inf }
 0x320   : > { %v3120_v0 = vpop.f32.mrb[2].mxu1  ;;  %v4146_v2 = vpop.f32.mrb[6].mxu0 }
 0x321   : > { %v807_v3 = vpop.f32.mrb[3].mxu1  ;;  %v4148_v4 = vpop.f32.mrb[7].mxu0  ;;  %v819_v5 = vsel %vm634_vm2, %v3120_v0, -inf  ;;  %v1137_v14 = vsel %vm634_vm2, %v4146_v2, -inf }
 0x322   : > { %820 = vmax.xlane.f32.xlu0 %v819_v5  ;;  %v816_v6 = vsel %vm634_vm2, %v807_v3, -inf  ;;  %v1134_v17 = vsel %vm634_vm2, %v4148_v4, -inf }
 0x323   : > { %817 = vmax.xlane.f32.xlu1 %v816_v6 }
 0x324   : > { %v3130_v7 = vpop.f32.mrb[4].mxu1 }
 0x325   : > { %v1019_v8 = vpop.f32.mrb[5].mxu1  ;;  %v1031_v10 = vsel %vm634_vm2, %v3130_v7, -inf }
 0x326   : > { %923 = vmax.xlane.f32.xlu0 %v922_v9  ;;  %v1028_v13 = vsel %vm634_vm2, %v1019_v8, -inf }
 0x327   : > { %1032 = vmax.xlane.f32.xlu1 %v1031_v10 }
 0x328   : > { %v4154_v11 = vpop.f32.mrb[6].mxu1 }
 0x329   : > { %v4156_v12 = vpop.f32.mrb[7].mxu1  ;;  %v1243_v18 = vsel %vm634_vm2, %v4154_v11, -inf }
 0x32a   : > { %1029 = vmax.xlane.f32.xlu0 %v1028_v13  ;;  %v1240_v21 = vsel %vm634_vm2, %v4156_v12, -inf }
 0x32b   : > { %1138 = vmax.xlane.f32.xlu1 %v1137_v14  ;;  %v4161_v15 = vpop.f32.mrb[8].mxu0 }
 0x32c   : > { %v4163_v16 = vpop.f32.mrb[9].mxu0  ;;  %v1349_v22 = vsel %vm634_vm2, %v4161_v15, -inf }
 0x32d   : > { %v1346_v23 = vsel %vm634_vm2, %v4163_v16, -inf }
 0x32e   : > { %1135 = vmax.xlane.f32.xlu0 %v1134_v17 }
 0x32f   : > { %v4169_v19 = vpop.f32.mrb[8].mxu1  ;;  %1244 = vmax.xlane.f32.xlu1 %v1243_v18 }
 0x330   : > { %v4171_v20 = vpop.f32.mrb[9].mxu1  ;;  %v1455_v24 = vsel %vm634_vm2, %v4169_v19, -inf }
 0x331   : > { %v1452_v25 = vsel %vm634_vm2, %v4171_v20, -inf }
 0x332   : > { %1241 = vmax.xlane.f32.xlu0 %v1240_v21 }
 0x333   : > { %1350 = vmax.xlane.f32.xlu1 %v1349_v22 }
 0x336   : > { %1347 = vmax.xlane.f32.xlu0 %v1346_v23 }
 0x337   : > { %1456 = vmax.xlane.f32.xlu1 %v1455_v24 }
 0x33a   : > { %1453 = vmax.xlane.f32.xlu0 %v1452_v25 }
 0x33b   : > { %723 = vmax.xlane.f32.xlu1 %v722_v26 }
 0x33e   : > { %720 = vmax.xlane.f32.xlu0 %v719_v27 }
 0x3a7   : > { %v927_v28 = vpop.xlane.xlu1 %926 }
 0x3a8   : > { %v929_v29 = vsub.f32 %v3125_v61, %v927_v28  ;;  %v3246_v61 = vpack.c.bf16 %v1482_v58, %v1481_v57 }
 0x3aa   : > { %934 = vrot.lane.b32.xlu0 %v929_v29, %s3717_s20  ;;  %3247 = vmatprep.subr.bf16.mxu0 %v3246_v61 }
 0x3ab   : > { %3249 = vmatpush3.bf16.msra.mxu0 %v3246_v61 }
 0x3af   : > { %v821_v30 = vpop.xlane.xlu0 %820 }
 0x3b0   : > { %v823_v31 = vsub.f32 %v3120_v0, %v821_v30  ;;  %v818_v33 = vpop.xlane.xlu1 %817 }
 0x3b1   : > { %v822_v34 = vsub.f32 %v807_v3, %v818_v33  ;;  %v1483_v3 = vld [vmem:[#allocation13 + $0x30] sm:$0xff] }
 0x3b2   : > { %828 = vrot.lane.b32.xlu1 %v823_v31, %s3718_s28 }
 0x3b3   : > { %v924_v35 = vpop.xlane.xlu0 %923  ;;  %826 = vrot.lane.b32.xlu0 %v822_v34, %s3718_s28 }
 0x3b4   : > { %v928_v36 = vsub.f32 %v913_v62, %v924_v35  ;;  %v1033_v37 = vpop.xlane.xlu1 %1032 }
 0x3b5   : > { %v1035_v38 = vsub.f32 %v3130_v7, %v1033_v37 }
 0x3b6   : > { %932 = vrot.lane.b32.xlu1 %v928_v36, %s3717_s20 }
 0x3b7   : > { %v1030_v39 = vpop.xlane.xlu0 %1029  ;;  %1040 = vrot.lane.b32.xlu0 %v1035_v38, %s3719_s4 }
 0x3b8   : > { %v1034_v40 = vsub.f32 %v1019_v8, %v1030_v39  ;;  %v1139_v41 = vpop.xlane.xlu1 %1138 }
 0x3b9   : > { %v1141_v42 = vsub.f32 %v4146_v2, %v1139_v41 }
 0x3ba   : > { %1038 = vrot.lane.b32.xlu1 %v1034_v40, %s3719_s4 }
 0x3bb   : > { %v1136_v46 = vpop.xlane.xlu0 %1135  ;;  %1146 = vrot.lane.b32.xlu0 %v1141_v42, %s3720_s0 }
 0x3bc   : > { %v1140_v47 = vsub.f32 %v4148_v4, %v1136_v46  ;;  %v1245_v48 = vpop.xlane.xlu1 %1244  ;;  %v1484_v4 = vld [vmem:[#allocation13 + $0x38] sm:$0xff] }
 0x3bd   : > { %v1247_v49 = vsub.f32 %v4154_v11, %v1245_v48  ;;  %v3250_v5 = vpack.c.bf16 %v1484_v4, %v1483_v3  ;;  %v2333_v3 = vld [vmem:[#allocation12 + $0x18] sm:$0xff] }
 0x3be   : > { %1144 = vrot.lane.b32.xlu1 %v1140_v47, %s3720_s0 }
 0x3bf   : > { %v1242_v53 = vpop.xlane.xlu0 %1241  ;;  %1252 = vrot.lane.b32.xlu0 %v1247_v49, %s3721_s17  ;;  %3251 = vmatprep.subr.bf16.mxu0 %v3250_v5 }
 0x3c0   : > { %v1246_v54 = vsub.f32 %v4156_v12, %v1242_v53  ;;  %v1351_v55 = vpop.xlane.xlu1 %1350  ;;  %3253 = vmatpush3.bf16.msra.mxu0 %v3250_v5  ;;  %v2341_v5 = vld [vmem:[#allocation12 + $0x58] sm:$0xff] }
 0x3c1   : > { %v1353_v56 = vsub.f32 %v4161_v15, %v1351_v55 }
 0x3c2   : > { %1250 = vrot.lane.b32.xlu1 %v1246_v54, %s3721_s17 }
 0x3c3   : > { %v1348_v62 = vpop.xlane.xlu0 %1347  ;;  %1358 = vrot.lane.b32.xlu0 %v1353_v56, %s3722_s26 }
 0x3c4   : > { %v1352_v63 = vsub.f32 %v4163_v16, %v1348_v62  ;;  %v1457_v0 = vpop.xlane.xlu1 %1456 }
 0x3c5   : > { %v1459_v2 = vsub.f32 %v4169_v19, %v1457_v0  ;;  %v2331_v0 = vld [vmem:[#allocation12 + $0x8] sm:$0xff] }
 0x3c6   : > { %1356 = vrot.lane.b32.xlu1 %v1352_v63, %s3722_s26 }
 0x3c7   : > { %v1454_v6 = vpop.xlane.xlu0 %1453  ;;  %1464 = vrot.lane.b32.xlu0 %v1459_v2, %s3723_s24  ;;  %v2339_v2 = vld [vmem:[#allocation12 + $0x48] sm:$0xff] }
 0x3c8   : > { %v1458_v7 = vsub.f32 %v4171_v20, %v1454_v6  ;;  %v724_v8 = vpop.xlane.xlu1 %723  ;;  %v3254_v4 = vpack.c.bf16 %v2339_v2, %v2331_v0  ;;  %v2330_v6 = vld [vmem:[#allocation12] sm:$0xff] }
 0x3c9   : > { %v726_v9 = vsub.f32 %v4141_v59, %v724_v8  ;;  %v3270_v8 = vpack.c.bf16 %v2341_v5, %v2333_v3 }
 0x3ca   : > { %1462 = vrot.lane.b32.xlu1 %v1458_v7, %s3723_s24  ;;  %v2338_v7 = vld [vmem:[#allocation12 + $0x40] sm:$0xff] }
 0x3cb   : > { %728 = vst.msk [vmem:[#allocation2 + $0x8] sm:$0xff] %vm634_vm2, %v726_v9  ;;  %1660 = vrot.lane.b32.xlu0 %v4077_v32, %s3723_s24  ;;  %v721_v10 = vpop.xlane.xlu0 %720  ;;  %v3256_v9 = vpack.c.bf16 %v2338_v7, %v2330_v6 }
 0x3cc   : > { %v725_v11 = vsub.f32 %v4143_v60, %v721_v10  ;;  %v2332_v10 = vld [vmem:[#allocation12 + $0x10] sm:$0xff] }
 0x3ce   : > { %727 = vst.msk [vmem:[#allocation2] sm:$0xff] %vm634_vm2, %v725_v11  ;;  %1570 = vrot.lane.b32.xlu1 %v4077_v32, %s3724_s15  ;;  %v2340_v11 = vld [vmem:[#allocation12 + $0x50] sm:$0xff] }
 0x3cf   : > { %1852 = vrot.lane.b32.xlu0 %v4077_v32, %s3721_s17 }
 0x3d2   : > { %1756 = vrot.lane.b32.xlu1 %v4077_v32, %s3722_s26 }
 0x3d6   : > { %1948 = vrot.lane.b32.xlu1 %v4077_v32, %s3720_s0 }
 0x3da   : > { %2044 = vrot.lane.b32.xlu1 %v4077_v32, %s3719_s4 }
 0x3de   : > { %2140 = vrot.lane.b32.xlu1 %v4077_v32, %s3717_s20 }
 0x41c   : > { %v935_v59 = vpop.permute.xlu0 %934 }
 0x424   : > { %v829_v60 = vpop.permute.xlu1 %828 }
 0x425   : > { %834 = vst.msk [vmem:[#allocation2 + $0x8] sm:$0xff] %vm832_vm3, %v829_v60  ;;  %v827_v12 = vpop.permute.xlu0 %826 }
 0x426   : > { %833 = vst.msk [vmem:[#allocation2] sm:$0xff] %vm832_vm3, %v827_v12  ;;  %v2347_v12 = vld [vmem:[#allocation12 + $0x88] sm:$0xff] }
 0x427   : > { %940 = vst.msk [vmem:[#allocation2 + $0x8] sm:$0xff] %vm938_vm4, %v935_v59  ;;  %v3272_v59 = vpack.c.bf16 %v2340_v11, %v2332_v10 }
 0x428   : > { %v933_v13 = vpop.permute.xlu1 %932 }
 0x429   : > { %939 = vst.msk [vmem:[#allocation2] sm:$0xff] %vm938_vm4, %v933_v13  ;;  %v1041_v14 = vpop.permute.xlu0 %1040  ;;  %v2355_v13 = vld [vmem:[#allocation12 + $0xc8] sm:$0xff] }
 0x42a   : > { %1046 = vst.msk [vmem:[#allocation2 + $0x8] sm:$0xff] %vm1044_vm5, %v1041_v14  ;;  %v2349_v14 = vld [vmem:[#allocation12 + $0x98] sm:$0xff] }
 0x42c   : > { %v1039_v15 = vpop.permute.xlu1 %1038 }
 0x42d   : > { %1045 = vst.msk [vmem:[#allocation2] sm:$0xff] %vm1044_vm5, %v1039_v15  ;;  %v1147_v16 = vpop.permute.xlu0 %1146 }
 0x42e   : > { %1152 = vst.msk [vmem:[#allocation2 + $0x8] sm:$0xff] %vm1150_vm6, %v1147_v16  ;;  %v3258_v16 = vpack.c.bf16 %v2355_v13, %v2347_v12  ;;  %v2342_v12 = vld [vmem:[#allocation12 + $0x60] sm:$0xff] }
 0x430   : > { %v1145_v17 = vpop.permute.xlu1 %1144 }
 0x431   : > { %1151 = vst.msk [vmem:[#allocation2] sm:$0xff] %vm1150_vm6, %v1145_v17  ;;  %v1253_v18 = vpop.permute.xlu0 %1252  ;;  %v2357_v17 = vld [vmem:[#allocation12 + $0xd8] sm:$0xff] }
 0x432   : > { %1258 = vst.msk [vmem:[#allocation2 + $0x8] sm:$0xff] %vm1256_vm7, %v1253_v18  ;;  %v2346_v18 = vld [vmem:[#allocation12 + $0x80] sm:$0xff] }
 0x434   : > { %v1251_v19 = vpop.permute.xlu1 %1250 }
 0x435   : > { %1257 = vst.msk [vmem:[#allocation2] sm:$0xff] %vm1256_vm7, %v1251_v19  ;;  %v1359_v20 = vpop.permute.xlu0 %1358  ;;  %v2354_v19 = vld [vmem:[#allocation12 + $0xc0] sm:$0xff] }
 0x436   : > { %1364 = vst.msk [vmem:[#allocation2 + $0x8] sm:$0xff] %vm1362_vm8, %v1359_v20  ;;  %v3274_v20 = vpack.c.bf16 %v2357_v17, %v2349_v14  ;;  %v2336_v14 = vld [vmem:[#allocation12 + $0x30] sm:$0xff]  ;;  %v2359_v17 = vld [vmem:[#allocation12 + $0xe8] sm:$0xff] }
 0x438   : > { %v1357_v21 = vpop.permute.xlu1 %1356 }
 0x439   : > { %1363 = vst.msk [vmem:[#allocation2] sm:$0xff] %vm1362_vm8, %v1357_v21  ;;  %v1465_v22 = vpop.permute.xlu0 %1464  ;;  %v3260_v21 = vpack.c.bf16 %v2354_v19, %v2346_v18  ;;  %v2353_v18 = vld [vmem:[#allocation12 + $0xb8] sm:$0xff] }
 0x43a   : > { %1470 = vst.msk [vmem:[#allocation2 + $0x8] sm:$0xff] %vm1468_vm9, %v1465_v22  ;;  %v2348_v22 = vld [vmem:[#allocation12 + $0x90] sm:$0xff]  ;;  %v2361_v19 = vld [vmem:[#allocation12 + $0xf8] sm:$0xff] }
 0x43c   : > { %v1463_v23 = vpop.permute.xlu1 %1462 }
 0x43d   : > { %1469 = vst.msk [vmem:[#allocation2] sm:$0xff] %vm1468_vm9, %v1463_v23  ;;  %v1661_v26 = vpop.permute.xlu0 %1660  ;;  %v2356_v23 = vld [vmem:[#allocation12 + $0xd0] sm:$0xff] }
 0x440   : > { %v1571_v24 = vpop.permute.xlu1 %1570 }
 0x441   : > { %v1472_v25 = vld [vmem:[#allocation2 + $0x8] sm:$0xff]  ;;  %3170 = vmatprep.subr.mxu1 %v1571_v24  ;;  %v1853_v43 = vpop.permute.xlu0 %1852 }
 0x442   : > { %3171 = vmatpush3.msra.mxu1 %v1571_v24  ;;  %v1475_v27 = vmul.f32 1.442695, %v1472_v25  ;;  %v3276_v24 = vpack.c.bf16 %v2356_v23, %v2348_v22  ;;  %v2350_v23 = vld [vmem:[#allocation12 + $0xa0] sm:$0xff] }
 0x443   : > { %3175 = vmatprep.subr.mxu1 %v1661_v26 }
 0x444   : > { %v1471_v28 = vld [vmem:[#allocation2] sm:$0xff]  ;;  %v1757_v29 = vpop.permute.xlu1 %1756 }
 0x445   : > { %v1473_v30 = vmul.f32 1.442695, %v1471_v28  ;;  %v2365_v28 = vld [vmem:[#allocation12 + $0x118] sm:$0xff] }
 0x447   : > { %3433 = vpow2.f32 %v1473_v30 }
 0x448   : > { %3435 = vpow2.f32 %v1475_v27  ;;  %v1949_v31 = vpop.permute.xlu1 %1948  ;;  %v2371_v27 = vld [vmem:[#allocation12 + $0x148] sm:$0xff] }
 0x449   : > { %3190 = vmatprep.subr.mxu0 %v1949_v31 }
 0x44c   : > { %v2045_v33 = vpop.permute.xlu1 %2044 }
 0x450   : > { %v2141_v36 = vpop.permute.xlu1 %2140 }
 0x451   : > { %v3434_v34 = vpop.eup %3433 }
 0x452   : > { %v3436_v35 = vpop.eup %3435  ;;  %3167 = vmatprep.mubr.msk.f32.mxu0 %vm464_vm1, %v3434_v34 }
 0x453   : > { %3168 = vmatmul.mubr.msk.f32.vlgmr.msra.gmra.mrb[10].mxu0 %vm464_vm1, %v3436_v35 }
 0x454   : > { %3191 = vmatpush3.msra.mxu0 %v1949_v31  ;;  %v2373_v31 = vld [vmem:[#allocation12 + $0x158] sm:$0xff] }
 0x455   : > { %3200 = vmatprep.subr.mxu0 %v2141_v36 }
 0x526   : > { %v3169_v37 = vpop.f32.mrb[10].mxu0 }
 0x527   : > { %3437 = vrcp.f32 %v3169_v37  ;;  %v1557_v38 = vpop.f32.mrb[11].mxu0  ;;  %v2364_v37 = vld [vmem:[#allocation12 + $0x110] sm:$0xff] }
 0x528   : > { %3439 = vrcp.f32 %v1557_v38  ;;  %v2372_v38 = vld [vmem:[#allocation12 + $0x150] sm:$0xff] }
 0x531   : > { %v3438_v39 = vpop.eup %3437 }
 0x532   : > { %v3440_v40 = vpop.eup %3439  ;;  %v1569_v41 = vmul.f32 %v3438_v39, %v3436_v35  ;;  %v3278_v35 = vpack.c.bf16 %v2373_v31, %v2365_v28  ;;  %v3280_v39 = vpack.c.bf16 %v2372_v38, %v2364_v37  ;;  %v3306_v28 = vpack.c.bf16 %v2361_v19, %v2353_v18  ;;  %v2375_v31 = vld [vmem:[#allocation12 + $0x168] sm:$0xff] }
 0x533   : > { %v1567_v42 = vmul.f32 %v3440_v40, %v3434_v34  ;;  %v2370_v34 = vld [vmem:[#allocation12 + $0x140] sm:$0xff] }
 0x534   : > { %1754 = vrot.lane.b32.xlu1 %v1569_v41, %s3710_s9  ;;  %1658 = vrot.lane.b32.xlu0 %v1569_v41, %s3711_s29 }
 0x535   : > { %3172 = vmatprep.mubr.msk.f32.mxu1 %vm634_vm2, %v1567_v42 }
 0x536   : > { %3173 = vmatmul.mubr.msk.f32.vlgmr.msra.gmra.mrb[10].mxu1 %vm634_vm2, %v1569_v41 }
 0x537   : > { %3176 = vmatpush3.msra.mxu1 %v1661_v26  ;;  %v2363_v26 = vld [vmem:[#allocation12 + $0x108] sm:$0xff] }
 0x538   : > { %3180 = vmatprep.subr.mxu1 %v1757_v29  ;;  %1850 = vrot.lane.b32.xlu0 %v1569_v41, %s3712_s19  ;;  %v3262_v30 = vpack.c.bf16 %v2371_v27, %v2363_v26 }
 0x539   : > { %1656 = vrot.lane.b32.xlu1 %v1567_v42, %s3711_s29  ;;  %s2995_s29 = sshll.u32 %s3798_s13, 11  ;;  %s4449_s13 = sld [smem:[#allocation28_spill]] }
 0x53c   : > { %1946 = vrot.lane.b32.xlu0 %v1569_v41, %s3713_s25 }
 0x53d   : > { %2236 = vrot.lane.b32.xlu1 %v4077_v32, %s3718_s28 }
 0x540   : > { %2042 = vrot.lane.b32.xlu0 %v1569_v41, %s3714_s30 }
 0x541   : > { %1848 = vrot.lane.b32.xlu1 %v1567_v42, %s3712_s19 }
 0x544   : > { %1752 = vrot.lane.b32.xlu0 %v1567_v42, %s3710_s9  ;;  %s4328_s9 = scalar_lea.vmem [#allocation15], %s2933_s22 }
 0x545   : > { %2040 = vrot.lane.b32.xlu1 %v1567_v42, %s3714_s30  ;;  %s2780_s19 = sshll.u32 %s4328_s9, 4  ;;  %s4349_s19 = int_to_ptr.vmem [resolvable:$true] %s2780_s19 }
 0x548   : > { %2138 = vrot.lane.b32.xlu0 %v1569_v41, %s3715_s21 }
 0x549   : > { %2232 = vrot.lane.b32.xlu1 %v1567_v42, %s3716_s23 }
 0x54c   : > { %1944 = vrot.lane.b32.xlu0 %v1567_v42, %s3713_s25 }
 0x550   : > { %2136 = vrot.lane.b32.xlu0 %v1567_v42, %s3715_s21  ;;  %v2379_v42 = vld [vmem:[#allocation12 + $0x188] sm:$0xff]  ;;  %s4347_s21 = scalar_lea.hbm %s4449_s13, %s2995_s29 }
 0x554   : > { %2234 = vrot.lane.b32.xlu0 %v1569_v41, %s3716_s23  ;;  %s2767_s23 = scalar_lea.sflag [#allocation6], %s4034_s6 }
 0x5a6   : > { %v1755_v32 = vpop.permute.xlu1 %1754  ;;  %v1659_v44 = vpop.permute.xlu0 %1658 }
 0x5aa   : > { %v1851_v45 = vpop.permute.xlu0 %1850 }
 0x5ab   : > { %v1657_v46 = vpop.permute.xlu1 %1656 }
 0x5ac   : > { %3177 = vmatprep.mubr.msk.f32.mxu1 %vm634_vm2, %v1657_v46 }
 0x5ad   : > { %3178 = vmatmul.mubr.msk.f32.vlgmr.msra.gmra.mrb[12].mxu1 %vm634_vm2, %v1659_v44 }
 0x5ae   : > { %3181 = vmatpush3.msra.mxu1 %v1757_v29  ;;  %v1947_v47 = vpop.permute.xlu0 %1946 }
 0x5af   : > { %3185 = vmatprep.subr.mxu1 %v1853_v43  ;;  %v2237_v48 = vpop.permute.xlu1 %2236 }
 0x5b2   : > { %v2043_v49 = vpop.permute.xlu0 %2042 }
 0x5b3   : > { %v1849_v50 = vpop.permute.xlu1 %1848 }
 0x5b6   : > { %v1753_v51 = vpop.permute.xlu0 %1752 }
 0x5b7   : > { %3182 = vmatprep.mubr.msk.f32.mxu1 %vm634_vm2, %v1753_v51  ;;  %v2041_v53 = vpop.permute.xlu1 %2040 }
 0x5b8   : > { %3183 = vmatmul.mubr.msk.f32.vlgmr.msra.gmra.mrb[14].mxu1 %vm634_vm2, %v1755_v32  ;;  %v2381_v32 = vld [vmem:[#allocation12 + $0x198] sm:$0xff] }
 0x5b9   : > { %3186 = vmatpush3.msra.mxu1 %v1853_v43  ;;  %3187 = vmatprep.mubr.msk.f32.mxu1 %vm634_vm2, %v1849_v50  ;;  %v2387_v43 = vld [vmem:[#allocation12 + $0x1c8] sm:$0xff] }
 0x5ba   : > { %3195 = vmatprep.subr.mxu1 %v2045_v33  ;;  %v2139_v52 = vpop.permute.xlu0 %2138  ;;  %v3266_v46 = vpack.c.bf16 %v2387_v43, %v2379_v42 }
 0x5bb   : > { %v2233_v55 = vpop.permute.xlu1 %2232 }
 0x5bc   : > { %3188 = vmatmul.mubr.msk.f32.vlgmr.msra.gmra.mrb[16].mxu1 %vm634_vm2, %v1851_v45 }
 0x5bd   : > { %3196 = vmatpush3.msra.mxu1 %v2045_v33  ;;  %3197 = vmatprep.mubr.msk.f32.mxu1 %vm634_vm2, %v2041_v53  ;;  %v2362_v33 = vld [vmem:[#allocation12 + $0x100] sm:$0xff]  ;;  %v2388_v53 = vld [vmem:[#allocation12 + $0x1d0] sm:$0xff] }
 0x5be   : > { %3205 = vmatprep.subr.mxu1 %v2237_v48  ;;  %v1945_v54 = vpop.permute.xlu0 %1944 }
 0x5bf   : > { %3192 = vmatprep.mubr.msk.f32.mxu0 %vm634_vm2, %v1945_v54 }
 0x5c0   : > { %3193 = vmatmul.mubr.msk.f32.vlgmr.msra.gmra.mrb[12].mxu0 %vm634_vm2, %v1947_v47  ;;  %3198 = vmatmul.mubr.msk.f32.vlgmr.msra.gmra.mrb[18].mxu1 %vm634_vm2, %v2043_v49  ;;  %v2389_v47 = vld [vmem:[#allocation12 + $0x1d8] sm:$0xff]  ;;  %v2386_v49 = vld [vmem:[#allocation12 + $0x1c0] sm:$0xff] }
 0x5c1   : > { %3201 = vmatpush3.msra.mxu0 %v2141_v36  ;;  %3206 = vmatpush3.msra.mxu1 %v2237_v48  ;;  %v3264_v36 = vpack.c.bf16 %v2370_v34, %v2362_v33  ;;  %v2378_v48 = vld [vmem:[#allocation12 + $0x180] sm:$0xff]  ;;  %v3282_v50 = vpack.c.bf16 %v2389_v47, %v2381_v32  ;;  %v2369_v34 = vld [vmem:[#allocation12 + $0x138] sm:$0xff]  ;;  %v2368_v32 = vld [vmem:[#allocation12 + $0x130] sm:$0xff] }
 0x5c2   : > { %3207 = vmatprep.mubr.msk.f32.mxu1 %vm634_vm2, %v2233_v55  ;;  %v2137_v56 = vpop.permute.xlu0 %2136  ;;  %3255 = vmatprep.subr.bf16.mxu0 %v3254_v4  ;;  %v3268_v51 = vpack.c.bf16 %v2386_v49, %v2378_v48  ;;  %v2385_v47 = vld [vmem:[#allocation12 + $0x1b8] sm:$0xff] }
 0x5c3   : > { %3202 = vmatprep.mubr.msk.f32.mxu0 %vm634_vm2, %v2137_v56  ;;  %3271 = vmatprep.subr.bf16.mxu1 %v3270_v8  ;;  %v2335_v56 = vld [vmem:[#allocation12 + $0x28] sm:$0xff]  ;;  %v2393_v48 = vld [vmem:[#allocation12 + $0x1f8] sm:$0xff] }
 0x5c4   : > { %3203 = vmatmul.mubr.msk.f32.vlgmr.msra.gmra.mrb[14].mxu0 %vm634_vm2, %v2139_v52  ;;  %v2380_v52 = vld [vmem:[#allocation12 + $0x190] sm:$0xff] }
 0x5c5   : > { %2506 = vmatprep.mubr.f32.mxu0 %v3709_v1  ;;  %3257 = vmatpush1.bf16.msra.mxu0 %v3256_v9  ;;  %v3284_v54 = vpack.c.bf16 %v2388_v53, %v2380_v52  ;;  %v3314_v53 = vpack.c.bf16 %v2393_v48, %v2385_v47 }
 0x5c6   : > { %v2235_v57 = vpop.permute.xlu0 %2234  ;;  %3259 = vmatprep.subr.bf16.mxu0 %v3258_v16  ;;  %v2351_v16 = vld [vmem:[#allocation12 + $0xa8] sm:$0xff] }
 0x5c7   : > { %3208 = vmatmul.mubr.msk.f32.vlgmr.msra.gmra.mrb[20].mxu1 %vm634_vm2, %v2235_v57  ;;  %v2343_v57 = vld [vmem:[#allocation12 + $0x68] sm:$0xff]  ;;  %v3290_v27 = vpack.c.bf16 %v2359_v17, %v2351_v16 }
 0x5c8   : > { %2583 = vmatprep.mubr.f32.mxu1 %v3709_v1  ;;  %3273 = vmatpush1.bf16.msra.mxu1 %v3272_v59 }
 0x5c9   : > { %3275 = vmatprep.subr.bf16.mxu1 %v3274_v20  ;;  %3261 = vmatpush1.bf16.msra.mxu0 %v3260_v21 }
 0x5ca   : > { %3263 = vmatprep.subr.bf16.mxu0 %v3262_v30  ;;  %v2367_v30 = vld [vmem:[#allocation12 + $0x128] sm:$0xff] }
 0x5cb   : > { %v3294_v42 = vpack.c.bf16 %v2375_v31, %v2367_v30 }
 0x5cc   : > { %3277 = vmatpush1.bf16.msra.mxu1 %v3276_v24  ;;  %v2358_v24 = vld [vmem:[#allocation12 + $0xe0] sm:$0xff] }
 0x5cd   : > { %3279 = vmatprep.subr.bf16.mxu1 %v3278_v35  ;;  %3265 = vmatpush1.bf16.msra.mxu0 %v3264_v36  ;;  %v2377_v35 = vld [vmem:[#allocation12 + $0x178] sm:$0xff]  ;;  %v3292_v37 = vpack.c.bf16 %v2358_v24, %v2350_v23 }
 0x5ce   : > { %3267 = vmatprep.subr.bf16.mxu0 %v3266_v46  ;;  %v3310_v43 = vpack.c.bf16 %v2377_v35, %v2369_v34  ;;  %v2391_v46 = vld [vmem:[#allocation12 + $0x1e8] sm:$0xff] }
 0x5d0   : > { %3281 = vmatpush1.bf16.msra.mxu1 %v3280_v39  ;;  %v2366_v39 = vld [vmem:[#allocation12 + $0x120] sm:$0xff] }
 0x5d1   : > { %3283 = vmatprep.subr.bf16.mxu1 %v3282_v50  ;;  %3269 = vmatpush1.bf16.msra.mxu0 %v3268_v51  ;;  %v2382_v51 = vld [vmem:[#allocation12 + $0x1a0] sm:$0xff] }
 0x5d4   : > { %3285 = vmatpush1.bf16.msra.mxu1 %v3284_v54  ;;  %v2390_v54 = vld [vmem:[#allocation12 + $0x1e0] sm:$0xff] }
 0x609   : > { %v3174_v58 = vpop.f32.mrb[10].mxu1 }
 0x60a   : > { %1655 = vst.msk [vmem:[#allocation3 + $0x8] sm:$0xff] %vm634_vm2, %v3174_v58  ;;  %v1645_v61 = vpop.f32.mrb[11].mxu1  ;;  %v2337_v58 = vld [vmem:[#allocation12 + $0x38] sm:$0xff] }
 0x60b   : > { %1654 = vst.msk [vmem:[#allocation3] sm:$0xff] %vm634_vm2, %v1645_v61 }
 0x680   : > { %v3179_v62 = vpop.f32.mrb[12].mxu1 }
 0x681   : > { %1746 = vrot.lane.b32.xlu0 %v3179_v62, %s3718_s28  ;;  %v1733_v63 = vpop.f32.mrb[13].mxu1  ;;  %v3286_v62 = vpack.c.bf16 %v2343_v57, %v2335_v56  ;;  %v2392_v56 = vld [vmem:[#allocation12 + $0x1f0] sm:$0xff]  ;;  %v3300_v57 = vpack.c.bf16 %v2390_v54, %v2382_v51 }
 0x682   : > { %1744 = vrot.lane.b32.xlu1 %v1733_v63, %s3718_s28  ;;  %v2345_v63 = vld [vmem:[#allocation12 + $0x78] sm:$0xff]  ;;  %s3725_s28 = smov [#allocation15]  }
 0x683   : > { %v3302_v0 = vpack.c.bf16 %v2345_v63, %v2337_v58  ;;  %3287 = vmatprep.subr.bf16.mxu0 %v3286_v62  ;;  %v2396_v62 = vlaneseq }
 0x685   : > { %3303 = vmatprep.subr.bf16.mxu1 %v3302_v0  ;;  %v2397_v63 = vshrl.u32 %v2396_v62, 7 }
 0x687   : > { %v2398_v0 = vsub.s32 0, %v2397_v63  ;;  %v2422_v16 = vsub.s32 6, %v2397_v63  ;;  %v2418_v17 = vsub.s32 5, %v2397_v63  ;;  %v2426_v18 = vsub.s32 7, %v2397_v63 }
 0x68b   : > { %v4281_v60 = vpop.f32.mrb[14].mxu1 }
 0x68c   : > { %v1829_v15 = vpop.f32.mrb[15].mxu1 }
 0x68f   : > { %v3189_v25 = vpop.f32.mrb[16].mxu1 }
 0x690   : > { %v1925_v29 = vpop.f32.mrb[17].mxu1 }
 0x691   : > { %1936 = vrot.lane.b32.xlu1 %v1925_v29, %s3719_s4  ;;  %v2360_v29 = vld [vmem:[#allocation12 + $0xf0] sm:$0xff] }
 0x693   : > { %v3194_v40 = vpop.f32.mrb[12].mxu0  ;;  %v3199_v41 = vpop.f32.mrb[18].mxu1 }
 0x694   : > { %v2021_v44 = vpop.f32.mrb[13].mxu0  ;;  %v2117_v45 = vpop.f32.mrb[19].mxu1 }
 0x695   : > { %2128 = vrot.lane.b32.xlu1 %v2117_v45, %s3721_s17  ;;  %2032 = vrot.lane.b32.xlu0 %v2021_v44, %s3720_s0  ;;  %v2376_v44 = vld [vmem:[#allocation12 + $0x170] sm:$0xff]  ;;  %v2383_v45 = vld [vmem:[#allocation12 + $0x1a8] sm:$0xff] }
 0x696   : > { %v3312_v50 = vpack.c.bf16 %v2376_v44, %v2368_v32  ;;  %v3298_v52 = vpack.c.bf16 %v2391_v46, %v2383_v45 }
 0x697   : > { %v3204_v55 = vpop.f32.mrb[14].mxu0 }
 0x698   : > { %v2213_v61 = vpop.f32.mrb[15].mxu0 }
 0x699   : > { %1840 = vrot.lane.b32.xlu0 %v1829_v15, %s3717_s20  ;;  %v2344_v15 = vld [vmem:[#allocation12 + $0x70] sm:$0xff] }
 0x69a   : > { %v3209_v2 = vpop.f32.mrb[20].mxu1  ;;  %v3304_v22 = vpack.c.bf16 %v2344_v15, %v2336_v14  ;;  %v2414_v15 = vsub.s32 4, %v2397_v63 }
 0x69b   : > { %v2309_v3 = vpop.f32.mrb[21].mxu1 }
 0x69c   : > { %2320 = vrot.lane.b32.xlu1 %v2309_v3, %s3723_s24  ;;  %v2394_v3 = vld [vmem:[%s4405_s7] sm:$0xff] }
 0x69d   : > { %2224 = vrot.lane.b32.xlu0 %v2213_v61, %s3722_s26  ;;  %v2427_v30 = vrot.slane %v2394_v3, %v2426_v18 }
 0x6a0   : > { %1842 = vrot.lane.b32.xlu1 %v4281_v60, %s3717_s20  ;;  %v2334_v60 = vld [vmem:[#allocation12 + $0x20] sm:$0xff]  ;;  %s3613_s20 = scalar_lea.vmem %s4349_s19, 2048 }
 0x6a1   : > { %1938 = vrot.lane.b32.xlu0 %v3189_v25, %s3719_s4  ;;  %v3288_v21 = vpack.c.bf16 %v2342_v12, %v2334_v60  ;;  %v2352_v25 = vld [vmem:[#allocation12 + $0xb0] sm:$0xff]  ;;  %p3614_p2 = scmp.ne.s32.totalorder %s4349_s19, %s3613_s20  ;;  %s3617_s4 = sshll.u32 %s3725_s28, 4  ;;  %s3618_s4 = int_to_ptr.vmem [resolvable:$false] %s3617_s4 }
 0x6a2   : > { %v3308_v38 = vpack.c.bf16 %v2360_v29, %v2352_v25  ;;  %v2419_v29 = vrot.slane %v2394_v3, %v2418_v17  ;;  %p3620_p3 = scmp.lt.s32.totalorder %s4349_s19, %s3618_s4 }
 0x6a3   : > { %p3615_p0 = pnand %p3614_p2, %p4450_p13 }
 0x6a4   : > { %2034 = vrot.lane.b32.xlu1 %v3194_v40, %s3720_s0  ;;  %v2374_v40 = vld [vmem:[#allocation12 + $0x160] sm:$0xff]  ;;  %s3619_s0 = scalar_lea.vmem %s3618_s4, 4096 }
 0x6a5   : > { %2130 = vrot.lane.b32.xlu0 %v3199_v41, %s3721_s17  ;;  %v3296_v49 = vpack.c.bf16 %v2374_v40, %v2366_v39  ;;  %p3616_p4 = pneg %p3615_p0  ;;  %p3621_p6 = scmp.lt.s32.totalorder %s3619_s0, %s3613_s20 }
 0x6a7   : > { %p3622_p8 = por %p3621_p6, %p3620_p3 }
 0x6a8   : > { %2226 = vrot.lane.b32.xlu1 %v3204_v55, %s3722_s26  ;;  %v2384_v55 = vld [vmem:[#allocation12 + $0x1b0] sm:$0xff] }
 0x6a9   : > { %2322 = vrot.lane.b32.xlu0 %v3209_v2, %s3723_s24  ;;  %v3316_v58 = vpack.c.bf16 %v2392_v56, %v2384_v55  ;;  %v2406_v2 = vsub.s32 2, %v2397_v63  ;;  %p3623_p10 = pnand %p3622_p8, %p3616_p4 }
 0x6f3   : > { %v1747_v4 = vpop.permute.xlu0 %1746 }
 0x6f4   : > { %1751 = vst.msk [vmem:[#allocation3 + $0x8] sm:$0xff] %vm832_vm3, %v1747_v4  ;;  %v1745_v5 = vpop.permute.xlu1 %1744  ;;  %v2402_v4 = vsub.s32 1, %v2397_v63 }
 0x6f5   : > { %1750 = vst.msk [vmem:[#allocation3] sm:$0xff] %vm832_vm3, %v1745_v5  ;;  %v2410_v5 = vsub.s32 3, %v2397_v63 }
 0x703   : > { %v1937_v6 = vpop.permute.xlu1 %1936 }
 0x707   : > { %v2033_v7 = vpop.permute.xlu0 %2032  ;;  %v2129_v8 = vpop.permute.xlu1 %2128 }
 0x70b   : > { %v1841_v9 = vpop.permute.xlu0 %1840 }
 0x70c   : > { %1846 = vst.msk [vmem:[#allocation3] sm:$0xff] %vm938_vm4, %v1841_v9  ;;  %v2411_v9 = vrot.slane %v2394_v3, %v2410_v5 }
 0x70d   : > { %1942 = vst.msk [vmem:[#allocation3] sm:$0xff] %vm1044_vm5, %v1937_v6  ;;  %v2399_v6 = vrot.slane %v2394_v3, %v2398_v0 }
 0x70e   : > { %2038 = vst.msk [vmem:[#allocation3] sm:$0xff] %vm1150_vm6, %v2033_v7  ;;  %v2321_v10 = vpop.permute.xlu1 %2320  ;;  %v2407_v7 = vrot.slane %v2394_v3, %v2406_v2 }
 0x70f   : > { %2134 = vst.msk [vmem:[#allocation3] sm:$0xff] %vm1256_vm7, %v2129_v8  ;;  %v2225_v11 = vpop.permute.xlu0 %2224  ;;  %v2403_v8 = vrot.slane %v2394_v3, %v2402_v4 }
 0x710   : > { %2230 = vst.msk [vmem:[#allocation3] sm:$0xff] %vm1362_vm8, %v2225_v11 }
 0x711   : > { %2326 = vst.msk [vmem:[#allocation3] sm:$0xff] %vm1468_vm9, %v2321_v10 }
 0x712   : > { %v1843_v59 = vpop.permute.xlu1 %1842 }
 0x713   : > { %1847 = vst.msk [vmem:[#allocation3 + $0x8] sm:$0xff] %vm938_vm4, %v1843_v59  ;;  %v1939_v13 = vpop.permute.xlu0 %1938 }
 0x714   : > { %1943 = vst.msk [vmem:[#allocation3 + $0x8] sm:$0xff] %vm1044_vm5, %v1939_v13 }
 0x716   : > { %v2035_v20 = vpop.permute.xlu1 %2034 }
 0x717   : > { %2039 = vst.msk [vmem:[#allocation3 + $0x8] sm:$0xff] %vm1150_vm6, %v2035_v20  ;;  %v2131_v26 = vpop.permute.xlu0 %2130 }
 0x718   : > { %2135 = vst.msk [vmem:[#allocation3 + $0x8] sm:$0xff] %vm1256_vm7, %v2131_v26  ;;  %v2328_v33 = vld [vmem:[#allocation3] sm:$0xff] }
 0x719   : > { %2981 = vmatmul.mubr.msk.f32.vlgmr.msra.gmra.mrb[16].mxu0 %vm464_vm1, %v2328_v33  ;;  %2983 = vmatmul.mubr.msk.f32.vlgmr.msra.gmra.mrb[22].mxu1 %vm464_vm1, %v2328_v33 }
 0x71a   : > { %3289 = vmatpush1.bf16.msra.mxu0 %v3288_v21  ;;  %3305 = vmatpush1.bf16.msra.mxu1 %v3304_v22  ;;  %v2227_v36 = vpop.permute.xlu1 %2226 }
 0x71b   : > { %2231 = vst.msk [vmem:[#allocation3 + $0x8] sm:$0xff] %vm1362_vm8, %v2227_v36  ;;  %v2323_v41 = vpop.permute.xlu0 %2322  ;;  %3291 = vmatprep.subr.bf16.mxu0 %v3290_v27  ;;  %3307 = vmatprep.subr.bf16.mxu1 %v3306_v28  ;;  %v2415_v27 = vrot.slane %v2394_v3, %v2414_v15  ;;  %v2423_v28 = vrot.slane %v2394_v3, %v2422_v16 }
 0x71c   : > { %2327 = vst.msk [vmem:[#allocation3 + $0x8] sm:$0xff] %vm1468_vm9, %v2323_v41  ;;  %2512 = vmatprep.mubr.f32.mxu0 %v3709_v1  ;;  %2589 = vmatprep.mubr.f32.mxu1 %v3709_v1 }
 0x71e   : > { %3293 = vmatpush1.bf16.msra.mxu0 %v3292_v37  ;;  %3309 = vmatpush1.bf16.msra.mxu1 %v3308_v38 }
 0x71f   : > { %3295 = vmatprep.subr.bf16.mxu0 %v3294_v42  ;;  %3311 = vmatprep.subr.bf16.mxu1 %v3310_v43 }
 0x722   : > { %3297 = vmatpush1.bf16.msra.mxu0 %v3296_v49  ;;  %3313 = vmatpush1.bf16.msra.mxu1 %v3312_v50 }
 0x723   : > { %v2329_v61 = vld [vmem:[#allocation3 + $0x8] sm:$0xff]  ;;  %3299 = vmatprep.subr.bf16.mxu0 %v3298_v52  ;;  %3315 = vmatprep.subr.bf16.mxu1 %v3314_v53 }
 0x724   : > { %2982 = vmatmul.mubr.msk.f32.gmra.mrb[18].mxu0 %vm464_vm1, %v2329_v61  ;;  %2984 = vmatmul.mubr.msk.f32.gmra.mrb[24].mxu1 %vm464_vm1, %v2329_v61 }
 0x725   : > { %2660 = vmatprep.mubr.f32.mxu0 %v3709_v1  ;;  %2737 = vmatprep.mubr.f32.mxu1 %v3709_v1 }
 0x726   : > { %3301 = vmatpush1.bf16.msra.mxu0 %v3300_v57  ;;  %3317 = vmatpush1.bf16.msra.mxu1 %v3316_v58 }
 0x729   : > { %2985 = vmatmul.mubr.msk.f32.vlgmr.msra.gmra.mrb[20].mxu0 %vm464_vm1, %v2328_v33  ;;  %2987 = vmatmul.mubr.msk.f32.vlgmr.msra.gmra.mrb[26].mxu1 %vm464_vm1, %v2328_v33 }
 0x72a   : > { %2666 = vmatprep.mubr.f32.mxu0 %v3709_v1  ;;  %2743 = vmatprep.mubr.f32.mxu1 %v3709_v1 }
 0x72d   : > { %2986 = vmatmul.mubr.msk.f32.gmra.mrb[22].mxu0 %vm464_vm1, %v2329_v61  ;;  %2988 = vmatmul.mubr.msk.f32.gmra.mrb[28].mxu1 %vm464_vm1, %v2329_v61 }
 0x7ec   : > { %v2508_v1 = vpop.f32.mrb[16].mxu0  ;;  %v2585_v10 = vpop.f32.mrb[22].mxu1 }
 0x7ed   : > { %v2509_v11 = vadd.f32 %v2508_v1, %v2399_v6  ;;  %v2586_v59 = vadd.f32 %v2585_v10, %v2407_v7  ;;  %v2510_v60 = vpop.f32.mrb[17].mxu0  ;;  %v2587_v12 = vpop.f32.mrb[23].mxu1 }
 0x7ee   : > { %v2511_v13 = vadd.f32 %v2510_v60, %v2403_v8  ;;  %v2588_v14 = vadd.f32 %v2587_v12, %v2411_v9 }
 0x7ef   : > { %2750 = vst [vmem:[%s4328_s9] sm:$0xff] %v2509_v11  ;;  %2752 = vst [vmem:[%s4328_s9 + $0x10] sm:$0xff] %v2586_v59 }
 0x7f0   : > { %2751 = vst [vmem:[%s4328_s9 + $0x8] sm:$0xff] %v2511_v13  ;;  %2753 = vst [vmem:[%s4328_s9 + $0x18] sm:$0xff] %v2588_v14 }
 0x7f7   : > { %v2514_v19 = vpop.f32.mrb[18].mxu0  ;;  %v2591_v20 = vpop.f32.mrb[24].mxu1 }
 0x7f8   : > { %v2515_v21 = vadd.f32 %v2514_v19, %v2399_v6  ;;  %v2592_v22 = vadd.f32 %v2591_v20, %v2407_v7  ;;  %v2516_v23 = vpop.f32.mrb[19].mxu0  ;;  %v2593_v24 = vpop.f32.mrb[25].mxu1 }
 0x7f9   : > { %v2517_v25 = vadd.f32 %v2516_v23, %v2403_v8  ;;  %v2594_v26 = vadd.f32 %v2593_v24, %v2411_v9 }
 0x7fa   : > { %2758 = vst [vmem:[%s4328_s9 + $0x40] sm:$0xff] %v2515_v21  ;;  %2760 = vst [vmem:[%s4328_s9 + $0x50] sm:$0xff] %v2592_v22 }
 0x7fb   : > { %2759 = vst [vmem:[%s4328_s9 + $0x48] sm:$0xff] %v2517_v25  ;;  %2761 = vst [vmem:[%s4328_s9 + $0x58] sm:$0xff] %v2594_v26 }
 0x7fc   : > { %v2662_v31 = vpop.f32.mrb[20].mxu0  ;;  %v2739_v33 = vpop.f32.mrb[26].mxu1 }
 0x7fd   : > { %v2663_v34 = vadd.f32 %v2662_v31, %v2415_v27  ;;  %v2740_v35 = vadd.f32 %v2739_v33, %v2423_v28  ;;  %v2664_v36 = vpop.f32.mrb[21].mxu0  ;;  %v2741_v37 = vpop.f32.mrb[27].mxu1 }
 0x7fe   : > { %v2665_v38 = vadd.f32 %v2664_v36, %v2419_v29  ;;  %v2742_v39 = vadd.f32 %v2741_v37, %v2427_v30 }
 0x7ff   : > { %2754 = vst [vmem:[%s4328_s9 + $0x20] sm:$0xff] %v2663_v34  ;;  %2756 = vst [vmem:[%s4328_s9 + $0x30] sm:$0xff] %v2740_v35 }
 0x800   : > { %2755 = vst [vmem:[%s4328_s9 + $0x28] sm:$0xff] %v2665_v38  ;;  %2757 = vst [vmem:[%s4328_s9 + $0x38] sm:$0xff] %v2742_v39  ;;  %v2668_v40 = vpop.f32.mrb[22].mxu0  ;;  %v2745_v41 = vpop.f32.mrb[28].mxu1 }
 0x801   : > { %v2669_v42 = vadd.f32 %v2668_v40, %v2415_v27  ;;  %v2746_v43 = vadd.f32 %v2745_v41, %v2423_v28  ;;  %v2670_v32 = vpop.f32.mrb[23].mxu0  ;;  %v2747_v44 = vpop.f32.mrb[29].mxu1 }
 0x802   : > { %v2671_v45 = vadd.f32 %v2670_v32, %v2419_v29  ;;  %v2748_v46 = vadd.f32 %v2747_v44, %v2427_v30 }
 0x803   : > { %2762 = vst [vmem:[%s4328_s9 + $0x60] sm:$0xff] %v2669_v42  ;;  %2764 = vst [vmem:[%s4328_s9 + $0x70] sm:$0xff] %v2746_v43 }
 0x804   : > { %2763 = vst [vmem:[%s4328_s9 + $0x68] sm:$0xff] %v2671_v45  ;;  %2765 = vst [vmem:[%s4328_s9 + $0x78] sm:$0xff] %v2748_v46 }
 0x805   : > { %3626 = shalt.err (!%p3623_p10)
}
 0x806   : > { %s3627_s17 = scalar_lea.hbm %s4347_s21, 2048  ;;  %s3631_s18 = scalar_lea.hbm %s4449_s13, 4096 }
 0x807   : > { %p3628_p11 = scmp.ne.s32.totalorder %s4347_s21, %s3627_s17  ;;  %p3632_p7 = scmp.lt.u32.totalorder %s4347_s21, %s4449_s13 }
 0x808   : > { %p3633_p12 = scmp.lt.u32.totalorder %s3631_s18, %s3627_s17  ;;  %p3635_p2 = scmp.lt.u32.totalorder %s3627_s17, %s4347_s21 }
 0x809   : > { %p3629_p9 = pnand %p3628_p11, %p4450_p13 }
 0x80a   : > { %p3634_p1 = por %p3633_p12, %p3632_p7 }
 0x80b   : > { %p3630_p5 = pneg %p3629_p9 }
 0x80c   : > { %p3636_p0 = por %p3635_p2, %p3634_p1 }
 0x80e   : > { %p3637_p4 = pnand %p3636_p0, %p3630_p5 }
 0x810   : > { %3640 = shalt.err (!%p3637_p4)
}
 0x811   : > { %s3726_s9 = smov 1024  }
 0x812   : > { %3338 = dma.vmem_to_hbm [thread:$0]  (%p4450_p13), %s4349_s19, 2048, %s4347_s21, %s2767_s23, %s3726_s9, %s3726_s9, %s3724_s15  }
 0x813 PF: > { %s4451_s29 = sld [smem:[#allocation22_spill]]  ;;  %s4452_s25 = sld [smem:[#allocation23_spill]] }
 0x814   : > { %p4454_p6 = scmp.ge.s32.totalorder %s3695_s12, 2 }
 0x819   : > { %s2795_s30 = sand.u32 1, %s4451_s29   ;;  %p4453_p3 = scmp.ne.s32.totalorder %s4452_s25, 0 }
 0x81a   : > { %s2796_s20 = scalar_lea.sflag [#allocation6], %s2795_s30 }
 0x81b   : > { %p3361_p8 = pnand %p4454_p6, %p4453_p3 }
 0x81d   : > { %3678 = dma.done.wait (!%p3361_p8), %s2796_s20, 2048  }
 0x81e   : > { %3680 = vsyncadd (!%p3361_p8), %s2796_s20, 4294965248  ;;  %p27_p10 = scmp.ge.s32.totalorder %s3935_s14, 4   ;;  %s4455_s30 = smov %s3687_s10 }
 0x81f   : > { %s4456_s10 = smov %s3691_s11  ;;  %s4457_s11 = smov %s3951_s27 }
 0x820   : > { %s4458_s12 = smov %s3935_s14  ;;  %29 = sbr.rel (!%p27_p10) target bundleno = 15 (0xf), region = 130 }
 0x827   :  { %2801 = vsyncpa [#allocation5], 1 }
 0x828   :  { %2803 = vsyncpa [#allocation5 + $0x1], 1 }
 0x829   :  { %2804 = vsyncpa [#allocation8], 1 }
 0x82a   :  { %2806 = vsyncpa [#allocation8 + $0x1], 1 }
 0x82b   :  { %2807 = vsyncpa [#allocation11], 1 }
 0x82c   :  { %2808 = vsyncpa [#allocation14], 1 }
 0x82d   :  { %2809 = vsyncpa [#allocation6], 1 }
 0x82e   :  { %2811 = vsyncpa [#allocation6 + $0x1], 1 }

</bundles_post_ra>
